<compile_context>
chip_gen: v7x
topology: tpu7x:2x2x1
jax: 0.10.0
libtpu: 0.0.40
codegen_flags: <defaults>
</compile_context>

<pallas_src>
import functools
import math

import jax
import jax.numpy as jnp
from jax import lax
from jax.experimental import pallas as pl
from jax.experimental.pallas import tpu as pltpu

BN_EPS = 1e-5
TM_CAP = 512   # lane-tile cap (multiple of 128) -> VMEM headroom on v5e/v7x


# ----------------------------- Pallas kernels ------------------------------

def _pw_kernel(*refs, act, has_gate, skip_mode):
    """Fused 1x1-conv kernel.

    o = act( scale * (W @ (x * gate?)) + bias  [+ skip | + BN(Wp @ xs)] )
    Block shapes: x (1, Cin, TM), W (Cout, Cin), scale/bias (Cout, 1),
    gate (1, Cin, 1), skip (1, Cout, TM), xs (1, CinP, TM), o (1, Cout, TM).
    """
    x_ref, w_ref, s_ref, b_ref = refs[0], refs[1], refs[2], refs[3]
    i = 4
    gate_ref = None
    if has_gate:
        gate_ref = refs[i]; i += 1
    if skip_mode == "identity":
        skip_ref = refs[i]; i += 1
    elif skip_mode == "proj":
        xs_ref, wp_ref, sp_ref, bp_ref = refs[i], refs[i + 1], refs[i + 2], refs[i + 3]
        i += 4
    o_ref = refs[i]

    x = x_ref[0]                                    # [Cin, TM]  (lane dense)
    if has_gate:
        x = x * gate_ref[0]                         # SE excite, [Cin,1] bcast
    y = jnp.dot(w_ref[...], x, preferred_element_type=jnp.float32)
    y = y * s_ref[...] + b_ref[...]                 # folded BN
    if skip_mode == "identity":
        y = y + skip_ref[0]
    elif skip_mode == "proj":
        sk = jnp.dot(wp_ref[...], xs_ref[0], preferred_element_type=jnp.float32)
        y = y + (sk * sp_ref[...] + bp_ref[...])
    if act == "relu":
        y = jnp.maximum(y, 0.0)
    o_ref[0] = y


def _conv3x3_kernel(x_ref, w_ref, scale_ref, bias_ref, o_ref, *, ksize, wp, act):
    """3x3 conv as K*K shifted dots on the padded flattened input.

    x (1, Cin, Lin) is the zero-padded image flattened over (Hp, Wp); the tap
    (di, dj) contribution is W_t @ x[:, off : off+Lout] with off = di*Wp + dj.
    Output covers the dense padded grid; the wrapper extracts valid / strided
    positions.  BN + activation fused in the epilogue.
    """
    lout = o_ref.shape[2]
    o_ref[0] = jnp.dot(w_ref[0], x_ref[0, :, 0:lout],
                       preferred_element_type=jnp.float32)
    for t in range(1, ksize * ksize):
        di, dj = divmod(t, ksize)
        off = di * wp + dj
        o_ref[0] += jnp.dot(w_ref[t], x_ref[0, :, off:off + lout],
                            preferred_element_type=jnp.float32)
    y = o_ref[0] * scale_ref[...] + bias_ref[...]
    if act == "relu":
        y = jnp.maximum(y, 0.0)
    o_ref[0] = y


def _se_gate_kernel(f_ref, w1_ref, b1_ref, w2_ref, b2_ref, g_ref):
    """SE gate: sigmoid(W2 @ relu(W1 @ mean_hw(f) + b1) + b2), per image."""
    m = jnp.mean(f_ref[0], axis=1, keepdims=True)                 # [Cb, 1]
    h = jnp.dot(w1_ref[...], m, preferred_element_type=jnp.float32) + b1_ref[...]
    h = jnp.maximum(h, 0.0)
    s = jnp.dot(w2_ref[...], h, preferred_element_type=jnp.float32) + b2_ref[...]
    g_ref[0] = jax.nn.sigmoid(s)                                  # [Cb, 1]


# ------------------------------- wrappers -----------------------------------

def fold_bn(bn):
    scale = bn["gamma"] / jnp.sqrt(bn["var"] + BN_EPS)
    bias = bn["beta"] - bn["mean"] * scale
    return scale, bias


def pointwise_conv(x, w, bn, act, gate=None, skip=None):
    """x: [N, Cin, M]; w: [Cout, Cin] -> [N, Cout, M] (1x1 conv + BN + act,
    optionally fused SE gate on the input and residual/projection skip)."""
    n, cin, m = x.shape
    cout = w.shape[0]
    scale, bias = fold_bn(bn)
    tm = m if m <= TM_CAP else TM_CAP
    grid = (n, pl.cdiv(m, tm))

    in_specs = [
        pl.BlockSpec((1, cin, tm), lambda i, j: (i, 0, j)),
        pl.BlockSpec((cout, cin), lambda i, j: (0, 0)),
        pl.BlockSpec((cout, 1), lambda i, j: (0, 0)),
        pl.BlockSpec((cout, 1), lambda i, j: (0, 0)),
    ]
    args = [x, w, scale.reshape(cout, 1), bias.reshape(cout, 1)]

    has_gate = gate is not None
    if has_gate:
        cg = gate.shape[1]
        in_specs.append(pl.BlockSpec((1, cg, 1), lambda i, j: (i, 0, 0)))
        args.append(gate)

    skip_mode = None
    if skip is not None:
        skip_mode = skip[0]
        if skip_mode == "identity":
            in_specs.append(pl.BlockSpec((1, cout, tm), lambda i, j: (i, 0, j)))
            args.append(skip[1])
        else:  # "proj"
            xs, wp, bnp = skip[1], skip[2], skip[3]
            cin_p = wp.shape[1]
            ps, pb = fold_bn(bnp)
            in_specs += [
                pl.BlockSpec((1, cin_p, tm), lambda i, j: (i, 0, j)),
                pl.BlockSpec((cout, cin_p), lambda i, j: (0, 0)),
                pl.BlockSpec((cout, 1), lambda i, j: (0, 0)),
                pl.BlockSpec((cout, 1), lambda i, j: (0, 0)),
            ]
            args += [xs, wp, ps.reshape(cout, 1), pb.reshape(cout, 1)]

    kern = functools.partial(_pw_kernel, act=act, has_gate=has_gate,
                             skip_mode=skip_mode)
    return pl.pallas_call(
        kern,
        out_shape=jax.ShapeDtypeStruct((n, cout, m), jnp.float32),
        grid=grid,
        in_specs=in_specs,
        out_specs=pl.BlockSpec((1, cout, tm), lambda i, j: (i, 0, j)),
        compiler_params=pltpu.CompilerParams(
            dimension_semantics=("parallel", "parallel")),
    )(*args)


def conv3x3_bn_act(x, hw, wtaps, bn, stride, pad, act):
    """x: [N, Cin, H*W]; wtaps: [9, Cout, Cin] -> ([N, Cout, Ho*Wo], (Ho, Wo)).

    The padded input image is flattened over (Hp, Wp) and DMA'd to the kernel
    once; the kernel accumulates the 9 shifted taps (no im2col materialized).
    """
    n, cin, _ = x.shape
    h, w = hw
    k = 3
    cout = wtaps.shape[1]

    hp_ext = h + 2 * pad + (k - 1)          # extra bottom rows keep shifted
    wp = w + 2 * pad                        # flat reads in-bounds
    ho = (h + 2 * pad - k) // stride + 1
    wo = (w + 2 * pad - k) // stride + 1
    ho_span = (ho - 1) * stride + 1
    lout = ho_span * wp
    lin = hp_ext * wp

    x4 = x.reshape(n, cin, h, w)
    xp = jnp.pad(x4, ((0, 0), (0, 0), (pad, pad + k - 1), (pad, pad)))
    xf = xp.reshape(n, cin, lin)

    scale, bias = fold_bn(bn)
    kern = functools.partial(_conv3x3_kernel, ksize=k, wp=wp, act=act)
    y = pl.pallas_call(
        kern,
        out_shape=jax.ShapeDtypeStruct((n, cout, lout), jnp.float32),
        grid=(n,),
        in_specs=[
            pl.BlockSpec((1, cin, lin), lambda i: (i, 0, 0)),
            pl.BlockSpec((k * k, cout, cin), lambda i: (0, 0, 0)),
            pl.BlockSpec((cout, 1), lambda i: (0, 0)),
            pl.BlockSpec((cout, 1), lambda i: (0, 0)),
        ],
        out_specs=pl.BlockSpec((1, cout, lout), lambda i: (i, 0, 0)),
        compiler_params=pltpu.CompilerParams(
            dimension_semantics=("parallel",)),
    )(xf, wtaps, scale.reshape(cout, 1), bias.reshape(cout, 1))

    # extract valid (and stride-subsampled) output positions
    y = y.reshape(n, cout, ho_span, wp)
    y = y[:, :, ::stride, 0:(wo - 1) * stride + 1:stride]
    return y.reshape(n, cout, ho * wo), (ho, wo)


def se_gate(f, se):
    """f: [N, Cb, M] -> gate [N, Cb, 1] (squeeze + fc1 + relu + fc2 + sigmoid)."""
    n, cb, m = f.shape
    cse = se["w1"].shape[0]
    return pl.pallas_call(
        _se_gate_kernel,
        out_shape=jax.ShapeDtypeStruct((n, cb, 1), jnp.float32),
        grid=(n,),
        in_specs=[
            pl.BlockSpec((1, cb, m), lambda i: (i, 0, 0)),
            pl.BlockSpec((cse, cb), lambda i: (0, 0)),
            pl.BlockSpec((cse, 1), lambda i: (0, 0)),
            pl.BlockSpec((cb, cse), lambda i: (0, 0)),
            pl.BlockSpec((cb, 1), lambda i: (0, 0)),
        ],
        out_specs=pl.BlockSpec((1, cb, 1), lambda i: (i, 0, 0)),
        compiler_params=pltpu.CompilerParams(
            dimension_semantics=("parallel",)),
    )(f, se["w1"], se["b1"].reshape(cse, 1), se["w2"], se["b2"].reshape(cb, 1))


# ------------------------------ network glue --------------------------------

def res_bottleneck_block(x, hw, p):
    h, w = hw
    n, cin, _ = x.shape
    s = p["stride"]

    # conv_a (1x1) + BN + ReLU
    fa = pointwise_conv(x, p["a"]["w"], p["a"]["bn"], act="relu")
    # conv_b (3x3 grouped, stride s) + BN + ReLU
    fb, (ho, wo) = conv3x3_bn_act(fa, (h, w), p["b"]["w"], p["b"]["bn"],
                                  stride=s, pad=1, act="relu")
    # SE gate (excite multiply is fused into conv_c below)
    gate = se_gate(fb, p["se"]) if p["se"] is not None else None

    # conv_c (1x1) + BN + [SE excite on input] + [skip (identity or proj+BN)]
    # + residual add + ReLU, all in one kernel
    if p["proj"] is not None:
        xs = x.reshape(n, cin, h, w)[:, :, 0:(ho - 1) * s + 1:s,
                                     0:(wo - 1) * s + 1:s]
        xs = xs.reshape(n, cin, ho * wo)
        out = pointwise_conv(fb, p["c"]["w"], p["c"]["bn"], act="relu",
                             gate=gate,
                             skip=("proj", xs, p["proj"]["w"], p["proj"]["bn"]))
    else:
        out = pointwise_conv(fb, p["c"]["w"], p["c"]["bn"], act="relu",
                             gate=gate, skip=("identity", x))
    return out, (ho, wo)


def anynet_forward(x_nchw, params):
    n, c, h, w = x_nchw.shape
    x = x_nchw.reshape(n, c, h * w)               # NCHW -> [N, C, H*W] (free)
    st = params["stem"]
    # SimpleStemIN: 3x3 conv stride 2 pad 1, BN, ReLU
    x, (h, w) = conv3x3_bn_act(x, (h, w), st["w"], st["bn"],
                               stride=2, pad=1, act="relu")
    for stage in params["stages"]:
        for blk in stage:
            x, (h, w) = res_bottleneck_block(x, (h, w), blk)
    n, c, _ = x.shape
    return x.reshape(n, c, h, w)                  # back to NCHW (free)


# ------------------------- parameter construction ---------------------------

def make_bn(key, c):
    # non-trivial running stats / affine so BN folding is genuinely exercised
    k1, k2, k3, k4 = jax.random.split(key, 4)
    return dict(
        gamma=1.0 + 0.2 * jax.random.normal(k1, (c,), jnp.float32),
        beta=0.1 * jax.random.normal(k2, (c,), jnp.float32),
        mean=0.1 * jax.random.normal(k3, (c,), jnp.float32),
        var=1.0 + 0.2 * jax.random.uniform(k4, (c,), jnp.float32),
    )


def conv1x1_weight(key, cin, cout):
    std = math.sqrt(2.0 / cout)                   # fan_out = 1*1*cout
    return std * jax.random.normal(key, (cout, cin), jnp.float32)


def conv3x3_weight(key, cin, cout):
    std = math.sqrt(2.0 / (9 * cout))             # fan_out = 3*3*cout
    return std * jax.random.normal(key, (9, cout, cin), jnp.float32)


def grouped_conv3x3_weight(key, cin, cout, groups):
    # block-diagonal dense taps (numerically identical to a grouped conv)
    cig, cog = cin // groups, cout // groups
    std = math.sqrt(2.0 / (9 * cout))
    w = jnp.zeros((9, cout, cin), jnp.float32)
    keys = jax.random.split(key, groups)
    for g in range(groups):
        wg = std * jax.random.normal(keys[g], (9, cog, cig), jnp.float32)
        w = w.at[:, g * cog:(g + 1) * cog, g * cig:(g + 1) * cig].set(wg)
    return w


def build_params(key, cfg):
    keys = iter(jax.random.split(key, 256))
    stem_w = cfg["stem_w"]
    params = {"stem": {"w": conv3x3_weight(next(keys), 3, stem_w),
                       "bn": make_bn(next(keys), stem_w)},
              "stages": []}
    prev_w = stem_w
    for d, w, s, bm, gw in zip(cfg["ds"], cfg["ws"], cfg["ss"],
                               cfg["bms"], cfg["gws"]):
        stage = []
        for i in range(d):
            b_stride = s if i == 0 else 1
            b_w_in = prev_w if i == 0 else w
            w_b = int(round(w * bm))
            num_gs = w_b // gw
            proj = None
            if b_w_in != w or b_stride != 1:
                proj = {"w": conv1x1_weight(next(keys), b_w_in, w),
                        "bn": make_bn(next(keys), w)}
            se = None
            if cfg["se_r"]:
                w_se = int(round(b_w_in * cfg["se_r"]))
                se = {"w1": math.sqrt(2.0 / w_se)
                            * jax.random.normal(next(keys), (w_se, w_b), jnp.float32),
                      "b1": 0.1 * jax.random.normal(next(keys), (w_se,), jnp.float32),
                      "w2": math.sqrt(2.0 / w_b)
                            * jax.random.normal(next(keys), (w_b, w_se), jnp.float32),
                      "b2": 0.1 * jax.random.normal(next(keys), (w_b,), jnp.float32)}
            blk = {"stride": b_stride,
                   "proj": proj,
                   "a": {"w": conv1x1_weight(next(keys), b_w_in, w_b),
                         "bn": make_bn(next(keys), w_b)},
                   "b": {"w": grouped_conv3x3_weight(next(keys), w_b, w_b, num_gs),
                         "bn": make_bn(next(keys), w_b)},
                   "se": se,
                   "c": {"w": conv1x1_weight(next(keys), w_b, w),
                         "bn": make_bn(next(keys), w)}}
            stage.append(blk)
        params["stages"].append(stage)
        prev_w = w
    return params


# ------------------------- pure-JAX reference check -------------------------

def _bn_ref(y, bn):
    g = bn["gamma"][None, :, None, None]
    b = bn["beta"][None, :, None, None]
    m = bn["mean"][None, :, None, None]
    v = bn["var"][None, :, None, None]
    return (y - m) / jnp.sqrt(v + BN_EPS) * g + b


def _ref_conv1x1(x, w2d, stride=1):
    w4 = w2d[:, :, None, None]
    return lax.conv_general_dilated(
        x, w4, (stride, stride), [(0, 0), (0, 0)],
        dimension_numbers=("NCHW", "OIHW", "NCHW"),
        precision=lax.Precision.HIGHEST)


def _ref_conv3x3(x, wtaps, stride, pad):
    cout, cin = wtaps.shape[1], wtaps.shape[2]
    w4 = wtaps.reshape(3, 3, cout, cin).transpose(2, 3, 0, 1)
    return lax.conv_general_dilated(
        x, w4, (stride, stride), [(pad, pad), (pad, pad)],
        dimension_numbers=("NCHW", "OIHW", "NCHW"),
        precision=lax.Precision.HIGHEST)


def _ref_block(x, p):
    s = p["stride"]
    if p["proj"] is not None:
        skip = _bn_ref(_ref_conv1x1(x, p["proj"]["w"], stride=s), p["proj"]["bn"])
    else:
        skip = x
    f = jnp.maximum(_bn_ref(_ref_conv1x1(x, p["a"]["w"]), p["a"]["bn"]), 0.0)
    f = jnp.maximum(_bn_ref(_ref_conv3x3(f, p["b"]["w"], s, 1), p["b"]["bn"]), 0.0)
    if p["se"] is not None:
        se = p["se"]
        m = jnp.mean(f, axis=(2, 3))
        h = jnp.maximum(m @ se["w1"].T + se["b1"], 0.0)
        g = jax.nn.sigmoid(h @ se["w2"].T + se["b2"])
        f = f * g[:, :, None, None]
    f = _bn_ref(_ref_conv1x1(f, p["c"]["w"]), p["c"]["bn"])
    return jnp.maximum(skip + f, 0.0)


def ref_forward(x_nchw, params):
    st = params["stem"]
    x = jnp.maximum(_bn_ref(_ref_conv3x3(x_nchw, st["w"], 2, 1), st["bn"]), 0.0)
    for stage in params["stages"]:
        for blk in stage:
            x = _ref_block(x, blk)
    return x


# ----------------------------------- main -----------------------------------

if __name__ == "__main__":
    cfg = dict(stem_type="simple_stem_in", stem_w=8,
               block_type="res_bottleneck_block",
               ds=[1, 1], ws=[8, 16], ss=[1, 2],
               bms=[1.0, 1.0], gws=[4, 4], se_r=0.25, nc=10)
    # NOTE: the reference AnyNet.construct builds no classification head, so
    # the forward output is the final feature map (nc is unused there too).

    key = jax.random.PRNGKey(0)
    kp, kx = jax.random.split(key)
    params = build_params(kp, cfg)

    # PyTorch-style NCHW input: batch=2, 3 channels, 16x16 spatial.
    x = jax.random.normal(kx, (2, 3, 16, 16), jnp.float32)

    fwd = jax.jit(lambda inp: anynet_forward(inp, params))
    out = jax.block_until_ready(fwd(x))
    ref = jax.block_until_ready(ref_forward(x, params))

    assert out.shape == (2, 16, 4, 4), out.shape
    assert bool(jnp.all(jnp.isfinite(out)))
    err = float(jnp.max(jnp.abs(out - ref)))
    scale = float(jnp.max(jnp.abs(ref)))
    assert err <= 5e-2 * max(1.0, scale), (err, scale)

    print("KERNEL_OK")
</pallas_src>

<mosaic_0001>
module attributes {stable_mosaic.version = 11 : i64} {
  func.func @_conv3x3_kernel(%arg0: i32, %arg1: memref<1x3x360xf32, #tpu.memory_space<vmem>>, %arg2: memref<9x8x3xf32, #tpu.memory_space<vmem>>, %arg3: memref<8x1xf32, #tpu.memory_space<vmem>>, %arg4: memref<8x1xf32, #tpu.memory_space<vmem>>, %arg5: memref<1x8x270xf32, #tpu.memory_space<vmem>>) attributes {dimension_semantics = [#tpu.dimension_semantics<parallel>], iteration_bounds = array<i64: 2>, scalar_prefetch = 0 : i64, scratch_operands = 0 : i64, tpu.core_type = #tpu.core_type<tc>, window_params = [{transform_indices = @transform_0, window_bounds = array<i64: 1, 3, 360>}, {pipeline_mode = #tpu.pipeline_mode<synchronous>, transform_indices = @transform_1, window_bounds = array<i64: 9, 8, 3>}, {pipeline_mode = #tpu.pipeline_mode<synchronous>, transform_indices = @transform_2, window_bounds = array<i64: 8, 1>}, {pipeline_mode = #tpu.pipeline_mode<synchronous>, transform_indices = @transform_3, window_bounds = array<i64: 8, 1>}, {transform_indices = @transform_4, window_bounds = array<i64: 1, 8, 270>}]} {
    %c0 = arith.constant 0 : index
    %c0_0 = arith.constant 0 : index
    %c0_1 = arith.constant 0 : index
    %0 = vector.load %arg2[%c0, %c0_0, %c0_1] : memref<9x8x3xf32, #tpu.memory_space<vmem>>, vector<1x8x3xf32>
    %1 = vector.shape_cast %0 : vector<1x8x3xf32> to vector<8x3xf32>
    %c0_2 = arith.constant 0 : index
    %c0_3 = arith.constant 0 : index
    %c0_4 = arith.constant 0 : index
    %2 = vector.load %arg1[%c0_2, %c0_3, %c0_4] : memref<1x3x360xf32, #tpu.memory_space<vmem>>, vector<1x3x270xf32>
    %3 = vector.shape_cast %2 : vector<1x3x270xf32> to vector<3x270xf32>
    %cst = arith.constant dense<0.000000e+00> : vector<8x270xf32>
    %4 = tpu.matmul %1, %3, %cst {dimension_numbers = #tpu.dot_dimension_numbers<[1], [0], [0], [1], [0, 0, 1, 1], [], []>} : vector<8x3xf32>, vector<3x270xf32>, vector<8x270xf32> -> vector<8x270xf32>
    %c0_5 = arith.constant 0 : index
    %c0_6 = arith.constant 0 : index
    %c0_7 = arith.constant 0 : index
    %5 = vector.load %arg5[%c0_5, %c0_6, %c0_7] : memref<1x8x270xf32, #tpu.memory_space<vmem>>, vector<1x8x270xf32>
    %6 = vector.shape_cast %5 : vector<1x8x270xf32> to vector<8x270xf32>
    %7 = vector.shape_cast %4 : vector<8x270xf32> to vector<1x8x270xf32>
    tpu.vector_store %arg5[%c0_5, %c0_6, %c0_7], %7 {strides = array<i32>} : memref<1x8x270xf32, #tpu.memory_space<vmem>>, vector<1x8x270xf32>,
    %c0_8 = arith.constant 0 : index
    %c0_9 = arith.constant 0 : index
    %c0_10 = arith.constant 0 : index
    %8 = vector.load %arg5[%c0_8, %c0_9, %c0_10] : memref<1x8x270xf32, #tpu.memory_space<vmem>>, vector<1x8x270xf32>
    %9 = vector.shape_cast %8 : vector<1x8x270xf32> to vector<8x270xf32>
    %c1 = arith.constant 1 : index
    %c0_11 = arith.constant 0 : index
    %c0_12 = arith.constant 0 : index
    %10 = vector.load %arg2[%c1, %c0_11, %c0_12] : memref<9x8x3xf32, #tpu.memory_space<vmem>>, vector<1x8x3xf32>
    %11 = vector.shape_cast %10 : vector<1x8x3xf32> to vector<8x3xf32>
    %c0_13 = arith.constant 0 : index
    %c0_14 = arith.constant 0 : index
    %c1_15 = arith.constant 1 : index
    %12 = vector.load %arg1[%c0_13, %c0_14, %c1_15] : memref<1x3x360xf32, #tpu.memory_space<vmem>>, vector<1x3x270xf32>
    %13 = vector.shape_cast %12 : vector<1x3x270xf32> to vector<3x270xf32>
    %cst_16 = arith.constant dense<0.000000e+00> : vector<8x270xf32>
    %14 = tpu.matmul %11, %13, %cst_16 {dimension_numbers = #tpu.dot_dimension_numbers<[1], [0], [0], [1], [0, 0, 1, 1], [], []>} : vector<8x3xf32>, vector<3x270xf32>, vector<8x270xf32> -> vector<8x270xf32>
    %15 = arith.addf %9, %14 : vector<8x270xf32>
    %c0_17 = arith.constant 0 : index
    %c0_18 = arith.constant 0 : index
    %c0_19 = arith.constant 0 : index
    %16 = vector.load %arg5[%c0_17, %c0_18, %c0_19] : memref<1x8x270xf32, #tpu.memory_space<vmem>>, vector<1x8x270xf32>
    %17 = vector.shape_cast %16 : vector<1x8x270xf32> to vector<8x270xf32>
    %18 = vector.shape_cast %15 : vector<8x270xf32> to vector<1x8x270xf32>
    tpu.vector_store %arg5[%c0_17, %c0_18, %c0_19], %18 {strides = array<i32>} : memref<1x8x270xf32, #tpu.memory_space<vmem>>, vector<1x8x270xf32>,
    %c0_20 = arith.constant 0 : index
    %c0_21 = arith.constant 0 : index
    %c0_22 = arith.constant 0 : index
    %19 = vector.load %arg5[%c0_20, %c0_21, %c0_22] : memref<1x8x270xf32, #tpu.memory_space<vmem>>, vector<1x8x270xf32>
    %20 = vector.shape_cast %19 : vector<1x8x270xf32> to vector<8x270xf32>
    %c2 = arith.constant 2 : index
    %c0_23 = arith.constant 0 : index
    %c0_24 = arith.constant 0 : index
    %21 = vector.load %arg2[%c2, %c0_23, %c0_24] : memref<9x8x3xf32, #tpu.memory_space<vmem>>, vector<1x8x3xf32>
    %22 = vector.shape_cast %21 : vector<1x8x3xf32> to vector<8x3xf32>
    %c0_25 = arith.constant 0 : index
    %c0_26 = arith.constant 0 : index
    %c2_27 = arith.constant 2 : index
    %23 = vector.load %arg1[%c0_25, %c0_26, %c2_27] : memref<1x3x360xf32, #tpu.memory_space<vmem>>, vector<1x3x270xf32>
    %24 = vector.shape_cast %23 : vector<1x3x270xf32> to vector<3x270xf32>
    %cst_28 = arith.constant dense<0.000000e+00> : vector<8x270xf32>
    %25 = tpu.matmul %22, %24, %cst_28 {dimension_numbers = #tpu.dot_dimension_numbers<[1], [0], [0], [1], [0, 0, 1, 1], [], []>} : vector<8x3xf32>, vector<3x270xf32>, vector<8x270xf32> -> vector<8x270xf32>
    %26 = arith.addf %20, %25 : vector<8x270xf32>
    %c0_29 = arith.constant 0 : index
    %c0_30 = arith.constant 0 : index
    %c0_31 = arith.constant 0 : index
    %27 = vector.load %arg5[%c0_29, %c0_30, %c0_31] : memref<1x8x270xf32, #tpu.memory_space<vmem>>, vector<1x8x270xf32>
    %28 = vector.shape_cast %27 : vector<1x8x270xf32> to vector<8x270xf32>
    %29 = vector.shape_cast %26 : vector<8x270xf32> to vector<1x8x270xf32>
    tpu.vector_store %arg5[%c0_29, %c0_30, %c0_31], %29 {strides = array<i32>} : memref<1x8x270xf32, #tpu.memory_space<vmem>>, vector<1x8x270xf32>,
    %c0_32 = arith.constant 0 : index
    %c0_33 = arith.constant 0 : index
    %c0_34 = arith.constant 0 : index
    %30 = vector.load %arg5[%c0_32, %c0_33, %c0_34] : memref<1x8x270xf32, #tpu.memory_space<vmem>>, vector<1x8x270xf32>
    %31 = vector.shape_cast %30 : vector<1x8x270xf32> to vector<8x270xf32>
    %c3 = arith.constant 3 : index
    %c0_35 = arith.constant 0 : index
    %c0_36 = arith.constant 0 : index
    %32 = vector.load %arg2[%c3, %c0_35, %c0_36] : memref<9x8x3xf32, #tpu.memory_space<vmem>>, vector<1x8x3xf32>
    %33 = vector.shape_cast %32 : vector<1x8x3xf32> to vector<8x3xf32>
    %c0_37 = arith.constant 0 : index
    %c0_38 = arith.constant 0 : index
    %c18 = arith.constant 18 : index
    %34 = vector.load %arg1[%c0_37, %c0_38, %c18] : memref<1x3x360xf32, #tpu.memory_space<vmem>>, vector<1x3x270xf32>
    %35 = vector.shape_cast %34 : vector<1x3x270xf32> to vector<3x270xf32>
    %cst_39 = arith.constant dense<0.000000e+00> : vector<8x270xf32>
    %36 = tpu.matmul %33, %35, %cst_39 {dimension_numbers = #tpu.dot_dimension_numbers<[1], [0], [0], [1], [0, 0, 1, 1], [], []>} : vector<8x3xf32>, vector<3x270xf32>, vector<8x270xf32> -> vector<8x270xf32>
    %37 = arith.addf %31, %36 : vector<8x270xf32>
    %c0_40 = arith.constant 0 : index
    %c0_41 = arith.constant 0 : index
    %c0_42 = arith.constant 0 : index
    %38 = vector.load %arg5[%c0_40, %c0_41, %c0_42] : memref<1x8x270xf32, #tpu.memory_space<vmem>>, vector<1x8x270xf32>
    %39 = vector.shape_cast %38 : vector<1x8x270xf32> to vector<8x270xf32>
    %40 = vector.shape_cast %37 : vector<8x270xf32> to vector<1x8x270xf32>
    tpu.vector_store %arg5[%c0_40, %c0_41, %c0_42], %40 {strides = array<i32>} : memref<1x8x270xf32, #tpu.memory_space<vmem>>, vector<1x8x270xf32>,
    %c0_43 = arith.constant 0 : index
    %c0_44 = arith.constant 0 : index
    %c0_45 = arith.constant 0 : index
    %41 = vector.load %arg5[%c0_43, %c0_44, %c0_45] : memref<1x8x270xf32, #tpu.memory_space<vmem>>, vector<1x8x270xf32>
    %42 = vector.shape_cast %41 : vector<1x8x270xf32> to vector<8x270xf32>
    %c4 = arith.constant 4 : index
    %c0_46 = arith.constant 0 : index
    %c0_47 = arith.constant 0 : index
    %43 = vector.load %arg2[%c4, %c0_46, %c0_47] : memref<9x8x3xf32, #tpu.memory_space<vmem>>, vector<1x8x3xf32>
    %44 = vector.shape_cast %43 : vector<1x8x3xf32> to vector<8x3xf32>
    %c0_48 = arith.constant 0 : index
    %c0_49 = arith.constant 0 : index
    %c19 = arith.constant 19 : index
    %45 = vector.load %arg1[%c0_48, %c0_49, %c19] : memref<1x3x360xf32, #tpu.memory_space<vmem>>, vector<1x3x270xf32>
    %46 = vector.shape_cast %45 : vector<1x3x270xf32> to vector<3x270xf32>
    %cst_50 = arith.constant dense<0.000000e+00> : vector<8x270xf32>
    %47 = tpu.matmul %44, %46, %cst_50 {dimension_numbers = #tpu.dot_dimension_numbers<[1], [0], [0], [1], [0, 0, 1, 1], [], []>} : vector<8x3xf32>, vector<3x270xf32>, vector<8x270xf32> -> vector<8x270xf32>
    %48 = arith.addf %42, %47 : vector<8x270xf32>
    %c0_51 = arith.constant 0 : index
    %c0_52 = arith.constant 0 : index
    %c0_53 = arith.constant 0 : index
    %49 = vector.load %arg5[%c0_51, %c0_52, %c0_53] : memref<1x8x270xf32, #tpu.memory_space<vmem>>, vector<1x8x270xf32>
    %50 = vector.shape_cast %49 : vector<1x8x270xf32> to vector<8x270xf32>
    %51 = vector.shape_cast %48 : vector<8x270xf32> to vector<1x8x270xf32>
    tpu.vector_store %arg5[%c0_51, %c0_52, %c0_53], %51 {strides = array<i32>} : memref<1x8x270xf32, #tpu.memory_space<vmem>>, vector<1x8x270xf32>,
    %c0_54 = arith.constant 0 : index
    %c0_55 = arith.constant 0 : index
    %c0_56 = arith.constant 0 : index
    %52 = vector.load %arg5[%c0_54, %c0_55, %c0_56] : memref<1x8x270xf32, #tpu.memory_space<vmem>>, vector<1x8x270xf32>
    %53 = vector.shape_cast %52 : vector<1x8x270xf32> to vector<8x270xf32>
    %c5 = arith.constant 5 : index
    %c0_57 = arith.constant 0 : index
    %c0_58 = arith.constant 0 : index
    %54 = vector.load %arg2[%c5, %c0_57, %c0_58] : memref<9x8x3xf32, #tpu.memory_space<vmem>>, vector<1x8x3xf32>
    %55 = vector.shape_cast %54 : vector<1x8x3xf32> to vector<8x3xf32>
    %c0_59 = arith.constant 0 : index
    %c0_60 = arith.constant 0 : index
    %c20 = arith.constant 20 : index
    %56 = vector.load %arg1[%c0_59, %c0_60, %c20] : memref<1x3x360xf32, #tpu.memory_space<vmem>>, vector<1x3x270xf32>
    %57 = vector.shape_cast %56 : vector<1x3x270xf32> to vector<3x270xf32>
    %cst_61 = arith.constant dense<0.000000e+00> : vector<8x270xf32>
    %58 = tpu.matmul %55, %57, %cst_61 {dimension_numbers = #tpu.dot_dimension_numbers<[1], [0], [0], [1], [0, 0, 1, 1], [], []>} : vector<8x3xf32>, vector<3x270xf32>, vector<8x270xf32> -> vector<8x270xf32>
    %59 = arith.addf %53, %58 : vector<8x270xf32>
    %c0_62 = arith.constant 0 : index
    %c0_63 = arith.constant 0 : index
    %c0_64 = arith.constant 0 : index
    %60 = vector.load %arg5[%c0_62, %c0_63, %c0_64] : memref<1x8x270xf32, #tpu.memory_space<vmem>>, vector<1x8x270xf32>
    %61 = vector.shape_cast %60 : vector<1x8x270xf32> to vector<8x270xf32>
    %62 = vector.shape_cast %59 : vector<8x270xf32> to vector<1x8x270xf32>
    tpu.vector_store %arg5[%c0_62, %c0_63, %c0_64], %62 {strides = array<i32>} : memref<1x8x270xf32, #tpu.memory_space<vmem>>, vector<1x8x270xf32>,
    %c0_65 = arith.constant 0 : index
    %c0_66 = arith.constant 0 : index
    %c0_67 = arith.constant 0 : index
    %63 = vector.load %arg5[%c0_65, %c0_66, %c0_67] : memref<1x8x270xf32, #tpu.memory_space<vmem>>, vector<1x8x270xf32>
    %64 = vector.shape_cast %63 : vector<1x8x270xf32> to vector<8x270xf32>
    %c6 = arith.constant 6 : index
    %c0_68 = arith.constant 0 : index
    %c0_69 = arith.constant 0 : index
    %65 = vector.load %arg2[%c6, %c0_68, %c0_69] : memref<9x8x3xf32, #tpu.memory_space<vmem>>, vector<1x8x3xf32>
    %66 = vector.shape_cast %65 : vector<1x8x3xf32> to vector<8x3xf32>
    %c0_70 = arith.constant 0 : index
    %c0_71 = arith.constant 0 : index
    %c36 = arith.constant 36 : index
    %67 = vector.load %arg1[%c0_70, %c0_71, %c36] : memref<1x3x360xf32, #tpu.memory_space<vmem>>, vector<1x3x270xf32>
    %68 = vector.shape_cast %67 : vector<1x3x270xf32> to vector<3x270xf32>
    %cst_72 = arith.constant dense<0.000000e+00> : vector<8x270xf32>
    %69 = tpu.matmul %66, %68, %cst_72 {dimension_numbers = #tpu.dot_dimension_numbers<[1], [0], [0], [1], [0, 0, 1, 1], [], []>} : vector<8x3xf32>, vector<3x270xf32>, vector<8x270xf32> -> vector<8x270xf32>
    %70 = arith.addf %64, %69 : vector<8x270xf32>
    %c0_73 = arith.constant 0 : index
    %c0_74 = arith.constant 0 : index
    %c0_75 = arith.constant 0 : index
    %71 = vector.load %arg5[%c0_73, %c0_74, %c0_75] : memref<1x8x270xf32, #tpu.memory_space<vmem>>, vector<1x8x270xf32>
    %72 = vector.shape_cast %71 : vector<1x8x270xf32> to vector<8x270xf32>
    %73 = vector.shape_cast %70 : vector<8x270xf32> to vector<1x8x270xf32>
    tpu.vector_store %arg5[%c0_73, %c0_74, %c0_75], %73 {strides = array<i32>} : memref<1x8x270xf32, #tpu.memory_space<vmem>>, vector<1x8x270xf32>,
    %c0_76 = arith.constant 0 : index
    %c0_77 = arith.constant 0 : index
    %c0_78 = arith.constant 0 : index
    %74 = vector.load %arg5[%c0_76, %c0_77, %c0_78] : memref<1x8x270xf32, #tpu.memory_space<vmem>>, vector<1x8x270xf32>
    %75 = vector.shape_cast %74 : vector<1x8x270xf32> to vector<8x270xf32>
    %c7 = arith.constant 7 : index
    %c0_79 = arith.constant 0 : index
    %c0_80 = arith.constant 0 : index
    %76 = vector.load %arg2[%c7, %c0_79, %c0_80] : memref<9x8x3xf32, #tpu.memory_space<vmem>>, vector<1x8x3xf32>
    %77 = vector.shape_cast %76 : vector<1x8x3xf32> to vector<8x3xf32>
    %c0_81 = arith.constant 0 : index
    %c0_82 = arith.constant 0 : index
    %c37 = arith.constant 37 : index
    %78 = vector.load %arg1[%c0_81, %c0_82, %c37] : memref<1x3x360xf32, #tpu.memory_space<vmem>>, vector<1x3x270xf32>
    %79 = vector.shape_cast %78 : vector<1x3x270xf32> to vector<3x270xf32>
    %cst_83 = arith.constant dense<0.000000e+00> : vector<8x270xf32>
    %80 = tpu.matmul %77, %79, %cst_83 {dimension_numbers = #tpu.dot_dimension_numbers<[1], [0], [0], [1], [0, 0, 1, 1], [], []>} : vector<8x3xf32>, vector<3x270xf32>, vector<8x270xf32> -> vector<8x270xf32>
    %81 = arith.addf %75, %80 : vector<8x270xf32>
    %c0_84 = arith.constant 0 : index
    %c0_85 = arith.constant 0 : index
    %c0_86 = arith.constant 0 : index
    %82 = vector.load %arg5[%c0_84, %c0_85, %c0_86] : memref<1x8x270xf32, #tpu.memory_space<vmem>>, vector<1x8x270xf32>
    %83 = vector.shape_cast %82 : vector<1x8x270xf32> to vector<8x270xf32>
    %84 = vector.shape_cast %81 : vector<8x270xf32> to vector<1x8x270xf32>
    tpu.vector_store %arg5[%c0_84, %c0_85, %c0_86], %84 {strides = array<i32>} : memref<1x8x270xf32, #tpu.memory_space<vmem>>, vector<1x8x270xf32>,
    %c0_87 = arith.constant 0 : index
    %c0_88 = arith.constant 0 : index
    %c0_89 = arith.constant 0 : index
    %85 = vector.load %arg5[%c0_87, %c0_88, %c0_89] : memref<1x8x270xf32, #tpu.memory_space<vmem>>, vector<1x8x270xf32>
    %86 = vector.shape_cast %85 : vector<1x8x270xf32> to vector<8x270xf32>
    %c8 = arith.constant 8 : index
    %c0_90 = arith.constant 0 : index
    %c0_91 = arith.constant 0 : index
    %87 = vector.load %arg2[%c8, %c0_90, %c0_91] : memref<9x8x3xf32, #tpu.memory_space<vmem>>, vector<1x8x3xf32>
    %88 = vector.shape_cast %87 : vector<1x8x3xf32> to vector<8x3xf32>
    %c0_92 = arith.constant 0 : index
    %c0_93 = arith.constant 0 : index
    %c38 = arith.constant 38 : index
    %89 = vector.load %arg1[%c0_92, %c0_93, %c38] : memref<1x3x360xf32, #tpu.memory_space<vmem>>, vector<1x3x270xf32>
    %90 = vector.shape_cast %89 : vector<1x3x270xf32> to vector<3x270xf32>
    %cst_94 = arith.constant dense<0.000000e+00> : vector<8x270xf32>
    %91 = tpu.matmul %88, %90, %cst_94 {dimension_numbers = #tpu.dot_dimension_numbers<[1], [0], [0], [1], [0, 0, 1, 1], [], []>} : vector<8x3xf32>, vector<3x270xf32>, vector<8x270xf32> -> vector<8x270xf32>
    %92 = arith.addf %86, %91 : vector<8x270xf32>
    %c0_95 = arith.constant 0 : index
    %c0_96 = arith.constant 0 : index
    %c0_97 = arith.constant 0 : index
    %93 = vector.load %arg5[%c0_95, %c0_96, %c0_97] : memref<1x8x270xf32, #tpu.memory_space<vmem>>, vector<1x8x270xf32>
    %94 = vector.shape_cast %93 : vector<1x8x270xf32> to vector<8x270xf32>
    %95 = vector.shape_cast %92 : vector<8x270xf32> to vector<1x8x270xf32>
    tpu.vector_store %arg5[%c0_95, %c0_96, %c0_97], %95 {strides = array<i32>} : memref<1x8x270xf32, #tpu.memory_space<vmem>>, vector<1x8x270xf32>,
    %c0_98 = arith.constant 0 : index
    %c0_99 = arith.constant 0 : index
    %c0_100 = arith.constant 0 : index
    %96 = vector.load %arg5[%c0_98, %c0_99, %c0_100] : memref<1x8x270xf32, #tpu.memory_space<vmem>>, vector<1x8x270xf32>
    %97 = vector.shape_cast %96 : vector<1x8x270xf32> to vector<8x270xf32>
    %c0_101 = arith.constant 0 : index
    %c0_102 = arith.constant 0 : index
    %98 = vector.load %arg3[%c0_101, %c0_102] : memref<8x1xf32, #tpu.memory_space<vmem>>, vector<8x1xf32>
    %99 = vector.broadcast %98 : vector<8x1xf32> to vector<8x270xf32>
    %100 = arith.mulf %97, %99 : vector<8x270xf32>
    %c0_103 = arith.constant 0 : index
    %c0_104 = arith.constant 0 : index
    %101 = vector.load %arg4[%c0_103, %c0_104] : memref<8x1xf32, #tpu.memory_space<vmem>>, vector<8x1xf32>
    %102 = vector.broadcast %101 : vector<8x1xf32> to vector<8x270xf32>
    %103 = arith.addf %100, %102 : vector<8x270xf32>
    %cst_105 = arith.constant 0.000000e+00 : f32
    %104 = vector.broadcast %cst_105 : f32 to vector<8x270xf32>
    %105 = arith.maximumf %103, %104 : vector<8x270xf32>
    %c0_106 = arith.constant 0 : index
    %c0_107 = arith.constant 0 : index
    %c0_108 = arith.constant 0 : index
    %106 = vector.load %arg5[%c0_106, %c0_107, %c0_108] : memref<1x8x270xf32, #tpu.memory_space<vmem>>, vector<1x8x270xf32>
    %107 = vector.shape_cast %106 : vector<1x8x270xf32> to vector<8x270xf32>
    %108 = vector.shape_cast %105 : vector<8x270xf32> to vector<1x8x270xf32>
    tpu.vector_store %arg5[%c0_106, %c0_107, %c0_108], %108 {strides = array<i32>} : memref<1x8x270xf32, #tpu.memory_space<vmem>>, vector<1x8x270xf32>,
    return
  }
  func.func @transform_0(%arg0: i32) -> (i32, i32, i32) {
    %c0_i32 = arith.constant 0 : i32
    %c0_i32_0 = arith.constant 0 : i32
    %c0_i32_1 = arith.constant 0 : i32
    return %arg0, %c0_i32, %c0_i32_0 : i32, i32, i32
  }
  func.func @transform_1(%arg0: i32) -> (i32, i32, i32) {
    %c0_i32 = arith.constant 0 : i32
    %c0_i32_0 = arith.constant 0 : i32
    %c0_i32_1 = arith.constant 0 : i32
    %c0_i32_2 = arith.constant 0 : i32
    return %c0_i32, %c0_i32_0, %c0_i32_1 : i32, i32, i32
  }
  func.func @transform_2(%arg0: i32) -> (i32, i32) {
    %c0_i32 = arith.constant 0 : i32
    %c0_i32_0 = arith.constant 0 : i32
    %c0_i32_1 = arith.constant 0 : i32
    return %c0_i32, %c0_i32_0 : i32, i32
  }
  func.func @transform_3(%arg0: i32) -> (i32, i32) {
    %c0_i32 = arith.constant 0 : i32
    %c0_i32_0 = arith.constant 0 : i32
    %c0_i32_1 = arith.constant 0 : i32
    return %c0_i32, %c0_i32_0 : i32, i32
  }
  func.func @transform_4(%arg0: i32) -> (i32, i32, i32) {
    %c0_i32 = arith.constant 0 : i32
    %c0_i32_0 = arith.constant 0 : i32
    %c0_i32_1 = arith.constant 0 : i32
    return %arg0, %c0_i32, %c0_i32_0 : i32, i32, i32
  }
}

module attributes {stable_mosaic.version = 11 : i64} {
  func.func @_pw_kernel(%arg0: i32, %arg1: i32, %arg2: memref<1x8x64xf32, #tpu.memory_space<vmem>>, %arg3: memref<8x8xf32, #tpu.memory_space<vmem>>, %arg4: memref<8x1xf32, #tpu.memory_space<vmem>>, %arg5: memref<8x1xf32, #tpu.memory_space<vmem>>, %arg6: memref<1x8x64xf32, #tpu.memory_space<vmem>>) attributes {dimension_semantics = [#tpu.dimension_semantics<parallel>, #tpu.dimension_semantics<parallel>], iteration_bounds = array<i64: 2, 1>, scalar_prefetch = 0 : i64, scratch_operands = 0 : i64, tpu.core_type = #tpu.core_type<tc>, window_params = [{transform_indices = @transform_0, window_bounds = array<i64: 1, 8, 64>}, {pipeline_mode = #tpu.pipeline_mode<synchronous>, transform_indices = @transform_1, window_bounds = array<i64: 8, 8>}, {pipeline_mode = #tpu.pipeline_mode<synchronous>, transform_indices = @transform_2, window_bounds = array<i64: 8, 1>}, {pipeline_mode = #tpu.pipeline_mode<synchronous>, transform_indices = @transform_3, window_bounds = array<i64: 8, 1>}, {transform_indices = @transform_4, window_bounds = array<i64: 1, 8, 64>}]} {
    %c0 = arith.constant 0 : index
    %c0_0 = arith.constant 0 : index
    %c0_1 = arith.constant 0 : index
    %0 = vector.load %arg2[%c0, %c0_0, %c0_1] : memref<1x8x64xf32, #tpu.memory_space<vmem>>, vector<1x8x64xf32>
    %1 = vector.shape_cast %0 : vector<1x8x64xf32> to vector<8x64xf32>
    %c0_2 = arith.constant 0 : index
    %c0_3 = arith.constant 0 : index
    %2 = vector.load %arg3[%c0_2, %c0_3] : memref<8x8xf32, #tpu.memory_space<vmem>>, vector<8x8xf32>
    %cst = arith.constant dense<0.000000e+00> : vector<8x64xf32>
    %3 = tpu.matmul %2, %1, %cst {dimension_numbers = #tpu.dot_dimension_numbers<[1], [0], [0], [1], [0, 0, 1, 1], [], []>} : vector<8x8xf32>, vector<8x64xf32>, vector<8x64xf32> -> vector<8x64xf32>
    %c0_4 = arith.constant 0 : index
    %c0_5 = arith.constant 0 : index
    %4 = vector.load %arg4[%c0_4, %c0_5] : memref<8x1xf32, #tpu.memory_space<vmem>>, vector<8x1xf32>
    %5 = vector.broadcast %4 : vector<8x1xf32> to vector<8x64xf32>
    %6 = arith.mulf %3, %5 : vector<8x64xf32>
    %c0_6 = arith.constant 0 : index
    %c0_7 = arith.constant 0 : index
    %7 = vector.load %arg5[%c0_6, %c0_7] : memref<8x1xf32, #tpu.memory_space<vmem>>, vector<8x1xf32>
    %8 = vector.broadcast %7 : vector<8x1xf32> to vector<8x64xf32>
    %9 = arith.addf %6, %8 : vector<8x64xf32>
    %cst_8 = arith.constant 0.000000e+00 : f32
    %10 = vector.broadcast %cst_8 : f32 to vector<8x64xf32>
    %11 = arith.maximumf %9, %10 : vector<8x64xf32>
    %c0_9 = arith.constant 0 : index
    %c0_10 = arith.constant 0 : index
    %c0_11 = arith.constant 0 : index
    %12 = vector.load %arg6[%c0_9, %c0_10, %c0_11] : memref<1x8x64xf32, #tpu.memory_space<vmem>>, vector<1x8x64xf32>
    %13 = vector.shape_cast %12 : vector<1x8x64xf32> to vector<8x64xf32>
    %14 = vector.shape_cast %11 : vector<8x64xf32> to vector<1x8x64xf32>
    tpu.vector_store %arg6[%c0_9, %c0_10, %c0_11], %14 {strides = array<i32>} : memref<1x8x64xf32, #tpu.memory_space<vmem>>, vector<1x8x64xf32>,
    return
  }
  func.func @transform_0(%arg0: i32, %arg1: i32) -> (i32, i32, i32) {
    %c0_i32 = arith.constant 0 : i32
    %c0_i32_0 = arith.constant 0 : i32
    return %arg0, %c0_i32, %arg1 : i32, i32, i32
  }
  func.func @transform_1(%arg0: i32, %arg1: i32) -> (i32, i32) {
    %c0_i32 = arith.constant 0 : i32
    %c0_i32_0 = arith.constant 0 : i32
    %c0_i32_1 = arith.constant 0 : i32
    return %c0_i32, %c0_i32_0 : i32, i32
  }
  func.func @transform_2(%arg0: i32, %arg1: i32) -> (i32, i32) {
    %c0_i32 = arith.constant 0 : i32
    %c0_i32_0 = arith.constant 0 : i32
    %c0_i32_1 = arith.constant 0 : i32
    return %c0_i32, %c0_i32_0 : i32, i32
  }
  func.func @transform_3(%arg0: i32, %arg1: i32) -> (i32, i32) {
    %c0_i32 = arith.constant 0 : i32
    %c0_i32_0 = arith.constant 0 : i32
    %c0_i32_1 = arith.constant 0 : i32
    return %c0_i32, %c0_i32_0 : i32, i32
  }
  func.func @transform_4(%arg0: i32, %arg1: i32) -> (i32, i32, i32) {
    %c0_i32 = arith.constant 0 : i32
    %c0_i32_0 = arith.constant 0 : i32
    return %arg0, %c0_i32, %arg1 : i32, i32, i32
  }
}

module attributes {stable_mosaic.version = 11 : i64} {
  func.func @_conv3x3_kernel(%arg0: i32, %arg1: memref<1x8x120xf32, #tpu.memory_space<vmem>>, %arg2: memref<9x8x8xf32, #tpu.memory_space<vmem>>, %arg3: memref<8x1xf32, #tpu.memory_space<vmem>>, %arg4: memref<8x1xf32, #tpu.memory_space<vmem>>, %arg5: memref<1x8x80xf32, #tpu.memory_space<vmem>>) attributes {dimension_semantics = [#tpu.dimension_semantics<parallel>], iteration_bounds = array<i64: 2>, scalar_prefetch = 0 : i64, scratch_operands = 0 : i64, tpu.core_type = #tpu.core_type<tc>, window_params = [{transform_indices = @transform_0, window_bounds = array<i64: 1, 8, 120>}, {pipeline_mode = #tpu.pipeline_mode<synchronous>, transform_indices = @transform_1, window_bounds = array<i64: 9, 8, 8>}, {pipeline_mode = #tpu.pipeline_mode<synchronous>, transform_indices = @transform_2, window_bounds = array<i64: 8, 1>}, {pipeline_mode = #tpu.pipeline_mode<synchronous>, transform_indices = @transform_3, window_bounds = array<i64: 8, 1>}, {transform_indices = @transform_4, window_bounds = array<i64: 1, 8, 80>}]} {
    %c0 = arith.constant 0 : index
    %c0_0 = arith.constant 0 : index
    %c0_1 = arith.constant 0 : index
    %0 = vector.load %arg2[%c0, %c0_0, %c0_1] : memref<9x8x8xf32, #tpu.memory_space<vmem>>, vector<1x8x8xf32>
    %1 = vector.shape_cast %0 : vector<1x8x8xf32> to vector<8x8xf32>
    %c0_2 = arith.constant 0 : index
    %c0_3 = arith.constant 0 : index
    %c0_4 = arith.constant 0 : index
    %2 = vector.load %arg1[%c0_2, %c0_3, %c0_4] : memref<1x8x120xf32, #tpu.memory_space<vmem>>, vector<1x8x80xf32>
    %3 = vector.shape_cast %2 : vector<1x8x80xf32> to vector<8x80xf32>
    %cst = arith.constant dense<0.000000e+00> : vector<8x80xf32>
    %4 = tpu.matmul %1, %3, %cst {dimension_numbers = #tpu.dot_dimension_numbers<[1], [0], [0], [1], [0, 0, 1, 1], [], []>} : vector<8x8xf32>, vector<8x80xf32>, vector<8x80xf32> -> vector<8x80xf32>
    %c0_5 = arith.constant 0 : index
    %c0_6 = arith.constant 0 : index
    %c0_7 = arith.constant 0 : index
    %5 = vector.load %arg5[%c0_5, %c0_6, %c0_7] : memref<1x8x80xf32, #tpu.memory_space<vmem>>, vector<1x8x80xf32>
    %6 = vector.shape_cast %5 : vector<1x8x80xf32> to vector<8x80xf32>
    %7 = vector.shape_cast %4 : vector<8x80xf32> to vector<1x8x80xf32>
    tpu.vector_store %arg5[%c0_5, %c0_6, %c0_7], %7 {strides = array<i32>} : memref<1x8x80xf32, #tpu.memory_space<vmem>>, vector<1x8x80xf32>,
    %c0_8 = arith.constant 0 : index
    %c0_9 = arith.constant 0 : index
    %c0_10 = arith.constant 0 : index
    %8 = vector.load %arg5[%c0_8, %c0_9, %c0_10] : memref<1x8x80xf32, #tpu.memory_space<vmem>>, vector<1x8x80xf32>
    %9 = vector.shape_cast %8 : vector<1x8x80xf32> to vector<8x80xf32>
    %c1 = arith.constant 1 : index
    %c0_11 = arith.constant 0 : index
    %c0_12 = arith.constant 0 : index
    %10 = vector.load %arg2[%c1, %c0_11, %c0_12] : memref<9x8x8xf32, #tpu.memory_space<vmem>>, vector<1x8x8xf32>
    %11 = vector.shape_cast %10 : vector<1x8x8xf32> to vector<8x8xf32>
    %c0_13 = arith.constant 0 : index
    %c0_14 = arith.constant 0 : index
    %c1_15 = arith.constant 1 : index
    %12 = vector.load %arg1[%c0_13, %c0_14, %c1_15] : memref<1x8x120xf32, #tpu.memory_space<vmem>>, vector<1x8x80xf32>
    %13 = vector.shape_cast %12 : vector<1x8x80xf32> to vector<8x80xf32>
    %cst_16 = arith.constant dense<0.000000e+00> : vector<8x80xf32>
    %14 = tpu.matmul %11, %13, %cst_16 {dimension_numbers = #tpu.dot_dimension_numbers<[1], [0], [0], [1], [0, 0, 1, 1], [], []>} : vector<8x8xf32>, vector<8x80xf32>, vector<8x80xf32> -> vector<8x80xf32>
    %15 = arith.addf %9, %14 : vector<8x80xf32>
    %c0_17 = arith.constant 0 : index
    %c0_18 = arith.constant 0 : index
    %c0_19 = arith.constant 0 : index
    %16 = vector.load %arg5[%c0_17, %c0_18, %c0_19] : memref<1x8x80xf32, #tpu.memory_space<vmem>>, vector<1x8x80xf32>
    %17 = vector.shape_cast %16 : vector<1x8x80xf32> to vector<8x80xf32>
    %18 = vector.shape_cast %15 : vector<8x80xf32> to vector<1x8x80xf32>
    tpu.vector_store %arg5[%c0_17, %c0_18, %c0_19], %18 {strides = array<i32>} : memref<1x8x80xf32, #tpu.memory_space<vmem>>, vector<1x8x80xf32>,
    %c0_20 = arith.constant 0 : index
    %c0_21 = arith.constant 0 : index
    %c0_22 = arith.constant 0 : index
    %19 = vector.load %arg5[%c0_20, %c0_21, %c0_22] : memref<1x8x80xf32, #tpu.memory_space<vmem>>, vector<1x8x80xf32>
    %20 = vector.shape_cast %19 : vector<1x8x80xf32> to vector<8x80xf32>
    %c2 = arith.constant 2 : index
    %c0_23 = arith.constant 0 : index
    %c0_24 = arith.constant 0 : index
    %21 = vector.load %arg2[%c2, %c0_23, %c0_24] : memref<9x8x8xf32, #tpu.memory_space<vmem>>, vector<1x8x8xf32>
    %22 = vector.shape_cast %21 : vector<1x8x8xf32> to vector<8x8xf32>
    %c0_25 = arith.constant 0 : index
    %c0_26 = arith.constant 0 : index
    %c2_27 = arith.constant 2 : index
    %23 = vector.load %arg1[%c0_25, %c0_26, %c2_27] : memref<1x8x120xf32, #tpu.memory_space<vmem>>, vector<1x8x80xf32>
    %24 = vector.shape_cast %23 : vector<1x8x80xf32> to vector<8x80xf32>
    %cst_28 = arith.constant dense<0.000000e+00> : vector<8x80xf32>
    %25 = tpu.matmul %22, %24, %cst_28 {dimension_numbers = #tpu.dot_dimension_numbers<[1], [0], [0], [1], [0, 0, 1, 1], [], []>} : vector<8x8xf32>, vector<8x80xf32>, vector<8x80xf32> -> vector<8x80xf32>
    %26 = arith.addf %20, %25 : vector<8x80xf32>
    %c0_29 = arith.constant 0 : index
    %c0_30 = arith.constant 0 : index
    %c0_31 = arith.constant 0 : index
    %27 = vector.load %arg5[%c0_29, %c0_30, %c0_31] : memref<1x8x80xf32, #tpu.memory_space<vmem>>, vector<1x8x80xf32>
    %28 = vector.shape_cast %27 : vector<1x8x80xf32> to vector<8x80xf32>
    %29 = vector.shape_cast %26 : vector<8x80xf32> to vector<1x8x80xf32>
    tpu.vector_store %arg5[%c0_29, %c0_30, %c0_31], %29 {strides = array<i32>} : memref<1x8x80xf32, #tpu.memory_space<vmem>>, vector<1x8x80xf32>,
    %c0_32 = arith.constant 0 : index
    %c0_33 = arith.constant 0 : index
    %c0_34 = arith.constant 0 : index
    %30 = vector.load %arg5[%c0_32, %c0_33, %c0_34] : memref<1x8x80xf32, #tpu.memory_space<vmem>>, vector<1x8x80xf32>
    %31 = vector.shape_cast %30 : vector<1x8x80xf32> to vector<8x80xf32>
    %c3 = arith.constant 3 : index
    %c0_35 = arith.constant 0 : index
    %c0_36 = arith.constant 0 : index
    %32 = vector.load %arg2[%c3, %c0_35, %c0_36] : memref<9x8x8xf32, #tpu.memory_space<vmem>>, vector<1x8x8xf32>
    %33 = vector.shape_cast %32 : vector<1x8x8xf32> to vector<8x8xf32>
    %c0_37 = arith.constant 0 : index
    %c0_38 = arith.constant 0 : index
    %c10 = arith.constant 10 : index
    %34 = vector.load %arg1[%c0_37, %c0_38, %c10] : memref<1x8x120xf32, #tpu.memory_space<vmem>>, vector<1x8x80xf32>
    %35 = vector.shape_cast %34 : vector<1x8x80xf32> to vector<8x80xf32>
    %cst_39 = arith.constant dense<0.000000e+00> : vector<8x80xf32>
    %36 = tpu.matmul %33, %35, %cst_39 {dimension_numbers = #tpu.dot_dimension_numbers<[1], [0], [0], [1], [0, 0, 1, 1], [], []>} : vector<8x8xf32>, vector<8x80xf32>, vector<8x80xf32> -> vector<8x80xf32>
    %37 = arith.addf %31, %36 : vector<8x80xf32>
    %c0_40 = arith.constant 0 : index
    %c0_41 = arith.constant 0 : index
    %c0_42 = arith.constant 0 : index
    %38 = vector.load %arg5[%c0_40, %c0_41, %c0_42] : memref<1x8x80xf32, #tpu.memory_space<vmem>>, vector<1x8x80xf32>
    %39 = vector.shape_cast %38 : vector<1x8x80xf32> to vector<8x80xf32>
    %40 = vector.shape_cast %37 : vector<8x80xf32> to vector<1x8x80xf32>
    tpu.vector_store %arg5[%c0_40, %c0_41, %c0_42], %40 {strides = array<i32>} : memref<1x8x80xf32, #tpu.memory_space<vmem>>, vector<1x8x80xf32>,
    %c0_43 = arith.constant 0 : index
    %c0_44 = arith.constant 0 : index
    %c0_45 = arith.constant 0 : index
    %41 = vector.load %arg5[%c0_43, %c0_44, %c0_45] : memref<1x8x80xf32, #tpu.memory_space<vmem>>, vector<1x8x80xf32>
    %42 = vector.shape_cast %41 : vector<1x8x80xf32> to vector<8x80xf32>
    %c4 = arith.constant 4 : index
    %c0_46 = arith.constant 0 : index
    %c0_47 = arith.constant 0 : index
    %43 = vector.load %arg2[%c4, %c0_46, %c0_47] : memref<9x8x8xf32, #tpu.memory_space<vmem>>, vector<1x8x8xf32>
    %44 = vector.shape_cast %43 : vector<1x8x8xf32> to vector<8x8xf32>
    %c0_48 = arith.constant 0 : index
    %c0_49 = arith.constant 0 : index
    %c11 = arith.constant 11 : index
    %45 = vector.load %arg1[%c0_48, %c0_49, %c11] : memref<1x8x120xf32, #tpu.memory_space<vmem>>, vector<1x8x80xf32>
    %46 = vector.shape_cast %45 : vector<1x8x80xf32> to vector<8x80xf32>
    %cst_50 = arith.constant dense<0.000000e+00> : vector<8x80xf32>
    %47 = tpu.matmul %44, %46, %cst_50 {dimension_numbers = #tpu.dot_dimension_numbers<[1], [0], [0], [1], [0, 0, 1, 1], [], []>} : vector<8x8xf32>, vector<8x80xf32>, vector<8x80xf32> -> vector<8x80xf32>
    %48 = arith.addf %42, %47 : vector<8x80xf32>
    %c0_51 = arith.constant 0 : index
    %c0_52 = arith.constant 0 : index
    %c0_53 = arith.constant 0 : index
    %49 = vector.load %arg5[%c0_51, %c0_52, %c0_53] : memref<1x8x80xf32, #tpu.memory_space<vmem>>, vector<1x8x80xf32>
    %50 = vector.shape_cast %49 : vector<1x8x80xf32> to vector<8x80xf32>
    %51 = vector.shape_cast %48 : vector<8x80xf32> to vector<1x8x80xf32>
    tpu.vector_store %arg5[%c0_51, %c0_52, %c0_53], %51 {strides = array<i32>} : memref<1x8x80xf32, #tpu.memory_space<vmem>>, vector<1x8x80xf32>,
    %c0_54 = arith.constant 0 : index
    %c0_55 = arith.constant 0 : index
    %c0_56 = arith.constant 0 : index
    %52 = vector.load %arg5[%c0_54, %c0_55, %c0_56] : memref<1x8x80xf32, #tpu.memory_space<vmem>>, vector<1x8x80xf32>
    %53 = vector.shape_cast %52 : vector<1x8x80xf32> to vector<8x80xf32>
    %c5 = arith.constant 5 : index
    %c0_57 = arith.constant 0 : index
    %c0_58 = arith.constant 0 : index
    %54 = vector.load %arg2[%c5, %c0_57, %c0_58] : memref<9x8x8xf32, #tpu.memory_space<vmem>>, vector<1x8x8xf32>
    %55 = vector.shape_cast %54 : vector<1x8x8xf32> to vector<8x8xf32>
    %c0_59 = arith.constant 0 : index
    %c0_60 = arith.constant 0 : index
    %c12 = arith.constant 12 : index
    %56 = vector.load %arg1[%c0_59, %c0_60, %c12] : memref<1x8x120xf32, #tpu.memory_space<vmem>>, vector<1x8x80xf32>
    %57 = vector.shape_cast %56 : vector<1x8x80xf32> to vector<8x80xf32>
    %cst_61 = arith.constant dense<0.000000e+00> : vector<8x80xf32>
    %58 = tpu.matmul %55, %57, %cst_61 {dimension_numbers = #tpu.dot_dimension_numbers<[1], [0], [0], [1], [0, 0, 1, 1], [], []>} : vector<8x8xf32>, vector<8x80xf32>, vector<8x80xf32> -> vector<8x80xf32>
    %59 = arith.addf %53, %58 : vector<8x80xf32>
    %c0_62 = arith.constant 0 : index
    %c0_63 = arith.constant 0 : index
    %c0_64 = arith.constant 0 : index
    %60 = vector.load %arg5[%c0_62, %c0_63, %c0_64] : memref<1x8x80xf32, #tpu.memory_space<vmem>>, vector<1x8x80xf32>
    %61 = vector.shape_cast %60 : vector<1x8x80xf32> to vector<8x80xf32>
    %62 = vector.shape_cast %59 : vector<8x80xf32> to vector<1x8x80xf32>
    tpu.vector_store %arg5[%c0_62, %c0_63, %c0_64], %62 {strides = array<i32>} : memref<1x8x80xf32, #tpu.memory_space<vmem>>, vector<1x8x80xf32>,
    %c0_65 = arith.constant 0 : index
    %c0_66 = arith.constant 0 : index
    %c0_67 = arith.constant 0 : index
    %63 = vector.load %arg5[%c0_65, %c0_66, %c0_67] : memref<1x8x80xf32, #tpu.memory_space<vmem>>, vector<1x8x80xf32>
    %64 = vector.shape_cast %63 : vector<1x8x80xf32> to vector<8x80xf32>
    %c6 = arith.constant 6 : index
    %c0_68 = arith.constant 0 : index
    %c0_69 = arith.constant 0 : index
    %65 = vector.load %arg2[%c6, %c0_68, %c0_69] : memref<9x8x8xf32, #tpu.memory_space<vmem>>, vector<1x8x8xf32>
    %66 = vector.shape_cast %65 : vector<1x8x8xf32> to vector<8x8xf32>
    %c0_70 = arith.constant 0 : index
    %c0_71 = arith.constant 0 : index
    %c20 = arith.constant 20 : index
    %67 = vector.load %arg1[%c0_70, %c0_71, %c20] : memref<1x8x120xf32, #tpu.memory_space<vmem>>, vector<1x8x80xf32>
    %68 = vector.shape_cast %67 : vector<1x8x80xf32> to vector<8x80xf32>
    %cst_72 = arith.constant dense<0.000000e+00> : vector<8x80xf32>
    %69 = tpu.matmul %66, %68, %cst_72 {dimension_numbers = #tpu.dot_dimension_numbers<[1], [0], [0], [1], [0, 0, 1, 1], [], []>} : vector<8x8xf32>, vector<8x80xf32>, vector<8x80xf32> -> vector<8x80xf32>
    %70 = arith.addf %64, %69 : vector<8x80xf32>
    %c0_73 = arith.constant 0 : index
    %c0_74 = arith.constant 0 : index
    %c0_75 = arith.constant 0 : index
    %71 = vector.load %arg5[%c0_73, %c0_74, %c0_75] : memref<1x8x80xf32, #tpu.memory_space<vmem>>, vector<1x8x80xf32>
    %72 = vector.shape_cast %71 : vector<1x8x80xf32> to vector<8x80xf32>
    %73 = vector.shape_cast %70 : vector<8x80xf32> to vector<1x8x80xf32>
    tpu.vector_store %arg5[%c0_73, %c0_74, %c0_75], %73 {strides = array<i32>} : memref<1x8x80xf32, #tpu.memory_space<vmem>>, vector<1x8x80xf32>,
    %c0_76 = arith.constant 0 : index
    %c0_77 = arith.constant 0 : index
    %c0_78 = arith.constant 0 : index
    %74 = vector.load %arg5[%c0_76, %c0_77, %c0_78] : memref<1x8x80xf32, #tpu.memory_space<vmem>>, vector<1x8x80xf32>
    %75 = vector.shape_cast %74 : vector<1x8x80xf32> to vector<8x80xf32>
    %c7 = arith.constant 7 : index
    %c0_79 = arith.constant 0 : index
    %c0_80 = arith.constant 0 : index
    %76 = vector.load %arg2[%c7, %c0_79, %c0_80] : memref<9x8x8xf32, #tpu.memory_space<vmem>>, vector<1x8x8xf32>
    %77 = vector.shape_cast %76 : vector<1x8x8xf32> to vector<8x8xf32>
    %c0_81 = arith.constant 0 : index
    %c0_82 = arith.constant 0 : index
    %c21 = arith.constant 21 : index
    %78 = vector.load %arg1[%c0_81, %c0_82, %c21] : memref<1x8x120xf32, #tpu.memory_space<vmem>>, vector<1x8x80xf32>
    %79 = vector.shape_cast %78 : vector<1x8x80xf32> to vector<8x80xf32>
    %cst_83 = arith.constant dense<0.000000e+00> : vector<8x80xf32>
    %80 = tpu.matmul %77, %79, %cst_83 {dimension_numbers = #tpu.dot_dimension_numbers<[1], [0], [0], [1], [0, 0, 1, 1], [], []>} : vector<8x8xf32>, vector<8x80xf32>, vector<8x80xf32> -> vector<8x80xf32>
    %81 = arith.addf %75, %80 : vector<8x80xf32>
    %c0_84 = arith.constant 0 : index
    %c0_85 = arith.constant 0 : index
    %c0_86 = arith.constant 0 : index
    %82 = vector.load %arg5[%c0_84, %c0_85, %c0_86] : memref<1x8x80xf32, #tpu.memory_space<vmem>>, vector<1x8x80xf32>
    %83 = vector.shape_cast %82 : vector<1x8x80xf32> to vector<8x80xf32>
    %84 = vector.shape_cast %81 : vector<8x80xf32> to vector<1x8x80xf32>
    tpu.vector_store %arg5[%c0_84, %c0_85, %c0_86], %84 {strides = array<i32>} : memref<1x8x80xf32, #tpu.memory_space<vmem>>, vector<1x8x80xf32>,
    %c0_87 = arith.constant 0 : index
    %c0_88 = arith.constant 0 : index
    %c0_89 = arith.constant 0 : index
    %85 = vector.load %arg5[%c0_87, %c0_88, %c0_89] : memref<1x8x80xf32, #tpu.memory_space<vmem>>, vector<1x8x80xf32>
    %86 = vector.shape_cast %85 : vector<1x8x80xf32> to vector<8x80xf32>
    %c8 = arith.constant 8 : index
    %c0_90 = arith.constant 0 : index
    %c0_91 = arith.constant 0 : index
    %87 = vector.load %arg2[%c8, %c0_90, %c0_91] : memref<9x8x8xf32, #tpu.memory_space<vmem>>, vector<1x8x8xf32>
    %88 = vector.shape_cast %87 : vector<1x8x8xf32> to vector<8x8xf32>
    %c0_92 = arith.constant 0 : index
    %c0_93 = arith.constant 0 : index
    %c22 = arith.constant 22 : index
    %89 = vector.load %arg1[%c0_92, %c0_93, %c22] : memref<1x8x120xf32, #tpu.memory_space<vmem>>, vector<1x8x80xf32>
    %90 = vector.shape_cast %89 : vector<1x8x80xf32> to vector<8x80xf32>
    %cst_94 = arith.constant dense<0.000000e+00> : vector<8x80xf32>
    %91 = tpu.matmul %88, %90, %cst_94 {dimension_numbers = #tpu.dot_dimension_numbers<[1], [0], [0], [1], [0, 0, 1, 1], [], []>} : vector<8x8xf32>, vector<8x80xf32>, vector<8x80xf32> -> vector<8x80xf32>
    %92 = arith.addf %86, %91 : vector<8x80xf32>
    %c0_95 = arith.constant 0 : index
    %c0_96 = arith.constant 0 : index
    %c0_97 = arith.constant 0 : index
    %93 = vector.load %arg5[%c0_95, %c0_96, %c0_97] : memref<1x8x80xf32, #tpu.memory_space<vmem>>, vector<1x8x80xf32>
    %94 = vector.shape_cast %93 : vector<1x8x80xf32> to vector<8x80xf32>
    %95 = vector.shape_cast %92 : vector<8x80xf32> to vector<1x8x80xf32>
    tpu.vector_store %arg5[%c0_95, %c0_96, %c0_97], %95 {strides = array<i32>} : memref<1x8x80xf32, #tpu.memory_space<vmem>>, vector<1x8x80xf32>,
    %c0_98 = arith.constant 0 : index
    %c0_99 = arith.constant 0 : index
    %c0_100 = arith.constant 0 : index
    %96 = vector.load %arg5[%c0_98, %c0_99, %c0_100] : memref<1x8x80xf32, #tpu.memory_space<vmem>>, vector<1x8x80xf32>
    %97 = vector.shape_cast %96 : vector<1x8x80xf32> to vector<8x80xf32>
    %c0_101 = arith.constant 0 : index
    %c0_102 = arith.constant 0 : index
    %98 = vector.load %arg3[%c0_101, %c0_102] : memref<8x1xf32, #tpu.memory_space<vmem>>, vector<8x1xf32>
    %99 = vector.broadcast %98 : vector<8x1xf32> to vector<8x80xf32>
    %100 = arith.mulf %97, %99 : vector<8x80xf32>
    %c0_103 = arith.constant 0 : index
    %c0_104 = arith.constant 0 : index
    %101 = vector.load %arg4[%c0_103, %c0_104] : memref<8x1xf32, #tpu.memory_space<vmem>>, vector<8x1xf32>
    %102 = vector.broadcast %101 : vector<8x1xf32> to vector<8x80xf32>
    %103 = arith.addf %100, %102 : vector<8x80xf32>
    %cst_105 = arith.constant 0.000000e+00 : f32
    %104 = vector.broadcast %cst_105 : f32 to vector<8x80xf32>
    %105 = arith.maximumf %103, %104 : vector<8x80xf32>
    %c0_106 = arith.constant 0 : index
    %c0_107 = arith.constant 0 : index
    %c0_108 = arith.constant 0 : index
    %106 = vector.load %arg5[%c0_106, %c0_107, %c0_108] : memref<1x8x80xf32, #tpu.memory_space<vmem>>, vector<1x8x80xf32>
    %107 = vector.shape_cast %106 : vector<1x8x80xf32> to vector<8x80xf32>
    %108 = vector.shape_cast %105 : vector<8x80xf32> to vector<1x8x80xf32>
    tpu.vector_store %arg5[%c0_106, %c0_107, %c0_108], %108 {strides = array<i32>} : memref<1x8x80xf32, #tpu.memory_space<vmem>>, vector<1x8x80xf32>,
    return
  }
  func.func @transform_0(%arg0: i32) -> (i32, i32, i32) {
    %c0_i32 = arith.constant 0 : i32
    %c0_i32_0 = arith.constant 0 : i32
    %c0_i32_1 = arith.constant 0 : i32
    return %arg0, %c0_i32, %c0_i32_0 : i32, i32, i32
  }
  func.func @transform_1(%arg0: i32) -> (i32, i32, i32) {
    %c0_i32 = arith.constant 0 : i32
    %c0_i32_0 = arith.constant 0 : i32
    %c0_i32_1 = arith.constant 0 : i32
    %c0_i32_2 = arith.constant 0 : i32
    return %c0_i32, %c0_i32_0, %c0_i32_1 : i32, i32, i32
  }
  func.func @transform_2(%arg0: i32) -> (i32, i32) {
    %c0_i32 = arith.constant 0 : i32
    %c0_i32_0 = arith.constant 0 : i32
    %c0_i32_1 = arith.constant 0 : i32
    return %c0_i32, %c0_i32_0 : i32, i32
  }
  func.func @transform_3(%arg0: i32) -> (i32, i32) {
    %c0_i32 = arith.constant 0 : i32
    %c0_i32_0 = arith.constant 0 : i32
    %c0_i32_1 = arith.constant 0 : i32
    return %c0_i32, %c0_i32_0 : i32, i32
  }
  func.func @transform_4(%arg0: i32) -> (i32, i32, i32) {
    %c0_i32 = arith.constant 0 : i32
    %c0_i32_0 = arith.constant 0 : i32
    %c0_i32_1 = arith.constant 0 : i32
    return %arg0, %c0_i32, %c0_i32_0 : i32, i32, i32
  }
}

module attributes {stable_mosaic.version = 11 : i64} {
  func.func @_se_gate_kernel(%arg0: i32, %arg1: memref<1x8x64xf32, #tpu.memory_space<vmem>>, %arg2: memref<2x8xf32, #tpu.memory_space<vmem>>, %arg3: memref<2x1xf32, #tpu.memory_space<vmem>>, %arg4: memref<8x2xf32, #tpu.memory_space<vmem>>, %arg5: memref<8x1xf32, #tpu.memory_space<vmem>>, %arg6: memref<1x8x1xf32, #tpu.memory_space<vmem>>) attributes {dimension_semantics = [#tpu.dimension_semantics<parallel>], iteration_bounds = array<i64: 2>, scalar_prefetch = 0 : i64, scratch_operands = 0 : i64, tpu.core_type = #tpu.core_type<tc>, window_params = [{transform_indices = @transform_0, window_bounds = array<i64: 1, 8, 64>}, {pipeline_mode = #tpu.pipeline_mode<synchronous>, transform_indices = @transform_1, window_bounds = array<i64: 2, 8>}, {pipeline_mode = #tpu.pipeline_mode<synchronous>, transform_indices = @transform_2, window_bounds = array<i64: 2, 1>}, {pipeline_mode = #tpu.pipeline_mode<synchronous>, transform_indices = @transform_3, window_bounds = array<i64: 8, 2>}, {pipeline_mode = #tpu.pipeline_mode<synchronous>, transform_indices = @transform_4, window_bounds = array<i64: 8, 1>}, {transform_indices = @transform_5, window_bounds = array<i64: 1, 8, 1>}]} {
    %c0 = arith.constant 0 : index
    %c0_0 = arith.constant 0 : index
    %c0_1 = arith.constant 0 : index
    %0 = vector.load %arg1[%c0, %c0_0, %c0_1] : memref<1x8x64xf32, #tpu.memory_space<vmem>>, vector<1x8x64xf32>
    %1 = vector.shape_cast %0 : vector<1x8x64xf32> to vector<8x64xf32>
    %cst = arith.constant dense<0.000000e+00> : vector<8xf32>
    %2 = vector.multi_reduction <add>, %1, %cst [1] : vector<8x64xf32> to vector<8xf32>
    %3 = vector.shape_cast %2 : vector<8xf32> to vector<8x1xf32>
    %cst_2 = arith.constant 6.400000e+01 : f32
    %4 = vector.broadcast %cst_2 : f32 to vector<8x1xf32>
    %5 = arith.divf %3, %4 : vector<8x1xf32>
    %c0_3 = arith.constant 0 : index
    %c0_4 = arith.constant 0 : index
    %6 = vector.load %arg2[%c0_3, %c0_4] : memref<2x8xf32, #tpu.memory_space<vmem>>, vector<2x8xf32>
    %cst_5 = arith.constant dense<0.000000e+00> : vector<2x1xf32>
    %7 = tpu.matmul %6, %5, %cst_5 {dimension_numbers = #tpu.dot_dimension_numbers<[1], [0], [0], [1], [0, 0, 1, 1], [], []>} : vector<2x8xf32>, vector<8x1xf32>, vector<2x1xf32> -> vector<2x1xf32>
    %c0_6 = arith.constant 0 : index
    %c0_7 = arith.constant 0 : index
    %8 = vector.load %arg3[%c0_6, %c0_7] : memref<2x1xf32, #tpu.memory_space<vmem>>, vector<2x1xf32>
    %9 = arith.addf %7, %8 : vector<2x1xf32>
    %cst_8 = arith.constant 0.000000e+00 : f32
    %10 = vector.broadcast %cst_8 : f32 to vector<2x1xf32>
    %11 = arith.maximumf %9, %10 : vector<2x1xf32>
    %c0_9 = arith.constant 0 : index
    %c0_10 = arith.constant 0 : index
    %12 = vector.load %arg4[%c0_9, %c0_10] : memref<8x2xf32, #tpu.memory_space<vmem>>, vector<8x2xf32>
    %cst_11 = arith.constant dense<0.000000e+00> : vector<8x1xf32>
    %13 = tpu.matmul %12, %11, %cst_11 {dimension_numbers = #tpu.dot_dimension_numbers<[1], [0], [0], [1], [0, 0, 1, 1], [], []>} : vector<8x2xf32>, vector<2x1xf32>, vector<8x1xf32> -> vector<8x1xf32>
    %c0_12 = arith.constant 0 : index
    %c0_13 = arith.constant 0 : index
    %14 = vector.load %arg5[%c0_12, %c0_13] : memref<8x1xf32, #tpu.memory_space<vmem>>, vector<8x1xf32>
    %15 = arith.addf %13, %14 : vector<8x1xf32>
    %16 = arith.negf %15 : vector<8x1xf32>
    %17 = math.exp %16 : vector<8x1xf32>
    %cst_14 = arith.constant 1.000000e+00 : f32
    %18 = vector.broadcast %cst_14 : f32 to vector<8x1xf32>
    %19 = arith.addf %18, %17 : vector<8x1xf32>
    %20 = arith.divf %18, %19 : vector<8x1xf32>
    %c0_15 = arith.constant 0 : index
    %c0_16 = arith.constant 0 : index
    %c0_17 = arith.constant 0 : index
    %21 = vector.load %arg6[%c0_15, %c0_16, %c0_17] : memref<1x8x1xf32, #tpu.memory_space<vmem>>, vector<1x8x1xf32>
    %22 = vector.shape_cast %21 : vector<1x8x1xf32> to vector<8x1xf32>
    %23 = vector.shape_cast %20 : vector<8x1xf32> to vector<1x8x1xf32>
    tpu.vector_store %arg6[%c0_15, %c0_16, %c0_17], %23 {strides = array<i32>} : memref<1x8x1xf32, #tpu.memory_space<vmem>>, vector<1x8x1xf32>,
    return
  }
  func.func @transform_0(%arg0: i32) -> (i32, i32, i32) {
    %c0_i32 = arith.constant 0 : i32
    %c0_i32_0 = arith.constant 0 : i32
    %c0_i32_1 = arith.constant 0 : i32
    return %arg0, %c0_i32, %c0_i32_0 : i32, i32, i32
  }
  func.func @transform_1(%arg0: i32) -> (i32, i32) {
    %c0_i32 = arith.constant 0 : i32
    %c0_i32_0 = arith.constant 0 : i32
    %c0_i32_1 = arith.constant 0 : i32
    return %c0_i32, %c0_i32_0 : i32, i32
  }
  func.func @transform_2(%arg0: i32) -> (i32, i32) {
    %c0_i32 = arith.constant 0 : i32
    %c0_i32_0 = arith.constant 0 : i32
    %c0_i32_1 = arith.constant 0 : i32
    return %c0_i32, %c0_i32_0 : i32, i32
  }
  func.func @transform_3(%arg0: i32) -> (i32, i32) {
    %c0_i32 = arith.constant 0 : i32
    %c0_i32_0 = arith.constant 0 : i32
    %c0_i32_1 = arith.constant 0 : i32
    return %c0_i32, %c0_i32_0 : i32, i32
  }
  func.func @transform_4(%arg0: i32) -> (i32, i32) {
    %c0_i32 = arith.constant 0 : i32
    %c0_i32_0 = arith.constant 0 : i32
    %c0_i32_1 = arith.constant 0 : i32
    return %c0_i32, %c0_i32_0 : i32, i32
  }
  func.func @transform_5(%arg0: i32) -> (i32, i32, i32) {
    %c0_i32 = arith.constant 0 : i32
    %c0_i32_0 = arith.constant 0 : i32
    %c0_i32_1 = arith.constant 0 : i32
    return %arg0, %c0_i32, %c0_i32_0 : i32, i32, i32
  }
}

module attributes {stable_mosaic.version = 11 : i64} {
  func.func @_pw_kernel(%arg0: i32, %arg1: i32, %arg2: memref<1x8x64xf32, #tpu.memory_space<vmem>>, %arg3: memref<8x8xf32, #tpu.memory_space<vmem>>, %arg4: memref<8x1xf32, #tpu.memory_space<vmem>>, %arg5: memref<8x1xf32, #tpu.memory_space<vmem>>, %arg6: memref<1x8x1xf32, #tpu.memory_space<vmem>>, %arg7: memref<1x8x64xf32, #tpu.memory_space<vmem>>, %arg8: memref<1x8x64xf32, #tpu.memory_space<vmem>>) attributes {dimension_semantics = [#tpu.dimension_semantics<parallel>, #tpu.dimension_semantics<parallel>], iteration_bounds = array<i64: 2, 1>, scalar_prefetch = 0 : i64, scratch_operands = 0 : i64, tpu.core_type = #tpu.core_type<tc>, window_params = [{transform_indices = @transform_0, window_bounds = array<i64: 1, 8, 64>}, {pipeline_mode = #tpu.pipeline_mode<synchronous>, transform_indices = @transform_1, window_bounds = array<i64: 8, 8>}, {pipeline_mode = #tpu.pipeline_mode<synchronous>, transform_indices = @transform_2, window_bounds = array<i64: 8, 1>}, {pipeline_mode = #tpu.pipeline_mode<synchronous>, transform_indices = @transform_3, window_bounds = array<i64: 8, 1>}, {transform_indices = @transform_4, window_bounds = array<i64: 1, 8, 1>}, {transform_indices = @transform_5, window_bounds = array<i64: 1, 8, 64>}, {transform_indices = @transform_6, window_bounds = array<i64: 1, 8, 64>}]} {
    %c0 = arith.constant 0 : index
    %c0_0 = arith.constant 0 : index
    %c0_1 = arith.constant 0 : index
    %0 = vector.load %arg2[%c0, %c0_0, %c0_1] : memref<1x8x64xf32, #tpu.memory_space<vmem>>, vector<1x8x64xf32>
    %1 = vector.shape_cast %0 : vector<1x8x64xf32> to vector<8x64xf32>
    %c0_2 = arith.constant 0 : index
    %c0_3 = arith.constant 0 : index
    %c0_4 = arith.constant 0 : index
    %2 = vector.load %arg6[%c0_2, %c0_3, %c0_4] : memref<1x8x1xf32, #tpu.memory_space<vmem>>, vector<1x8x1xf32>
    %3 = vector.shape_cast %2 : vector<1x8x1xf32> to vector<8x1xf32>
    %4 = vector.broadcast %3 : vector<8x1xf32> to vector<8x64xf32>
    %5 = arith.mulf %1, %4 : vector<8x64xf32>
    %c0_5 = arith.constant 0 : index
    %c0_6 = arith.constant 0 : index
    %6 = vector.load %arg3[%c0_5, %c0_6] : memref<8x8xf32, #tpu.memory_space<vmem>>, vector<8x8xf32>
    %cst = arith.constant dense<0.000000e+00> : vector<8x64xf32>
    %7 = tpu.matmul %6, %5, %cst {dimension_numbers = #tpu.dot_dimension_numbers<[1], [0], [0], [1], [0, 0, 1, 1], [], []>} : vector<8x8xf32>, vector<8x64xf32>, vector<8x64xf32> -> vector<8x64xf32>
    %c0_7 = arith.constant 0 : index
    %c0_8 = arith.constant 0 : index
    %8 = vector.load %arg4[%c0_7, %c0_8] : memref<8x1xf32, #tpu.memory_space<vmem>>, vector<8x1xf32>
    %9 = vector.broadcast %8 : vector<8x1xf32> to vector<8x64xf32>
    %10 = arith.mulf %7, %9 : vector<8x64xf32>
    %c0_9 = arith.constant 0 : index
    %c0_10 = arith.constant 0 : index
    %11 = vector.load %arg5[%c0_9, %c0_10] : memref<8x1xf32, #tpu.memory_space<vmem>>, vector<8x1xf32>
    %12 = vector.broadcast %11 : vector<8x1xf32> to vector<8x64xf32>
    %13 = arith.addf %10, %12 : vector<8x64xf32>
    %c0_11 = arith.constant 0 : index
    %c0_12 = arith.constant 0 : index
    %c0_13 = arith.constant 0 : index
    %14 = vector.load %arg7[%c0_11, %c0_12, %c0_13] : memref<1x8x64xf32, #tpu.memory_space<vmem>>, vector<1x8x64xf32>
    %15 = vector.shape_cast %14 : vector<1x8x64xf32> to vector<8x64xf32>
    %16 = arith.addf %13, %15 : vector<8x64xf32>
    %cst_14 = arith.constant 0.000000e+00 : f32
    %17 = vector.broadcast %cst_14 : f32 to vector<8x64xf32>
    %18 = arith.maximumf %16, %17 : vector<8x64xf32>
    %c0_15 = arith.constant 0 : index
    %c0_16 = arith.constant 0 : index
    %c0_17 = arith.constant 0 : index
    %19 = vector.load %arg8[%c0_15, %c0_16, %c0_17] : memref<1x8x64xf32, #tpu.memory_space<vmem>>, vector<1x8x64xf32>
    %20 = vector.shape_cast %19 : vector<1x8x64xf32> to vector<8x64xf32>
    %21 = vector.shape_cast %18 : vector<8x64xf32> to vector<1x8x64xf32>
    tpu.vector_store %arg8[%c0_15, %c0_16, %c0_17], %21 {strides = array<i32>} : memref<1x8x64xf32, #tpu.memory_space<vmem>>, vector<1x8x64xf32>,
    return
  }
  func.func @transform_0(%arg0: i32, %arg1: i32) -> (i32, i32, i32) {
    %c0_i32 = arith.constant 0 : i32
    %c0_i32_0 = arith.constant 0 : i32
    return %arg0, %c0_i32, %arg1 : i32, i32, i32
  }
  func.func @transform_1(%arg0: i32, %arg1: i32) -> (i32, i32) {
    %c0_i32 = arith.constant 0 : i32
    %c0_i32_0 = arith.constant 0 : i32
    %c0_i32_1 = arith.constant 0 : i32
    return %c0_i32, %c0_i32_0 : i32, i32
  }
  func.func @transform_2(%arg0: i32, %arg1: i32) -> (i32, i32) {
    %c0_i32 = arith.constant 0 : i32
    %c0_i32_0 = arith.constant 0 : i32
    %c0_i32_1 = arith.constant 0 : i32
    return %c0_i32, %c0_i32_0 : i32, i32
  }
  func.func @transform_3(%arg0: i32, %arg1: i32) -> (i32, i32) {
    %c0_i32 = arith.constant 0 : i32
    %c0_i32_0 = arith.constant 0 : i32
    %c0_i32_1 = arith.constant 0 : i32
    return %c0_i32, %c0_i32_0 : i32, i32
  }
  func.func @transform_4(%arg0: i32, %arg1: i32) -> (i32, i32, i32) {
    %c0_i32 = arith.constant 0 : i32
    %c0_i32_0 = arith.constant 0 : i32
    %c0_i32_1 = arith.constant 0 : i32
    return %arg0, %c0_i32, %c0_i32_0 : i32, i32, i32
  }
  func.func @transform_5(%arg0: i32, %arg1: i32) -> (i32, i32, i32) {
    %c0_i32 = arith.constant 0 : i32
    %c0_i32_0 = arith.constant 0 : i32
    return %arg0, %c0_i32, %arg1 : i32, i32, i32
  }
  func.func @transform_6(%arg0: i32, %arg1: i32) -> (i32, i32, i32) {
    %c0_i32 = arith.constant 0 : i32
    %c0_i32_0 = arith.constant 0 : i32
    return %arg0, %c0_i32, %arg1 : i32, i32, i32
  }
}

module attributes {stable_mosaic.version = 11 : i64} {
  func.func @_pw_kernel(%arg0: i32, %arg1: i32, %arg2: memref<1x8x64xf32, #tpu.memory_space<vmem>>, %arg3: memref<16x8xf32, #tpu.memory_space<vmem>>, %arg4: memref<16x1xf32, #tpu.memory_space<vmem>>, %arg5: memref<16x1xf32, #tpu.memory_space<vmem>>, %arg6: memref<1x16x64xf32, #tpu.memory_space<vmem>>) attributes {dimension_semantics = [#tpu.dimension_semantics<parallel>, #tpu.dimension_semantics<parallel>], iteration_bounds = array<i64: 2, 1>, scalar_prefetch = 0 : i64, scratch_operands = 0 : i64, tpu.core_type = #tpu.core_type<tc>, window_params = [{transform_indices = @transform_0, window_bounds = array<i64: 1, 8, 64>}, {pipeline_mode = #tpu.pipeline_mode<synchronous>, transform_indices = @transform_1, window_bounds = array<i64: 16, 8>}, {pipeline_mode = #tpu.pipeline_mode<synchronous>, transform_indices = @transform_2, window_bounds = array<i64: 16, 1>}, {pipeline_mode = #tpu.pipeline_mode<synchronous>, transform_indices = @transform_3, window_bounds = array<i64: 16, 1>}, {transform_indices = @transform_4, window_bounds = array<i64: 1, 16, 64>}]} {
    %c0 = arith.constant 0 : index
    %c0_0 = arith.constant 0 : index
    %c0_1 = arith.constant 0 : index
    %0 = vector.load %arg2[%c0, %c0_0, %c0_1] : memref<1x8x64xf32, #tpu.memory_space<vmem>>, vector<1x8x64xf32>
    %1 = vector.shape_cast %0 : vector<1x8x64xf32> to vector<8x64xf32>
    %c0_2 = arith.constant 0 : index
    %c0_3 = arith.constant 0 : index
    %2 = vector.load %arg3[%c0_2, %c0_3] : memref<16x8xf32, #tpu.memory_space<vmem>>, vector<16x8xf32>
    %cst = arith.constant dense<0.000000e+00> : vector<16x64xf32>
    %3 = tpu.matmul %2, %1, %cst {dimension_numbers = #tpu.dot_dimension_numbers<[1], [0], [0], [1], [0, 0, 1, 1], [], []>} : vector<16x8xf32>, vector<8x64xf32>, vector<16x64xf32> -> vector<16x64xf32>
    %c0_4 = arith.constant 0 : index
    %c0_5 = arith.constant 0 : index
    %4 = vector.load %arg4[%c0_4, %c0_5] : memref<16x1xf32, #tpu.memory_space<vmem>>, vector<16x1xf32>
    %5 = vector.broadcast %4 : vector<16x1xf32> to vector<16x64xf32>
    %6 = arith.mulf %3, %5 : vector<16x64xf32>
    %c0_6 = arith.constant 0 : index
    %c0_7 = arith.constant 0 : index
    %7 = vector.load %arg5[%c0_6, %c0_7] : memref<16x1xf32, #tpu.memory_space<vmem>>, vector<16x1xf32>
    %8 = vector.broadcast %7 : vector<16x1xf32> to vector<16x64xf32>
    %9 = arith.addf %6, %8 : vector<16x64xf32>
    %cst_8 = arith.constant 0.000000e+00 : f32
    %10 = vector.broadcast %cst_8 : f32 to vector<16x64xf32>
    %11 = arith.maximumf %9, %10 : vector<16x64xf32>
    %c0_9 = arith.constant 0 : index
    %c0_10 = arith.constant 0 : index
    %c0_11 = arith.constant 0 : index
    %12 = vector.load %arg6[%c0_9, %c0_10, %c0_11] : memref<1x16x64xf32, #tpu.memory_space<vmem>>, vector<1x16x64xf32>
    %13 = vector.shape_cast %12 : vector<1x16x64xf32> to vector<16x64xf32>
    %14 = vector.shape_cast %11 : vector<16x64xf32> to vector<1x16x64xf32>
    tpu.vector_store %arg6[%c0_9, %c0_10, %c0_11], %14 {strides = array<i32>} : memref<1x16x64xf32, #tpu.memory_space<vmem>>, vector<1x16x64xf32>,
    return
  }
  func.func @transform_0(%arg0: i32, %arg1: i32) -> (i32, i32, i32) {
    %c0_i32 = arith.constant 0 : i32
    %c0_i32_0 = arith.constant 0 : i32
    return %arg0, %c0_i32, %arg1 : i32, i32, i32
  }
  func.func @transform_1(%arg0: i32, %arg1: i32) -> (i32, i32) {
    %c0_i32 = arith.constant 0 : i32
    %c0_i32_0 = arith.constant 0 : i32
    %c0_i32_1 = arith.constant 0 : i32
    return %c0_i32, %c0_i32_0 : i32, i32
  }
  func.func @transform_2(%arg0: i32, %arg1: i32) -> (i32, i32) {
    %c0_i32 = arith.constant 0 : i32
    %c0_i32_0 = arith.constant 0 : i32
    %c0_i32_1 = arith.constant 0 : i32
    return %c0_i32, %c0_i32_0 : i32, i32
  }
  func.func @transform_3(%arg0: i32, %arg1: i32) -> (i32, i32) {
    %c0_i32 = arith.constant 0 : i32
    %c0_i32_0 = arith.constant 0 : i32
    %c0_i32_1 = arith.constant 0 : i32
    return %c0_i32, %c0_i32_0 : i32, i32
  }
  func.func @transform_4(%arg0: i32, %arg1: i32) -> (i32, i32, i32) {
    %c0_i32 = arith.constant 0 : i32
    %c0_i32_0 = arith.constant 0 : i32
    return %arg0, %c0_i32, %arg1 : i32, i32, i32
  }
}

module attributes {stable_mosaic.version = 11 : i64} {
  func.func @_conv3x3_kernel(%arg0: i32, %arg1: memref<1x16x120xf32, #tpu.memory_space<vmem>>, %arg2: memref<9x16x16xf32, #tpu.memory_space<vmem>>, %arg3: memref<16x1xf32, #tpu.memory_space<vmem>>, %arg4: memref<16x1xf32, #tpu.memory_space<vmem>>, %arg5: memref<1x16x70xf32, #tpu.memory_space<vmem>>) attributes {dimension_semantics = [#tpu.dimension_semantics<parallel>], iteration_bounds = array<i64: 2>, scalar_prefetch = 0 : i64, scratch_operands = 0 : i64, tpu.core_type = #tpu.core_type<tc>, window_params = [{transform_indices = @transform_0, window_bounds = array<i64: 1, 16, 120>}, {pipeline_mode = #tpu.pipeline_mode<synchronous>, transform_indices = @transform_1, window_bounds = array<i64: 9, 16, 16>}, {pipeline_mode = #tpu.pipeline_mode<synchronous>, transform_indices = @transform_2, window_bounds = array<i64: 16, 1>}, {pipeline_mode = #tpu.pipeline_mode<synchronous>, transform_indices = @transform_3, window_bounds = array<i64: 16, 1>}, {transform_indices = @transform_4, window_bounds = array<i64: 1, 16, 70>}]} {
    %c0 = arith.constant 0 : index
    %c0_0 = arith.constant 0 : index
    %c0_1 = arith.constant 0 : index
    %0 = vector.load %arg2[%c0, %c0_0, %c0_1] : memref<9x16x16xf32, #tpu.memory_space<vmem>>, vector<1x16x16xf32>
    %1 = vector.shape_cast %0 : vector<1x16x16xf32> to vector<16x16xf32>
    %c0_2 = arith.constant 0 : index
    %c0_3 = arith.constant 0 : index
    %c0_4 = arith.constant 0 : index
    %2 = vector.load %arg1[%c0_2, %c0_3, %c0_4] : memref<1x16x120xf32, #tpu.memory_space<vmem>>, vector<1x16x70xf32>
    %3 = vector.shape_cast %2 : vector<1x16x70xf32> to vector<16x70xf32>
    %cst = arith.constant dense<0.000000e+00> : vector<16x70xf32>
    %4 = tpu.matmul %1, %3, %cst {dimension_numbers = #tpu.dot_dimension_numbers<[1], [0], [0], [1], [0, 0, 1, 1], [], []>} : vector<16x16xf32>, vector<16x70xf32>, vector<16x70xf32> -> vector<16x70xf32>
    %c0_5 = arith.constant 0 : index
    %c0_6 = arith.constant 0 : index
    %c0_7 = arith.constant 0 : index
    %5 = vector.load %arg5[%c0_5, %c0_6, %c0_7] : memref<1x16x70xf32, #tpu.memory_space<vmem>>, vector<1x16x70xf32>
    %6 = vector.shape_cast %5 : vector<1x16x70xf32> to vector<16x70xf32>
    %7 = vector.shape_cast %4 : vector<16x70xf32> to vector<1x16x70xf32>
    tpu.vector_store %arg5[%c0_5, %c0_6, %c0_7], %7 {strides = array<i32>} : memref<1x16x70xf32, #tpu.memory_space<vmem>>, vector<1x16x70xf32>,
    %c0_8 = arith.constant 0 : index
    %c0_9 = arith.constant 0 : index
    %c0_10 = arith.constant 0 : index
    %8 = vector.load %arg5[%c0_8, %c0_9, %c0_10] : memref<1x16x70xf32, #tpu.memory_space<vmem>>, vector<1x16x70xf32>
    %9 = vector.shape_cast %8 : vector<1x16x70xf32> to vector<16x70xf32>
    %c1 = arith.constant 1 : index
    %c0_11 = arith.constant 0 : index
    %c0_12 = arith.constant 0 : index
    %10 = vector.load %arg2[%c1, %c0_11, %c0_12] : memref<9x16x16xf32, #tpu.memory_space<vmem>>, vector<1x16x16xf32>
    %11 = vector.shape_cast %10 : vector<1x16x16xf32> to vector<16x16xf32>
    %c0_13 = arith.constant 0 : index
    %c0_14 = arith.constant 0 : index
    %c1_15 = arith.constant 1 : index
    %12 = vector.load %arg1[%c0_13, %c0_14, %c1_15] : memref<1x16x120xf32, #tpu.memory_space<vmem>>, vector<1x16x70xf32>
    %13 = vector.shape_cast %12 : vector<1x16x70xf32> to vector<16x70xf32>
    %cst_16 = arith.constant dense<0.000000e+00> : vector<16x70xf32>
    %14 = tpu.matmul %11, %13, %cst_16 {dimension_numbers = #tpu.dot_dimension_numbers<[1], [0], [0], [1], [0, 0, 1, 1], [], []>} : vector<16x16xf32>, vector<16x70xf32>, vector<16x70xf32> -> vector<16x70xf32>
    %15 = arith.addf %9, %14 : vector<16x70xf32>
    %c0_17 = arith.constant 0 : index
    %c0_18 = arith.constant 0 : index
    %c0_19 = arith.constant 0 : index
    %16 = vector.load %arg5[%c0_17, %c0_18, %c0_19] : memref<1x16x70xf32, #tpu.memory_space<vmem>>, vector<1x16x70xf32>
    %17 = vector.shape_cast %16 : vector<1x16x70xf32> to vector<16x70xf32>
    %18 = vector.shape_cast %15 : vector<16x70xf32> to vector<1x16x70xf32>
    tpu.vector_store %arg5[%c0_17, %c0_18, %c0_19], %18 {strides = array<i32>} : memref<1x16x70xf32, #tpu.memory_space<vmem>>, vector<1x16x70xf32>,
    %c0_20 = arith.constant 0 : index
    %c0_21 = arith.constant 0 : index
    %c0_22 = arith.constant 0 : index
    %19 = vector.load %arg5[%c0_20, %c0_21, %c0_22] : memref<1x16x70xf32, #tpu.memory_space<vmem>>, vector<1x16x70xf32>
    %20 = vector.shape_cast %19 : vector<1x16x70xf32> to vector<16x70xf32>
    %c2 = arith.constant 2 : index
    %c0_23 = arith.constant 0 : index
    %c0_24 = arith.constant 0 : index
    %21 = vector.load %arg2[%c2, %c0_23, %c0_24] : memref<9x16x16xf32, #tpu.memory_space<vmem>>, vector<1x16x16xf32>
    %22 = vector.shape_cast %21 : vector<1x16x16xf32> to vector<16x16xf32>
    %c0_25 = arith.constant 0 : index
    %c0_26 = arith.constant 0 : index
    %c2_27 = arith.constant 2 : index
    %23 = vector.load %arg1[%c0_25, %c0_26, %c2_27] : memref<1x16x120xf32, #tpu.memory_space<vmem>>, vector<1x16x70xf32>
    %24 = vector.shape_cast %23 : vector<1x16x70xf32> to vector<16x70xf32>
    %cst_28 = arith.constant dense<0.000000e+00> : vector<16x70xf32>
    %25 = tpu.matmul %22, %24, %cst_28 {dimension_numbers = #tpu.dot_dimension_numbers<[1], [0], [0], [1], [0, 0, 1, 1], [], []>} : vector<16x16xf32>, vector<16x70xf32>, vector<16x70xf32> -> vector<16x70xf32>
    %26 = arith.addf %20, %25 : vector<16x70xf32>
    %c0_29 = arith.constant 0 : index
    %c0_30 = arith.constant 0 : index
    %c0_31 = arith.constant 0 : index
    %27 = vector.load %arg5[%c0_29, %c0_30, %c0_31] : memref<1x16x70xf32, #tpu.memory_space<vmem>>, vector<1x16x70xf32>
    %28 = vector.shape_cast %27 : vector<1x16x70xf32> to vector<16x70xf32>
    %29 = vector.shape_cast %26 : vector<16x70xf32> to vector<1x16x70xf32>
    tpu.vector_store %arg5[%c0_29, %c0_30, %c0_31], %29 {strides = array<i32>} : memref<1x16x70xf32, #tpu.memory_space<vmem>>, vector<1x16x70xf32>,
    %c0_32 = arith.constant 0 : index
    %c0_33 = arith.constant 0 : index
    %c0_34 = arith.constant 0 : index
    %30 = vector.load %arg5[%c0_32, %c0_33, %c0_34] : memref<1x16x70xf32, #tpu.memory_space<vmem>>, vector<1x16x70xf32>
    %31 = vector.shape_cast %30 : vector<1x16x70xf32> to vector<16x70xf32>
    %c3 = arith.constant 3 : index
    %c0_35 = arith.constant 0 : index
    %c0_36 = arith.constant 0 : index
    %32 = vector.load %arg2[%c3, %c0_35, %c0_36] : memref<9x16x16xf32, #tpu.memory_space<vmem>>, vector<1x16x16xf32>
    %33 = vector.shape_cast %32 : vector<1x16x16xf32> to vector<16x16xf32>
    %c0_37 = arith.constant 0 : index
    %c0_38 = arith.constant 0 : index
    %c10 = arith.constant 10 : index
    %34 = vector.load %arg1[%c0_37, %c0_38, %c10] : memref<1x16x120xf32, #tpu.memory_space<vmem>>, vector<1x16x70xf32>
    %35 = vector.shape_cast %34 : vector<1x16x70xf32> to vector<16x70xf32>
    %cst_39 = arith.constant dense<0.000000e+00> : vector<16x70xf32>
    %36 = tpu.matmul %33, %35, %cst_39 {dimension_numbers = #tpu.dot_dimension_numbers<[1], [0], [0], [1], [0, 0, 1, 1], [], []>} : vector<16x16xf32>, vector<16x70xf32>, vector<16x70xf32> -> vector<16x70xf32>
    %37 = arith.addf %31, %36 : vector<16x70xf32>
    %c0_40 = arith.constant 0 : index
    %c0_41 = arith.constant 0 : index
    %c0_42 = arith.constant 0 : index
    %38 = vector.load %arg5[%c0_40, %c0_41, %c0_42] : memref<1x16x70xf32, #tpu.memory_space<vmem>>, vector<1x16x70xf32>
    %39 = vector.shape_cast %38 : vector<1x16x70xf32> to vector<16x70xf32>
    %40 = vector.shape_cast %37 : vector<16x70xf32> to vector<1x16x70xf32>
    tpu.vector_store %arg5[%c0_40, %c0_41, %c0_42], %40 {strides = array<i32>} : memref<1x16x70xf32, #tpu.memory_space<vmem>>, vector<1x16x70xf32>,
    %c0_43 = arith.constant 0 : index
    %c0_44 = arith.constant 0 : index
    %c0_45 = arith.constant 0 : index
    %41 = vector.load %arg5[%c0_43, %c0_44, %c0_45] : memref<1x16x70xf32, #tpu.memory_space<vmem>>, vector<1x16x70xf32>
    %42 = vector.shape_cast %41 : vector<1x16x70xf32> to vector<16x70xf32>
    %c4 = arith.constant 4 : index
    %c0_46 = arith.constant 0 : index
    %c0_47 = arith.constant 0 : index
    %43 = vector.load %arg2[%c4, %c0_46, %c0_47] : memref<9x16x16xf32, #tpu.memory_space<vmem>>, vector<1x16x16xf32>
    %44 = vector.shape_cast %43 : vector<1x16x16xf32> to vector<16x16xf32>
    %c0_48 = arith.constant 0 : index
    %c0_49 = arith.constant 0 : index
    %c11 = arith.constant 11 : index
    %45 = vector.load %arg1[%c0_48, %c0_49, %c11] : memref<1x16x120xf32, #tpu.memory_space<vmem>>, vector<1x16x70xf32>
    %46 = vector.shape_cast %45 : vector<1x16x70xf32> to vector<16x70xf32>
    %cst_50 = arith.constant dense<0.000000e+00> : vector<16x70xf32>
    %47 = tpu.matmul %44, %46, %cst_50 {dimension_numbers = #tpu.dot_dimension_numbers<[1], [0], [0], [1], [0, 0, 1, 1], [], []>} : vector<16x16xf32>, vector<16x70xf32>, vector<16x70xf32> -> vector<16x70xf32>
    %48 = arith.addf %42, %47 : vector<16x70xf32>
    %c0_51 = arith.constant 0 : index
    %c0_52 = arith.constant 0 : index
    %c0_53 = arith.constant 0 : index
    %49 = vector.load %arg5[%c0_51, %c0_52, %c0_53] : memref<1x16x70xf32, #tpu.memory_space<vmem>>, vector<1x16x70xf32>
    %50 = vector.shape_cast %49 : vector<1x16x70xf32> to vector<16x70xf32>
    %51 = vector.shape_cast %48 : vector<16x70xf32> to vector<1x16x70xf32>
    tpu.vector_store %arg5[%c0_51, %c0_52, %c0_53], %51 {strides = array<i32>} : memref<1x16x70xf32, #tpu.memory_space<vmem>>, vector<1x16x70xf32>,
    %c0_54 = arith.constant 0 : index
    %c0_55 = arith.constant 0 : index
    %c0_56 = arith.constant 0 : index
    %52 = vector.load %arg5[%c0_54, %c0_55, %c0_56] : memref<1x16x70xf32, #tpu.memory_space<vmem>>, vector<1x16x70xf32>
    %53 = vector.shape_cast %52 : vector<1x16x70xf32> to vector<16x70xf32>
    %c5 = arith.constant 5 : index
    %c0_57 = arith.constant 0 : index
    %c0_58 = arith.constant 0 : index
    %54 = vector.load %arg2[%c5, %c0_57, %c0_58] : memref<9x16x16xf32, #tpu.memory_space<vmem>>, vector<1x16x16xf32>
    %55 = vector.shape_cast %54 : vector<1x16x16xf32> to vector<16x16xf32>
    %c0_59 = arith.constant 0 : index
    %c0_60 = arith.constant 0 : index
    %c12 = arith.constant 12 : index
    %56 = vector.load %arg1[%c0_59, %c0_60, %c12] : memref<1x16x120xf32, #tpu.memory_space<vmem>>, vector<1x16x70xf32>
    %57 = vector.shape_cast %56 : vector<1x16x70xf32> to vector<16x70xf32>
    %cst_61 = arith.constant dense<0.000000e+00> : vector<16x70xf32>
    %58 = tpu.matmul %55, %57, %cst_61 {dimension_numbers = #tpu.dot_dimension_numbers<[1], [0], [0], [1], [0, 0, 1, 1], [], []>} : vector<16x16xf32>, vector<16x70xf32>, vector<16x70xf32> -> vector<16x70xf32>
    %59 = arith.addf %53, %58 : vector<16x70xf32>
    %c0_62 = arith.constant 0 : index
    %c0_63 = arith.constant 0 : index
    %c0_64 = arith.constant 0 : index
    %60 = vector.load %arg5[%c0_62, %c0_63, %c0_64] : memref<1x16x70xf32, #tpu.memory_space<vmem>>, vector<1x16x70xf32>
    %61 = vector.shape_cast %60 : vector<1x16x70xf32> to vector<16x70xf32>
    %62 = vector.shape_cast %59 : vector<16x70xf32> to vector<1x16x70xf32>
    tpu.vector_store %arg5[%c0_62, %c0_63, %c0_64], %62 {strides = array<i32>} : memref<1x16x70xf32, #tpu.memory_space<vmem>>, vector<1x16x70xf32>,
    %c0_65 = arith.constant 0 : index
    %c0_66 = arith.constant 0 : index
    %c0_67 = arith.constant 0 : index
    %63 = vector.load %arg5[%c0_65, %c0_66, %c0_67] : memref<1x16x70xf32, #tpu.memory_space<vmem>>, vector<1x16x70xf32>
    %64 = vector.shape_cast %63 : vector<1x16x70xf32> to vector<16x70xf32>
    %c6 = arith.constant 6 : index
    %c0_68 = arith.constant 0 : index
    %c0_69 = arith.constant 0 : index
    %65 = vector.load %arg2[%c6, %c0_68, %c0_69] : memref<9x16x16xf32, #tpu.memory_space<vmem>>, vector<1x16x16xf32>
    %66 = vector.shape_cast %65 : vector<1x16x16xf32> to vector<16x16xf32>
    %c0_70 = arith.constant 0 : index
    %c0_71 = arith.constant 0 : index
    %c20 = arith.constant 20 : index
    %67 = vector.load %arg1[%c0_70, %c0_71, %c20] : memref<1x16x120xf32, #tpu.memory_space<vmem>>, vector<1x16x70xf32>
    %68 = vector.shape_cast %67 : vector<1x16x70xf32> to vector<16x70xf32>
    %cst_72 = arith.constant dense<0.000000e+00> : vector<16x70xf32>
    %69 = tpu.matmul %66, %68, %cst_72 {dimension_numbers = #tpu.dot_dimension_numbers<[1], [0], [0], [1], [0, 0, 1, 1], [], []>} : vector<16x16xf32>, vector<16x70xf32>, vector<16x70xf32> -> vector<16x70xf32>
    %70 = arith.addf %64, %69 : vector<16x70xf32>
    %c0_73 = arith.constant 0 : index
    %c0_74 = arith.constant 0 : index
    %c0_75 = arith.constant 0 : index
    %71 = vector.load %arg5[%c0_73, %c0_74, %c0_75] : memref<1x16x70xf32, #tpu.memory_space<vmem>>, vector<1x16x70xf32>
    %72 = vector.shape_cast %71 : vector<1x16x70xf32> to vector<16x70xf32>
    %73 = vector.shape_cast %70 : vector<16x70xf32> to vector<1x16x70xf32>
    tpu.vector_store %arg5[%c0_73, %c0_74, %c0_75], %73 {strides = array<i32>} : memref<1x16x70xf32, #tpu.memory_space<vmem>>, vector<1x16x70xf32>,
    %c0_76 = arith.constant 0 : index
    %c0_77 = arith.constant 0 : index
    %c0_78 = arith.constant 0 : index
    %74 = vector.load %arg5[%c0_76, %c0_77, %c0_78] : memref<1x16x70xf32, #tpu.memory_space<vmem>>, vector<1x16x70xf32>
    %75 = vector.shape_cast %74 : vector<1x16x70xf32> to vector<16x70xf32>
    %c7 = arith.constant 7 : index
    %c0_79 = arith.constant 0 : index
    %c0_80 = arith.constant 0 : index
    %76 = vector.load %arg2[%c7, %c0_79, %c0_80] : memref<9x16x16xf32, #tpu.memory_space<vmem>>, vector<1x16x16xf32>
    %77 = vector.shape_cast %76 : vector<1x16x16xf32> to vector<16x16xf32>
    %c0_81 = arith.constant 0 : index
    %c0_82 = arith.constant 0 : index
    %c21 = arith.constant 21 : index
    %78 = vector.load %arg1[%c0_81, %c0_82, %c21] : memref<1x16x120xf32, #tpu.memory_space<vmem>>, vector<1x16x70xf32>
    %79 = vector.shape_cast %78 : vector<1x16x70xf32> to vector<16x70xf32>
    %cst_83 = arith.constant dense<0.000000e+00> : vector<16x70xf32>
    %80 = tpu.matmul %77, %79, %cst_83 {dimension_numbers = #tpu.dot_dimension_numbers<[1], [0], [0], [1], [0, 0, 1, 1], [], []>} : vector<16x16xf32>, vector<16x70xf32>, vector<16x70xf32> -> vector<16x70xf32>
    %81 = arith.addf %75, %80 : vector<16x70xf32>
    %c0_84 = arith.constant 0 : index
    %c0_85 = arith.constant 0 : index
    %c0_86 = arith.constant 0 : index
    %82 = vector.load %arg5[%c0_84, %c0_85, %c0_86] : memref<1x16x70xf32, #tpu.memory_space<vmem>>, vector<1x16x70xf32>
    %83 = vector.shape_cast %82 : vector<1x16x70xf32> to vector<16x70xf32>
    %84 = vector.shape_cast %81 : vector<16x70xf32> to vector<1x16x70xf32>
    tpu.vector_store %arg5[%c0_84, %c0_85, %c0_86], %84 {strides = array<i32>} : memref<1x16x70xf32, #tpu.memory_space<vmem>>, vector<1x16x70xf32>,
    %c0_87 = arith.constant 0 : index
    %c0_88 = arith.constant 0 : index
    %c0_89 = arith.constant 0 : index
    %85 = vector.load %arg5[%c0_87, %c0_88, %c0_89] : memref<1x16x70xf32, #tpu.memory_space<vmem>>, vector<1x16x70xf32>
    %86 = vector.shape_cast %85 : vector<1x16x70xf32> to vector<16x70xf32>
    %c8 = arith.constant 8 : index
    %c0_90 = arith.constant 0 : index
    %c0_91 = arith.constant 0 : index
    %87 = vector.load %arg2[%c8, %c0_90, %c0_91] : memref<9x16x16xf32, #tpu.memory_space<vmem>>, vector<1x16x16xf32>
    %88 = vector.shape_cast %87 : vector<1x16x16xf32> to vector<16x16xf32>
    %c0_92 = arith.constant 0 : index
    %c0_93 = arith.constant 0 : index
    %c22 = arith.constant 22 : index
    %89 = vector.load %arg1[%c0_92, %c0_93, %c22] : memref<1x16x120xf32, #tpu.memory_space<vmem>>, vector<1x16x70xf32>
    %90 = vector.shape_cast %89 : vector<1x16x70xf32> to vector<16x70xf32>
    %cst_94 = arith.constant dense<0.000000e+00> : vector<16x70xf32>
    %91 = tpu.matmul %88, %90, %cst_94 {dimension_numbers = #tpu.dot_dimension_numbers<[1], [0], [0], [1], [0, 0, 1, 1], [], []>} : vector<16x16xf32>, vector<16x70xf32>, vector<16x70xf32> -> vector<16x70xf32>
    %92 = arith.addf %86, %91 : vector<16x70xf32>
    %c0_95 = arith.constant 0 : index
    %c0_96 = arith.constant 0 : index
    %c0_97 = arith.constant 0 : index
    %93 = vector.load %arg5[%c0_95, %c0_96, %c0_97] : memref<1x16x70xf32, #tpu.memory_space<vmem>>, vector<1x16x70xf32>
    %94 = vector.shape_cast %93 : vector<1x16x70xf32> to vector<16x70xf32>
    %95 = vector.shape_cast %92 : vector<16x70xf32> to vector<1x16x70xf32>
    tpu.vector_store %arg5[%c0_95, %c0_96, %c0_97], %95 {strides = array<i32>} : memref<1x16x70xf32, #tpu.memory_space<vmem>>, vector<1x16x70xf32>,
    %c0_98 = arith.constant 0 : index
    %c0_99 = arith.constant 0 : index
    %c0_100 = arith.constant 0 : index
    %96 = vector.load %arg5[%c0_98, %c0_99, %c0_100] : memref<1x16x70xf32, #tpu.memory_space<vmem>>, vector<1x16x70xf32>
    %97 = vector.shape_cast %96 : vector<1x16x70xf32> to vector<16x70xf32>
    %c0_101 = arith.constant 0 : index
    %c0_102 = arith.constant 0 : index
    %98 = vector.load %arg3[%c0_101, %c0_102] : memref<16x1xf32, #tpu.memory_space<vmem>>, vector<16x1xf32>
    %99 = vector.broadcast %98 : vector<16x1xf32> to vector<16x70xf32>
    %100 = arith.mulf %97, %99 : vector<16x70xf32>
    %c0_103 = arith.constant 0 : index
    %c0_104 = arith.constant 0 : index
    %101 = vector.load %arg4[%c0_103, %c0_104] : memref<16x1xf32, #tpu.memory_space<vmem>>, vector<16x1xf32>
    %102 = vector.broadcast %101 : vector<16x1xf32> to vector<16x70xf32>
    %103 = arith.addf %100, %102 : vector<16x70xf32>
    %cst_105 = arith.constant 0.000000e+00 : f32
    %104 = vector.broadcast %cst_105 : f32 to vector<16x70xf32>
    %105 = arith.maximumf %103, %104 : vector<16x70xf32>
    %c0_106 = arith.constant 0 : index
    %c0_107 = arith.constant 0 : index
    %c0_108 = arith.constant 0 : index
    %106 = vector.load %arg5[%c0_106, %c0_107, %c0_108] : memref<1x16x70xf32, #tpu.memory_space<vmem>>, vector<1x16x70xf32>
    %107 = vector.shape_cast %106 : vector<1x16x70xf32> to vector<16x70xf32>
    %108 = vector.shape_cast %105 : vector<16x70xf32> to vector<1x16x70xf32>
    tpu.vector_store %arg5[%c0_106, %c0_107, %c0_108], %108 {strides = array<i32>} : memref<1x16x70xf32, #tpu.memory_space<vmem>>, vector<1x16x70xf32>,
    return
  }
  func.func @transform_0(%arg0: i32) -> (i32, i32, i32) {
    %c0_i32 = arith.constant 0 : i32
    %c0_i32_0 = arith.constant 0 : i32
    %c0_i32_1 = arith.constant 0 : i32
    return %arg0, %c0_i32, %c0_i32_0 : i32, i32, i32
  }
  func.func @transform_1(%arg0: i32) -> (i32, i32, i32) {
    %c0_i32 = arith.constant 0 : i32
    %c0_i32_0 = arith.constant 0 : i32
    %c0_i32_1 = arith.constant 0 : i32
    %c0_i32_2 = arith.constant 0 : i32
    return %c0_i32, %c0_i32_0, %c0_i32_1 : i32, i32, i32
  }
  func.func @transform_2(%arg0: i32) -> (i32, i32) {
    %c0_i32 = arith.constant 0 : i32
    %c0_i32_0 = arith.constant 0 : i32
    %c0_i32_1 = arith.constant 0 : i32
    return %c0_i32, %c0_i32_0 : i32, i32
  }
  func.func @transform_3(%arg0: i32) -> (i32, i32) {
    %c0_i32 = arith.constant 0 : i32
    %c0_i32_0 = arith.constant 0 : i32
    %c0_i32_1 = arith.constant 0 : i32
    return %c0_i32, %c0_i32_0 : i32, i32
  }
  func.func @transform_4(%arg0: i32) -> (i32, i32, i32) {
    %c0_i32 = arith.constant 0 : i32
    %c0_i32_0 = arith.constant 0 : i32
    %c0_i32_1 = arith.constant 0 : i32
    return %arg0, %c0_i32, %c0_i32_0 : i32, i32, i32
  }
}

module attributes {stable_mosaic.version = 11 : i64} {
  func.func @_se_gate_kernel(%arg0: i32, %arg1: memref<1x16x16xf32, #tpu.memory_space<vmem>>, %arg2: memref<2x16xf32, #tpu.memory_space<vmem>>, %arg3: memref<2x1xf32, #tpu.memory_space<vmem>>, %arg4: memref<16x2xf32, #tpu.memory_space<vmem>>, %arg5: memref<16x1xf32, #tpu.memory_space<vmem>>, %arg6: memref<1x16x1xf32, #tpu.memory_space<vmem>>) attributes {dimension_semantics = [#tpu.dimension_semantics<parallel>], iteration_bounds = array<i64: 2>, scalar_prefetch = 0 : i64, scratch_operands = 0 : i64, tpu.core_type = #tpu.core_type<tc>, window_params = [{transform_indices = @transform_0, window_bounds = array<i64: 1, 16, 16>}, {pipeline_mode = #tpu.pipeline_mode<synchronous>, transform_indices = @transform_1, window_bounds = array<i64: 2, 16>}, {pipeline_mode = #tpu.pipeline_mode<synchronous>, transform_indices = @transform_2, window_bounds = array<i64: 2, 1>}, {pipeline_mode = #tpu.pipeline_mode<synchronous>, transform_indices = @transform_3, window_bounds = array<i64: 16, 2>}, {pipeline_mode = #tpu.pipeline_mode<synchronous>, transform_indices = @transform_4, window_bounds = array<i64: 16, 1>}, {transform_indices = @transform_5, window_bounds = array<i64: 1, 16, 1>}]} {
    %c0 = arith.constant 0 : index
    %c0_0 = arith.constant 0 : index
    %c0_1 = arith.constant 0 : index
    %0 = vector.load %arg1[%c0, %c0_0, %c0_1] : memref<1x16x16xf32, #tpu.memory_space<vmem>>, vector<1x16x16xf32>
    %1 = vector.shape_cast %0 : vector<1x16x16xf32> to vector<16x16xf32>
    %cst = arith.constant dense<0.000000e+00> : vector<16xf32>
    %2 = vector.multi_reduction <add>, %1, %cst [1] : vector<16x16xf32> to vector<16xf32>
    %3 = vector.shape_cast %2 : vector<16xf32> to vector<16x1xf32>
    %cst_2 = arith.constant 1.600000e+01 : f32
    %4 = vector.broadcast %cst_2 : f32 to vector<16x1xf32>
    %5 = arith.divf %3, %4 : vector<16x1xf32>
    %c0_3 = arith.constant 0 : index
    %c0_4 = arith.constant 0 : index
    %6 = vector.load %arg2[%c0_3, %c0_4] : memref<2x16xf32, #tpu.memory_space<vmem>>, vector<2x16xf32>
    %cst_5 = arith.constant dense<0.000000e+00> : vector<2x1xf32>
    %7 = tpu.matmul %6, %5, %cst_5 {dimension_numbers = #tpu.dot_dimension_numbers<[1], [0], [0], [1], [0, 0, 1, 1], [], []>} : vector<2x16xf32>, vector<16x1xf32>, vector<2x1xf32> -> vector<2x1xf32>
    %c0_6 = arith.constant 0 : index
    %c0_7 = arith.constant 0 : index
    %8 = vector.load %arg3[%c0_6, %c0_7] : memref<2x1xf32, #tpu.memory_space<vmem>>, vector<2x1xf32>
    %9 = arith.addf %7, %8 : vector<2x1xf32>
    %cst_8 = arith.constant 0.000000e+00 : f32
    %10 = vector.broadcast %cst_8 : f32 to vector<2x1xf32>
    %11 = arith.maximumf %9, %10 : vector<2x1xf32>
    %c0_9 = arith.constant 0 : index
    %c0_10 = arith.constant 0 : index
    %12 = vector.load %arg4[%c0_9, %c0_10] : memref<16x2xf32, #tpu.memory_space<vmem>>, vector<16x2xf32>
    %cst_11 = arith.constant dense<0.000000e+00> : vector<16x1xf32>
    %13 = tpu.matmul %12, %11, %cst_11 {dimension_numbers = #tpu.dot_dimension_numbers<[1], [0], [0], [1], [0, 0, 1, 1], [], []>} : vector<16x2xf32>, vector<2x1xf32>, vector<16x1xf32> -> vector<16x1xf32>
    %c0_12 = arith.constant 0 : index
    %c0_13 = arith.constant 0 : index
    %14 = vector.load %arg5[%c0_12, %c0_13] : memref<16x1xf32, #tpu.memory_space<vmem>>, vector<16x1xf32>
    %15 = arith.addf %13, %14 : vector<16x1xf32>
    %16 = arith.negf %15 : vector<16x1xf32>
    %17 = math.exp %16 : vector<16x1xf32>
    %cst_14 = arith.constant 1.000000e+00 : f32
    %18 = vector.broadcast %cst_14 : f32 to vector<16x1xf32>
    %19 = arith.addf %18, %17 : vector<16x1xf32>
    %20 = arith.divf %18, %19 : vector<16x1xf32>
    %c0_15 = arith.constant 0 : index
    %c0_16 = arith.constant 0 : index
    %c0_17 = arith.constant 0 : index
    %21 = vector.load %arg6[%c0_15, %c0_16, %c0_17] : memref<1x16x1xf32, #tpu.memory_space<vmem>>, vector<1x16x1xf32>
    %22 = vector.shape_cast %21 : vector<1x16x1xf32> to vector<16x1xf32>
    %23 = vector.shape_cast %20 : vector<16x1xf32> to vector<1x16x1xf32>
    tpu.vector_store %arg6[%c0_15, %c0_16, %c0_17], %23 {strides = array<i32>} : memref<1x16x1xf32, #tpu.memory_space<vmem>>, vector<1x16x1xf32>,
    return
  }
  func.func @transform_0(%arg0: i32) -> (i32, i32, i32) {
    %c0_i32 = arith.constant 0 : i32
    %c0_i32_0 = arith.constant 0 : i32
    %c0_i32_1 = arith.constant 0 : i32
    return %arg0, %c0_i32, %c0_i32_0 : i32, i32, i32
  }
  func.func @transform_1(%arg0: i32) -> (i32, i32) {
    %c0_i32 = arith.constant 0 : i32
    %c0_i32_0 = arith.constant 0 : i32
    %c0_i32_1 = arith.constant 0 : i32
    return %c0_i32, %c0_i32_0 : i32, i32
  }
  func.func @transform_2(%arg0: i32) -> (i32, i32) {
    %c0_i32 = arith.constant 0 : i32
    %c0_i32_0 = arith.constant 0 : i32
    %c0_i32_1 = arith.constant 0 : i32
    return %c0_i32, %c0_i32_0 : i32, i32
  }
  func.func @transform_3(%arg0: i32) -> (i32, i32) {
    %c0_i32 = arith.constant 0 : i32
    %c0_i32_0 = arith.constant 0 : i32
    %c0_i32_1 = arith.constant 0 : i32
    return %c0_i32, %c0_i32_0 : i32, i32
  }
  func.func @transform_4(%arg0: i32) -> (i32, i32) {
    %c0_i32 = arith.constant 0 : i32
    %c0_i32_0 = arith.constant 0 : i32
    %c0_i32_1 = arith.constant 0 : i32
    return %c0_i32, %c0_i32_0 : i32, i32
  }
  func.func @transform_5(%arg0: i32) -> (i32, i32, i32) {
    %c0_i32 = arith.constant 0 : i32
    %c0_i32_0 = arith.constant 0 : i32
    %c0_i32_1 = arith.constant 0 : i32
    return %arg0, %c0_i32, %c0_i32_0 : i32, i32, i32
  }
}

module attributes {stable_mosaic.version = 11 : i64} {
  func.func @_pw_kernel(%arg0: i32, %arg1: i32, %arg2: memref<1x16x16xf32, #tpu.memory_space<vmem>>, %arg3: memref<16x16xf32, #tpu.memory_space<vmem>>, %arg4: memref<16x1xf32, #tpu.memory_space<vmem>>, %arg5: memref<16x1xf32, #tpu.memory_space<vmem>>, %arg6: memref<1x16x1xf32, #tpu.memory_space<vmem>>, %arg7: memref<1x8x16xf32, #tpu.memory_space<vmem>>, %arg8: memref<16x8xf32, #tpu.memory_space<vmem>>, %arg9: memref<16x1xf32, #tpu.memory_space<vmem>>, %arg10: memref<16x1xf32, #tpu.memory_space<vmem>>, %arg11: memref<1x16x16xf32, #tpu.memory_space<vmem>>) attributes {dimension_semantics = [#tpu.dimension_semantics<parallel>, #tpu.dimension_semantics<parallel>], iteration_bounds = array<i64: 2, 1>, scalar_prefetch = 0 : i64, scratch_operands = 0 : i64, tpu.core_type = #tpu.core_type<tc>, window_params = [{transform_indices = @transform_0, window_bounds = array<i64: 1, 16, 16>}, {pipeline_mode = #tpu.pipeline_mode<synchronous>, transform_indices = @transform_1, window_bounds = array<i64: 16, 16>}, {pipeline_mode = #tpu.pipeline_mode<synchronous>, transform_indices = @transform_2, window_bounds = array<i64: 16, 1>}, {pipeline_mode = #tpu.pipeline_mode<synchronous>, transform_indices = @transform_3, window_bounds = array<i64: 16, 1>}, {transform_indices = @transform_4, window_bounds = array<i64: 1, 16, 1>}, {transform_indices = @transform_5, window_bounds = array<i64: 1, 8, 16>}, {pipeline_mode = #tpu.pipeline_mode<synchronous>, transform_indices = @transform_6, window_bounds = array<i64: 16, 8>}, {pipeline_mode = #tpu.pipeline_mode<synchronous>, transform_indices = @transform_7, window_bounds = array<i64: 16, 1>}, {pipeline_mode = #tpu.pipeline_mode<synchronous>, transform_indices = @transform_8, window_bounds = array<i64: 16, 1>}, {transform_indices = @transform_9, window_bounds = array<i64: 1, 16, 16>}]} {
    %c0 = arith.constant 0 : index
    %c0_0 = arith.constant 0 : index
    %c0_1 = arith.constant 0 : index
    %0 = vector.load %arg2[%c0, %c0_0, %c0_1] : memref<1x16x16xf32, #tpu.memory_space<vmem>>, vector<1x16x16xf32>
    %1 = vector.shape_cast %0 : vector<1x16x16xf32> to vector<16x16xf32>
    %c0_2 = arith.constant 0 : index
    %c0_3 = arith.constant 0 : index
    %c0_4 = arith.constant 0 : index
    %2 = vector.load %arg6[%c0_2, %c0_3, %c0_4] : memref<1x16x1xf32, #tpu.memory_space<vmem>>, vector<1x16x1xf32>
    %3 = vector.shape_cast %2 : vector<1x16x1xf32> to vector<16x1xf32>
    %4 = vector.broadcast %3 : vector<16x1xf32> to vector<16x16xf32>
    %5 = arith.mulf %1, %4 : vector<16x16xf32>
    %c0_5 = arith.constant 0 : index
    %c0_6 = arith.constant 0 : index
    %6 = vector.load %arg3[%c0_5, %c0_6] : memref<16x16xf32, #tpu.memory_space<vmem>>, vector<16x16xf32>
    %cst = arith.constant dense<0.000000e+00> : vector<16x16xf32>
    %7 = tpu.matmul %6, %5, %cst {dimension_numbers = #tpu.dot_dimension_numbers<[1], [0], [0], [1], [0, 0, 1, 1], [], []>} : vector<16x16xf32>, vector<16x16xf32>, vector<16x16xf32> -> vector<16x16xf32>
    %c0_7 = arith.constant 0 : index
    %c0_8 = arith.constant 0 : index
    %8 = vector.load %arg4[%c0_7, %c0_8] : memref<16x1xf32, #tpu.memory_space<vmem>>, vector<16x1xf32>
    %9 = vector.broadcast %8 : vector<16x1xf32> to vector<16x16xf32>
    %10 = arith.mulf %7, %9 : vector<16x16xf32>
    %c0_9 = arith.constant 0 : index
    %c0_10 = arith.constant 0 : index
    %11 = vector.load %arg5[%c0_9, %c0_10] : memref<16x1xf32, #tpu.memory_space<vmem>>, vector<16x1xf32>
    %12 = vector.broadcast %11 : vector<16x1xf32> to vector<16x16xf32>
    %13 = arith.addf %10, %12 : vector<16x16xf32>
    %c0_11 = arith.constant 0 : index
    %c0_12 = arith.constant 0 : index
    %14 = vector.load %arg8[%c0_11, %c0_12] : memref<16x8xf32, #tpu.memory_space<vmem>>, vector<16x8xf32>
    %c0_13 = arith.constant 0 : index
    %c0_14 = arith.constant 0 : index
    %c0_15 = arith.constant 0 : index
    %15 = vector.load %arg7[%c0_13, %c0_14, %c0_15] : memref<1x8x16xf32, #tpu.memory_space<vmem>>, vector<1x8x16xf32>
    %16 = vector.shape_cast %15 : vector<1x8x16xf32> to vector<8x16xf32>
    %cst_16 = arith.constant dense<0.000000e+00> : vector<16x16xf32>
    %17 = tpu.matmul %14, %16, %cst_16 {dimension_numbers = #tpu.dot_dimension_numbers<[1], [0], [0], [1], [0, 0, 1, 1], [], []>} : vector<16x8xf32>, vector<8x16xf32>, vector<16x16xf32> -> vector<16x16xf32>
    %c0_17 = arith.constant 0 : index
    %c0_18 = arith.constant 0 : index
    %18 = vector.load %arg9[%c0_17, %c0_18] : memref<16x1xf32, #tpu.memory_space<vmem>>, vector<16x1xf32>
    %19 = vector.broadcast %18 : vector<16x1xf32> to vector<16x16xf32>
    %20 = arith.mulf %17, %19 : vector<16x16xf32>
    %c0_19 = arith.constant 0 : index
    %c0_20 = arith.constant 0 : index
    %21 = vector.load %arg10[%c0_19, %c0_20] : memref<16x1xf32, #tpu.memory_space<vmem>>, vector<16x1xf32>
    %22 = vector.broadcast %21 : vector<16x1xf32> to vector<16x16xf32>
    %23 = arith.addf %20, %22 : vector<16x16xf32>
    %24 = arith.addf %13, %23 : vector<16x16xf32>
    %cst_21 = arith.constant 0.000000e+00 : f32
    %25 = vector.broadcast %cst_21 : f32 to vector<16x16xf32>
    %26 = arith.maximumf %24, %25 : vector<16x16xf32>
    %c0_22 = arith.constant 0 : index
    %c0_23 = arith.constant 0 : index
    %c0_24 = arith.constant 0 : index
    %27 = vector.load %arg11[%c0_22, %c0_23, %c0_24] : memref<1x16x16xf32, #tpu.memory_space<vmem>>, vector<1x16x16xf32>
    %28 = vector.shape_cast %27 : vector<1x16x16xf32> to vector<16x16xf32>
    %29 = vector.shape_cast %26 : vector<16x16xf32> to vector<1x16x16xf32>
    tpu.vector_store %arg11[%c0_22, %c0_23, %c0_24], %29 {strides = array<i32>} : memref<1x16x16xf32, #tpu.memory_space<vmem>>, vector<1x16x16xf32>,
    return
  }
  func.func @transform_0(%arg0: i32, %arg1: i32) -> (i32, i32, i32) {
    %c0_i32 = arith.constant 0 : i32
    %c0_i32_0 = arith.constant 0 : i32
    return %arg0, %c0_i32, %arg1 : i32, i32, i32
  }
  func.func @transform_1(%arg0: i32, %arg1: i32) -> (i32, i32) {
    %c0_i32 = arith.constant 0 : i32
    %c0_i32_0 = arith.constant 0 : i32
    %c0_i32_1 = arith.constant 0 : i32
    return %c0_i32, %c0_i32_0 : i32, i32
  }
  func.func @transform_2(%arg0: i32, %arg1: i32) -> (i32, i32) {
    %c0_i32 = arith.constant 0 : i32
    %c0_i32_0 = arith.constant 0 : i32
    %c0_i32_1 = arith.constant 0 : i32
    return %c0_i32, %c0_i32_0 : i32, i32
  }
  func.func @transform_3(%arg0: i32, %arg1: i32) -> (i32, i32) {
    %c0_i32 = arith.constant 0 : i32
    %c0_i32_0 = arith.constant 0 : i32
    %c0_i32_1 = arith.constant 0 : i32
    return %c0_i32, %c0_i32_0 : i32, i32
  }
  func.func @transform_4(%arg0: i32, %arg1: i32) -> (i32, i32, i32) {
    %c0_i32 = arith.constant 0 : i32
    %c0_i32_0 = arith.constant 0 : i32
    %c0_i32_1 = arith.constant 0 : i32
    return %arg0, %c0_i32, %c0_i32_0 : i32, i32, i32
  }
  func.func @transform_5(%arg0: i32, %arg1: i32) -> (i32, i32, i32) {
    %c0_i32 = arith.constant 0 : i32
    %c0_i32_0 = arith.constant 0 : i32
    return %arg0, %c0_i32, %arg1 : i32, i32, i32
  }
  func.func @transform_6(%arg0: i32, %arg1: i32) -> (i32, i32) {
    %c0_i32 = arith.constant 0 : i32
    %c0_i32_0 = arith.constant 0 : i32
    %c0_i32_1 = arith.constant 0 : i32
    return %c0_i32, %c0_i32_0 : i32, i32
  }
  func.func @transform_7(%arg0: i32, %arg1: i32) -> (i32, i32) {
    %c0_i32 = arith.constant 0 : i32
    %c0_i32_0 = arith.constant 0 : i32
    %c0_i32_1 = arith.constant 0 : i32
    return %c0_i32, %c0_i32_0 : i32, i32
  }
  func.func @transform_8(%arg0: i32, %arg1: i32) -> (i32, i32) {
    %c0_i32 = arith.constant 0 : i32
    %c0_i32_0 = arith.constant 0 : i32
    %c0_i32_1 = arith.constant 0 : i32
    return %c0_i32, %c0_i32_0 : i32, i32
  }
  func.func @transform_9(%arg0: i32, %arg1: i32) -> (i32, i32, i32) {
    %c0_i32 = arith.constant 0 : i32
    %c0_i32_0 = arith.constant 0 : i32
    return %arg0, %c0_i32, %arg1 : i32, i32, i32
  }
}

</mosaic_0001>

<bundles_post_ra>
// kernel: _lambda_.10
= control target key start
LH: loop header
LB: loop body
LE: loop exit
PB: predicated region body
PF: predicated region fallthrough
CT: control target
= control target key end

     0   :  { %s488_s15 = smov 0   ;;  %s490_s16 = smov 0   ;;  %s530_s0 = inlined_call_operand.vmem [shape: f32[2,8,64], index: 0, kind: input, shape index: {}]   ;;  %s531_s1 = inlined_call_operand.vmem [shape: f32[8,8], index: 1, kind: input, shape index: {}]   ;;  %s532_s2 = inlined_call_operand.vmem [shape: f32[8,1], index: 2, kind: input, shape index: {}]   ;;  %s533_s3 = inlined_call_operand.vmem [shape: f32[8,1], index: 3, kind: input, shape index: {}]   ;;  %s534_s4 = inlined_call_operand.vmem [shape: f32[2,8,64], index: 4, kind: output, shape index: {}]  }
   0x1   :  { %s492_s17 = smov 0  }
   0x2 LB: > { %s26_s18 = sadd.s32 1, %s454_s16  ;;  %p395_p0 = scmp.ge.s32.totalorder %s458_s17, 1  ;;  %s458_s17 = sphi %s492_s17, %s14_s17   ;;  %s454_s16 = sphi %s490_s16, %s536_s16   ;;  %s450_s15 = sphi %s488_s15, %s535_s15  }
   0x3   : > { %p28_p1 = scmp.ge.s32.totalorder %s26_s18, 2  ;;  %p180_p2 = scmp.lt.s32.totalorder %s458_s17, 3 }
   0x5   : > { %s538_s18 = smov (%p28_p1, %s26_s18), 0  ;;  %p181_p3 = pnand %p395_p0, %p180_p2 }
   0x6   : > { %p210_p4 = scmp.lt.s32.totalorder (!%p181_p3), %s450_s15, 1  ;;  %v460_v0 = vmov (!%p181_p3), 0.0   ;;  %vm461_vm0 = vmmov (!%p181_p3), 0   ;;  %v300_v1 = vld [vmem:[%s532_s2] sm:$0xff] (!%p181_p3)  ;;  %v462_v2 = vmov (!%p181_p3), 0   ;;  %vm226_vm1 = vcmask (!%p181_p3), 64512  }
   0x7   : > { %184 = sbr.rel (%p181_p3) target bundleno = 238 (0xee), region = 36  ;;  %403 = vmatprep.subr.mxu0 (!%p181_p3), %v460_v0  ;;  %405 = vmatprep.mubr.msk.f32.mxu0 (!%p181_p3), %vm461_vm0, %v460_v0  ;;  %v307_v3 = vld [vmem:[%s533_s3] sm:$0xff] (!%p181_p3)  ;;  %vm315_vm2 = vcmask (!%p181_p3), 523264  }
   0x8   : > { %435 = vset.pattern.permute.xlu0 (!%p181_p3), %v462_v2  ;;  %v225_v4 = vld [vmem:[%s531_s1] sm:$0xff] (!%p181_p3) }
   0x9   : > { %303 = vperm.xlu0 (!%p181_p3), %435, %v300_v1  }
   0xd   : > { %310 = vperm.xlu0 (!%p181_p3), %435, %v307_v3  }
   0xe   : > { %s540_s15 = smov (!%p210_p4, %s450_s15), 1 }
   0xf   : > { %s396_s21 = sshll.u32 %s540_s15, 3 }
  0x10   : > { %s216_s26 = scalar_lea.vmem %s530_s0, %s396_s21  ;;  %s223_s5 = scalar_lea.vmem %s534_s4, %s396_s21 }
  0x11   : > { %v224_v5 = vld [vmem:[%s216_s26] sm:$0xff] }
  0x12   : > { %404 = vmatpush3.msra.mxu0 %v224_v5 }
  0x13   : > { %406 = vmatmul.mubr.msk.f32.vlgmr.msra.gmra.mrb[0].mxu0 %vm226_vm1, %v225_v4 }
  0x88   : > { %v304_v6 = vpop.permute.xlu0 %303 }
  0x8c   : > { %v311_v10 = vpop.permute.xlu0 %310 }
  0xe6   : > { %v296_v7 = vpop.f32.mrb[0].mxu0 }
  0xe7   : > { %v306_v8 = vmul.f32 %v304_v6, %v296_v7  ;;  %v407_v9 = vpop.f32.mrb[1].mxu0 }
  0xe9   : > { %v313_v11 = vadd.f32 %v311_v10, %v306_v8 }
  0xeb   : > { %v314_v12 = vmax.f32 %v313_v11, 0.0 }
  0xed   : > { %316 = vst.msk [vmem:[%s223_s5] sm:$0xff] %vm315_vm2, %v314_v12 }
  0xee PF: > { %s14_s17 = sadd.s32 1, %s458_s17   ;;  %s535_s15 = smov %s454_s16 }
  0xef   : > { %p11_p5 = scmp.ge.s32.totalorder %s14_s17, 4   ;;  %s536_s16 = smov %s538_s18 }
  0xf1   :  { %13 = sbr.rel (!%p11_p5) target bundleno = 2 (0x2), region = 66 }

// kernel: _lambda_.9
= control target key start
LH: loop header
LB: loop body
LE: loop exit
PB: predicated region body
PF: predicated region fallthrough
CT: control target
= control target key end

     0   :  { %s2043_s15 = smov 0   ;;  %s2237_s0 = inlined_call_operand.vmem [shape: f32[2,3,360], index: 0, kind: input, shape index: {}]   ;;  %s2238_s1 = inlined_call_operand.vmem [shape: f32[9,8,3], index: 1, kind: input, shape index: {}]   ;;  %s2239_s2 = inlined_call_operand.vmem [shape: f32[8,1], index: 2, kind: input, shape index: {}]   ;;  %s2240_s3 = inlined_call_operand.vmem [shape: f32[8,1], index: 3, kind: input, shape index: {}]   ;;  %s2241_s4 = inlined_call_operand.vmem [shape: f32[2,8,270], index: 4, kind: output, shape index: {}]  }
   0x1 LB: > { %s1842_s16 = sadd.s32 4294967295, %s2005_s15   ;;  %p1846_p0 = scmp.ge.s32.totalorder %s2005_s15, 1  ;;  %s2005_s15 = sphi %s2043_s15, %s14_s15  }
   0x2   : > { %p162_p1 = scmp.lt.s32.totalorder %s2005_s15, 3 }
   0x4   : > { %p163_p2 = pnand %p1846_p0, %p162_p1 }
   0x5   : > { %p188_p3 = scmp.lt.s32.totalorder (!%p163_p2), %s1842_s16, 1  ;;  %v2007_v0 = vmov (!%p163_p2), 0.0   ;;  %vm2008_vm0 = vmmov (!%p163_p2), 0   ;;  %s2009_s21 = smov (!%p163_p2), 127   ;;  %vm208_vm1 = vcmask (!%p163_p2), 1042432   ;;  %v198_v6 = vld [vmem:[%s2238_s1] sm:$0xff] (!%p163_p2) }
   0x6   : > { %166 = sbr.rel (%p163_p2) target bundleno = 439 (0x1b7), region = 36  ;;  %279 = vmatprep.mubr.f32.mxu0 (!%p163_p2), %v2007_v0  ;;  %1922 = vmatprep.subr.mxu1 (!%p163_p2), %v2007_v0  ;;  %vm204_vm2 = vcmask (!%p163_p2), 23552   ;;  %s2010_s24 = smov (!%p163_p2), 126   ;;  %v2016_v28 = vmov (!%p163_p2), 0   ;;  %v1772_v30 = vld [vmem:[%s2240_s3] sm:$0xff] (!%p163_p2)  ;;  %vm376_vm3 = vcmask (!%p163_p2), 1039360  }
   0x7   : > { %1924 = vmatprep.mubr.msk.f32.mxu1 (!%p163_p2), %vm2008_vm0, %v2007_v0  ;;  %s2011_s25 = smov (!%p163_p2), 110   ;;  %s2012_s26 = smov (!%p163_p2), 109   ;;  %1988 = vset.pattern.permute.xlu0 (!%p163_p2), %v2016_v28  ;;  %v1763_v31 = vld [vmem:[%s2239_s2] sm:$0xff] (!%p163_p2)  ;;  %v1854_v35 = vld [vmem:[%s2238_s1 + $0x8] sm:$0xff] (!%p163_p2)  ;;  %vm551_vm4 = vcmask (!%p163_p2), 1031168   ;;  %v1860_v40 = vld [vmem:[%s2238_s1 + $0x10] sm:$0xff] (!%p163_p2) }
   0x8   : > { %s2013_s27 = smov (!%p163_p2), 108   ;;  %s2014_s28 = smov (!%p163_p2), 92   ;;  %1989 = vset.pattern.permute.xlu1 (!%p163_p2), %v2016_v28  ;;  %vm726_vm5 = vcmask (!%p163_p2), 900096   ;;  %v1866_v45 = vld [vmem:[%s2238_s1 + $0x18] sm:$0xff] (!%p163_p2)  ;;  %vm901_vm6 = vcmask (!%p163_p2), 891904   ;;  %v1872_v52 = vld [vmem:[%s2238_s1 + $0x20] sm:$0xff] (!%p163_p2) }
   0x9   : > { %s2015_s29 = smov (!%p163_p2), 91   ;;  %s2017_s30 = smov (!%p163_p2), 90   ;;  %vm1076_vm7 = vcmask (!%p163_p2), 883712   ;;  %v1878_v57 = vld [vmem:[%s2238_s1 + $0x28] sm:$0xff] (!%p163_p2)  ;;  %vm1251_vm8 = vcmask (!%p163_p2), 752640   ;;  %vm1426_vm9 = vcmask (!%p163_p2), 744448  }
   0xa   : > { %vm1601_vm10 = vcmask (!%p163_p2), 736256   ;;  %vm358_vm11 = vcmask (!%p163_p2), 113664  }
   0xd   : > { %s2243_s16 = smov (!%p188_p3, %s1842_s16), 1 }
   0xe   : > { %s1967_s17 = smul.u32 12, %s2243_s16 }
  0x10   : > { %s2061_s20 = scalar_lea.vmem %s2237_s0, %s1967_s17 }
  0x11   : > { %v365_v1 = vld [vmem:[%s2061_s20] sm:$0x77]  ;;  %v366_v5 = vld [vmem:[%s2061_s20 + $0x8] sm:$0x7] }
  0x12   : > { %v540_v2 = vld [vmem:[%s2061_s20] sm:$0x77]  ;;  %370 = vrot.lane.b32.xlu1 %v365_v1, %s2009_s21  ;;  %v369_v3 = vcombine.high %v365_v1, %v365_v1  ;;  %v200_v8 = vld [vmem:[%s2061_s20 + $0x8] sm:$0x7]  ;;  %v1884_v1 = vld [vmem:[%s2238_s1 + $0x30] sm:$0xff] }
  0x13   : > { %v544_v4 = vcombine.high %v540_v2, %v540_v2  ;;  %v199_v7 = vld [vmem:[%s2061_s20] sm:$0x77]  ;;  %1923 = vmatpush3.msk.msra.mxu1 %vm208_vm1, %v200_v8  ;;  %v541_v10 = vld [vmem:[%s2061_s20 + $0x8] sm:$0x7]  ;;  %v1890_v8 = vld [vmem:[%s2238_s1 + $0x38] sm:$0xff] }
  0x14   : > { %372 = vrot.lane.b32.xlu0 %v369_v3, %s2009_s21  ;;  %v203_v9 = vcombine.high %v199_v7, %v199_v7  ;;  %1925 = vmatmul.mubr.msk.f32.vlgmr.msra.gmra.mrb[0].mxu1 %vm204_vm2, %v198_v6  ;;  %v715_v11 = vld [vmem:[%s2061_s20] sm:$0x77]  ;;  %v716_v12 = vld [vmem:[%s2061_s20 + $0x8] sm:$0x7] }
  0x15   : > { %1927 = vmatprep.subr.mxu1 %v2007_v0  ;;  %v890_v13 = vld [vmem:[%s2061_s20] sm:$0x77]  ;;  %1929 = vmatprep.mubr.msk.f32.mxu1 %vm2008_vm0, %v2007_v0  ;;  %v719_v14 = vcombine.high %v715_v11, %v715_v11  ;;  %v891_v16 = vld [vmem:[%s2061_s20 + $0x8] sm:$0x7] }
  0x16   : > { %547 = vrot.lane.b32.xlu1 %v544_v4, %s2010_s24  ;;  %1849 = vmatprep.subr.msk.mxu0 %vm208_vm1, %v203_v9  ;;  %v894_v15 = vcombine.high %v890_v13, %v890_v13  ;;  %v1065_v17 = vld [vmem:[%s2061_s20] sm:$0x77]  ;;  %v1066_v18 = vld [vmem:[%s2061_s20 + $0x8] sm:$0x7] }
  0x17   : > { %1850 = vmatpush1.msk.msra.mxu0 %vm208_vm1, %v199_v7  ;;  %v1240_v19 = vld [vmem:[%s2061_s20] sm:$0x77]  ;;  %v1069_v20 = vcombine.high %v1065_v17, %v1065_v17  ;;  %v1241_v22 = vld [vmem:[%s2061_s20 + $0x8] sm:$0x7] }
  0x18   : > { %374 = vrot.lane.b32.xlu0 %v366_v5, %s2009_s21  ;;  %1851 = vmatmul.mubr.msk.f32.vlgmr.msra.gmra.mrb[0].mxu0 %vm204_vm2, %v198_v6  ;;  %v1244_v21 = vcombine.high %v1240_v19, %v1240_v19  ;;  %v1415_v23 = vld [vmem:[%s2061_s20] sm:$0x77]  ;;  %v1416_v24 = vld [vmem:[%s2061_s20 + $0x8] sm:$0x7] }
  0x19   : > { %452 = vmatprep.mubr.f32.mxu0 %v2007_v0  ;;  %v1590_v25 = vld [vmem:[%s2061_s20] sm:$0x77]  ;;  %v1419_v26 = vcombine.high %v1415_v23, %v1415_v23  ;;  %v1591_v29 = vld [vmem:[%s2061_s20 + $0x8] sm:$0x7] }
  0x1a   : > { %545 = vrot.lane.b32.xlu1 %v540_v2, %s2010_s24  ;;  %v1594_v27 = vcombine.high %v1590_v25, %v1590_v25 }
  0x1c   : > { %549 = vrot.lane.b32.xlu0 %v541_v10, %s2010_s24 }
  0x1e   : > { %724 = vrot.lane.b32.xlu1 %v716_v12, %s2011_s25 }
  0x20   : > { %722 = vrot.lane.b32.xlu0 %v719_v14, %s2011_s25 }
  0x22   : > { %897 = vrot.lane.b32.xlu1 %v894_v15, %s2012_s26 }
  0x24   : > { %720 = vrot.lane.b32.xlu0 %v715_v11, %s2011_s25 }
  0x26   : > { %895 = vrot.lane.b32.xlu1 %v890_v13, %s2012_s26 }
  0x28   : > { %899 = vrot.lane.b32.xlu0 %v891_v16, %s2012_s26  ;;  %v1896_v16 = vld [vmem:[%s2238_s1 + $0x40] sm:$0xff] }
  0x2a   : > { %1074 = vrot.lane.b32.xlu1 %v1066_v18, %s2013_s27 }
  0x2c   : > { %1072 = vrot.lane.b32.xlu0 %v1069_v20, %s2013_s27 }
  0x2e   : > { %1247 = vrot.lane.b32.xlu1 %v1244_v21, %s2014_s28 }
  0x30   : > { %1070 = vrot.lane.b32.xlu0 %v1065_v17, %s2013_s27  ;;  %s1968_s27 = smul.u32 24, %s2243_s16 }
  0x32   : > { %1245 = vrot.lane.b32.xlu1 %v1240_v19, %s2014_s28 }
  0x34   : > { %1249 = vrot.lane.b32.xlu0 %v1241_v22, %s2014_s28 }
  0x36   : > { %1424 = vrot.lane.b32.xlu1 %v1416_v24, %s2015_s29 }
  0x38   : > { %1422 = vrot.lane.b32.xlu0 %v1419_v26, %s2015_s29 }
  0x3a   : > { %1597 = vrot.lane.b32.xlu1 %v1594_v27, %s2017_s30 }
  0x3c   : > { %1420 = vrot.lane.b32.xlu0 %v1415_v23, %s2015_s29 }
  0x3e   : > { %1595 = vrot.lane.b32.xlu1 %v1590_v25, %s2017_s30 }
  0x40   : > { %1599 = vrot.lane.b32.xlu0 %v1591_v29, %s2017_s30  ;;  %s2201_s30 = scalar_lea.vmem %s2241_s4, %s1968_s27 }
  0x42   : > { %1775 = vperm.xlu1 %1989, %v1772_v30  }
  0x44   : > { %1766 = vperm.xlu0 %1988, %v1763_v31  }
  0x84   : > { %v371_v32 = vpop.permute.xlu1 %370 }
  0x86   : > { %v373_v33 = vpop.permute.xlu0 %372 }
  0x87   : > { %v377_v38 = vsel %vm376_vm3, %v371_v32, %v373_v33 }
  0x88   : > { %v548_v34 = vpop.permute.xlu1 %547 }
  0x8a   : > { %v375_v36 = vpop.permute.xlu0 %374 }
  0x8b   : > { %v378_v37 = vsel %vm376_vm3, %v373_v33, %v375_v36  ;;  %1928 = vmatpush3.msk.msra.mxu1 %vm208_vm1, %v375_v36 }
  0x8c   : > { %1855 = vmatprep.subr.msk.mxu0 %vm208_vm1, %v378_v37  ;;  %v546_v39 = vpop.permute.xlu1 %545  ;;  %1930 = vmatmul.mubr.msk.f32.vlgmr.msra.gmra.mrb[2].mxu1 %vm204_vm2, %v1854_v35 }
  0x8d   : > { %1856 = vmatpush1.msk.msra.mxu0 %vm208_vm1, %v377_v38  ;;  %1932 = vmatprep.subr.mxu1 %v2007_v0  ;;  %v552_v42 = vsel %vm551_vm4, %v546_v39, %v548_v34 }
  0x8e   : > { %v550_v41 = vpop.permute.xlu0 %549  ;;  %1857 = vmatmul.mubr.msk.f32.vlgmr.msra.gmra.mrb[2].mxu0 %vm204_vm2, %v1854_v35  ;;  %1934 = vmatprep.mubr.msk.f32.mxu1 %vm2008_vm0, %v2007_v0 }
  0x8f   : > { %v553_v43 = vsel %vm551_vm4, %v548_v34, %v550_v41  ;;  %1933 = vmatpush3.msk.msra.mxu1 %vm208_vm1, %v550_v41  ;;  %627 = vmatprep.mubr.f32.mxu0 %v2007_v0 }
  0x90   : > { %1861 = vmatprep.subr.msk.mxu0 %vm208_vm1, %v553_v43  ;;  %v725_v44 = vpop.permute.xlu1 %724  ;;  %1935 = vmatmul.mubr.msk.f32.vlgmr.msra.gmra.mrb[4].mxu1 %vm204_vm2, %v1860_v40 }
  0x91   : > { %1862 = vmatpush1.msk.msra.mxu0 %vm208_vm1, %v552_v42  ;;  %1937 = vmatprep.subr.mxu1 %v2007_v0 }
  0x92   : > { %v723_v46 = vpop.permute.xlu0 %722  ;;  %1863 = vmatmul.mubr.msk.f32.vlgmr.msra.gmra.mrb[4].mxu0 %vm204_vm2, %v1860_v40  ;;  %1938 = vmatpush3.msk.msra.mxu1 %vm208_vm1, %v725_v44 }
  0x93   : > { %v728_v47 = vsel %vm726_vm5, %v723_v46, %v725_v44  ;;  %802 = vmatprep.mubr.f32.mxu0 %v2007_v0  ;;  %1939 = vmatprep.mubr.msk.f32.mxu1 %vm2008_vm0, %v2007_v0 }
  0x94   : > { %1867 = vmatprep.subr.msk.mxu0 %vm208_vm1, %v728_v47  ;;  %v898_v48 = vpop.permute.xlu1 %897  ;;  %1940 = vmatmul.mubr.msk.f32.vlgmr.msra.gmra.mrb[6].mxu1 %vm204_vm2, %v1866_v45 }
  0x95   : > { %1942 = vmatprep.subr.mxu1 %v2007_v0  ;;  %1944 = vmatprep.mubr.msk.f32.mxu1 %vm2008_vm0, %v2007_v0 }
  0x96   : > { %v721_v49 = vpop.permute.xlu0 %720 }
  0x97   : > { %v727_v50 = vsel %vm726_vm5, %v721_v49, %v723_v46 }
  0x98   : > { %1868 = vmatpush1.msk.msra.mxu0 %vm208_vm1, %v727_v50  ;;  %v896_v51 = vpop.permute.xlu1 %895 }
  0x99   : > { %1869 = vmatmul.mubr.msk.f32.vlgmr.msra.gmra.mrb[6].mxu0 %vm204_vm2, %v1866_v45  ;;  %v902_v54 = vsel %vm901_vm6, %v896_v51, %v898_v48 }
  0x9a   : > { %v900_v53 = vpop.permute.xlu0 %899  ;;  %977 = vmatprep.mubr.f32.mxu0 %v2007_v0 }
  0x9b   : > { %v903_v55 = vsel %vm901_vm6, %v898_v48, %v900_v53  ;;  %1943 = vmatpush3.msk.msra.mxu1 %vm208_vm1, %v900_v53 }
  0x9c   : > { %1873 = vmatprep.subr.msk.mxu0 %vm208_vm1, %v903_v55  ;;  %v1075_v56 = vpop.permute.xlu1 %1074  ;;  %1945 = vmatmul.mubr.msk.f32.vlgmr.msra.gmra.mrb[8].mxu1 %vm204_vm2, %v1872_v52 }
  0x9d   : > { %1874 = vmatpush1.msk.msra.mxu0 %vm208_vm1, %v902_v54  ;;  %1947 = vmatprep.subr.mxu1 %v2007_v0 }
  0x9e   : > { %v1073_v58 = vpop.permute.xlu0 %1072  ;;  %1875 = vmatmul.mubr.msk.f32.vlgmr.msra.gmra.mrb[8].mxu0 %vm204_vm2, %v1872_v52  ;;  %1948 = vmatpush3.msk.msra.mxu1 %vm208_vm1, %v1075_v56 }
  0x9f   : > { %v1078_v59 = vsel %vm1076_vm7, %v1073_v58, %v1075_v56  ;;  %1152 = vmatprep.mubr.f32.mxu0 %v2007_v0  ;;  %1949 = vmatprep.mubr.msk.f32.mxu1 %vm2008_vm0, %v2007_v0 }
  0xa0   : > { %1879 = vmatprep.subr.msk.mxu0 %vm208_vm1, %v1078_v59  ;;  %v1248_v60 = vpop.permute.xlu1 %1247  ;;  %1950 = vmatmul.mubr.msk.f32.vlgmr.msra.gmra.mrb[10].mxu1 %vm204_vm2, %v1878_v57 }
  0xa1   : > { %1952 = vmatprep.subr.mxu1 %v2007_v0  ;;  %1954 = vmatprep.mubr.msk.f32.mxu1 %vm2008_vm0, %v2007_v0 }
  0xa2   : > { %v1071_v61 = vpop.permute.xlu0 %1070 }
  0xa3   : > { %v1077_v62 = vsel %vm1076_vm7, %v1071_v61, %v1073_v58 }
  0xa4   : > { %1880 = vmatpush1.msk.msra.mxu0 %vm208_vm1, %v1077_v62  ;;  %v1246_v63 = vpop.permute.xlu1 %1245 }
  0xa5   : > { %1881 = vmatmul.mubr.msk.f32.vlgmr.msra.gmra.mrb[10].mxu0 %vm204_vm2, %v1878_v57  ;;  %v1252_v3 = vsel %vm1251_vm8, %v1246_v63, %v1248_v60 }
  0xa6   : > { %v1250_v2 = vpop.permute.xlu0 %1249  ;;  %1327 = vmatprep.mubr.f32.mxu0 %v2007_v0 }
  0xa7   : > { %v1253_v4 = vsel %vm1251_vm8, %v1248_v60, %v1250_v2  ;;  %1953 = vmatpush3.msk.msra.mxu1 %vm208_vm1, %v1250_v2 }
  0xa8   : > { %1885 = vmatprep.subr.msk.mxu0 %vm208_vm1, %v1253_v4  ;;  %v1425_v5 = vpop.permute.xlu1 %1424  ;;  %1955 = vmatmul.mubr.msk.f32.vlgmr.msra.gmra.mrb[12].mxu1 %vm204_vm2, %v1884_v1 }
  0xa9   : > { %1886 = vmatpush1.msk.msra.mxu0 %vm208_vm1, %v1252_v3  ;;  %1957 = vmatprep.subr.mxu1 %v2007_v0 }
  0xaa   : > { %v1423_v6 = vpop.permute.xlu0 %1422  ;;  %1887 = vmatmul.mubr.msk.f32.vlgmr.msra.gmra.mrb[12].mxu0 %vm204_vm2, %v1884_v1  ;;  %1958 = vmatpush3.msk.msra.mxu1 %vm208_vm1, %v1425_v5 }
  0xab   : > { %v1428_v7 = vsel %vm1426_vm9, %v1423_v6, %v1425_v5  ;;  %1502 = vmatprep.mubr.f32.mxu0 %v2007_v0  ;;  %1959 = vmatprep.mubr.msk.f32.mxu1 %vm2008_vm0, %v2007_v0 }
  0xac   : > { %1891 = vmatprep.subr.msk.mxu0 %vm208_vm1, %v1428_v7  ;;  %v1598_v9 = vpop.permute.xlu1 %1597  ;;  %1960 = vmatmul.mubr.msk.f32.vlgmr.msra.gmra.mrb[14].mxu1 %vm204_vm2, %v1890_v8 }
  0xad   : > { %1962 = vmatprep.subr.mxu1 %v2007_v0  ;;  %1964 = vmatprep.mubr.msk.f32.mxu1 %vm2008_vm0, %v2007_v0 }
  0xae   : > { %v1421_v10 = vpop.permute.xlu0 %1420 }
  0xaf   : > { %v1427_v11 = vsel %vm1426_vm9, %v1421_v10, %v1423_v6 }
  0xb0   : > { %1892 = vmatpush1.msk.msra.mxu0 %vm208_vm1, %v1427_v11  ;;  %v1596_v12 = vpop.permute.xlu1 %1595 }
  0xb1   : > { %1893 = vmatmul.mubr.msk.f32.vlgmr.msra.gmra.mrb[14].mxu0 %vm204_vm2, %v1890_v8  ;;  %v1602_v14 = vsel %vm1601_vm10, %v1596_v12, %v1598_v9 }
  0xb2   : > { %v1600_v13 = vpop.permute.xlu0 %1599  ;;  %1677 = vmatprep.mubr.f32.mxu0 %v2007_v0 }
  0xb3   : > { %v1603_v15 = vsel %vm1601_vm10, %v1598_v9, %v1600_v13  ;;  %1963 = vmatpush3.msk.msra.mxu1 %vm208_vm1, %v1600_v13 }
  0xb4   : > { %1897 = vmatprep.subr.msk.mxu0 %vm208_vm1, %v1603_v15  ;;  %1965 = vmatmul.mubr.msk.f32.vlgmr.msra.gmra.mrb[16].mxu1 %vm204_vm2, %v1896_v16 }
  0xb5   : > { %1898 = vmatpush1.msk.msra.mxu0 %vm208_vm1, %v1602_v14 }
  0xb6   : > { %1899 = vmatmul.mubr.msk.f32.vlgmr.msra.gmra.mrb[16].mxu0 %vm204_vm2, %v1896_v16 }
  0xc1   : > { %v1776_v16 = vpop.permute.xlu1 %1775 }
  0xc3   : > { %v1767_v12 = vpop.permute.xlu0 %1766 }
  0xe7   : > { %v352_v0 = vpop.f32.mrb[0].mxu1 }
  0xe8   : > { %359 = vst.msk [vmem:[%s2201_s30 + $0x10] sm:$0xff] %vm358_vm11, %v352_v0  ;;  %v1926_v17 = vpop.f32.mrb[1].mxu1 }
  0xeb   : > { %v281_v18 = vpop.f32.mrb[0].mxu0 }
  0xec   : > { %v283_v19 = vpop.f32.mrb[1].mxu0 }
  0xef   : > { %v362_v20 = vld [vmem:[%s2201_s30 + $0x10] sm:$0xff] }
 0x15f   : > { %v525_v21 = vpop.f32.mrb[2].mxu1 }
 0x160   : > { %v531_v22 = vadd.f32 %v525_v21, %v362_v20  ;;  %v1931_v23 = vpop.f32.mrb[3].mxu1 }
 0x161   : > { %v454_v24 = vpop.f32.mrb[2].mxu0 }
 0x162   : > { %v529_v25 = vadd.f32 %v454_v24, %v281_v18  ;;  %v456_v26 = vpop.f32.mrb[3].mxu0  ;;  %534 = vst.msk [vmem:[%s2201_s30 + $0x10] sm:$0xff] %vm358_vm11, %v531_v22 }
 0x163   : > { %v530_v27 = vadd.f32 %v456_v26, %v283_v19  ;;  %v700_v28 = vpop.f32.mrb[4].mxu1 }
 0x164   : > { %v1936_v29 = vpop.f32.mrb[5].mxu1 }
 0x165   : > { %v629_v30 = vpop.f32.mrb[4].mxu0 }
 0x166   : > { %v704_v31 = vadd.f32 %v629_v30, %v529_v25  ;;  %v631_v32 = vpop.f32.mrb[5].mxu0 }
 0x167   : > { %v705_v33 = vadd.f32 %v631_v32, %v530_v27  ;;  %v875_v34 = vpop.f32.mrb[6].mxu1 }
 0x168   : > { %v1941_v35 = vpop.f32.mrb[7].mxu1 }
 0x169   : > { %v537_v36 = vld [vmem:[%s2201_s30 + $0x10] sm:$0xff] }
 0x16a   : > { %v706_v37 = vadd.f32 %v700_v28, %v537_v36 }
 0x16c   : > { %709 = vst.msk [vmem:[%s2201_s30 + $0x10] sm:$0xff] %vm358_vm11, %v706_v37  ;;  %v804_v38 = vpop.f32.mrb[6].mxu0 }
 0x16d   : > { %v879_v39 = vadd.f32 %v804_v38, %v704_v31  ;;  %v806_v40 = vpop.f32.mrb[7].mxu0 }
 0x16e   : > { %v880_v41 = vadd.f32 %v806_v40, %v705_v33 }
 0x16f   : > { %v1050_v42 = vpop.f32.mrb[8].mxu1 }
 0x170   : > { %v1946_v43 = vpop.f32.mrb[9].mxu1 }
 0x171   : > { %v979_v44 = vpop.f32.mrb[8].mxu0 }
 0x172   : > { %v1054_v45 = vadd.f32 %v979_v44, %v879_v39  ;;  %v981_v46 = vpop.f32.mrb[9].mxu0 }
 0x173   : > { %v712_v47 = vld [vmem:[%s2201_s30 + $0x10] sm:$0xff]  ;;  %v1055_v48 = vadd.f32 %v981_v46, %v880_v41  ;;  %v1225_v49 = vpop.f32.mrb[10].mxu1 }
 0x174   : > { %v881_v50 = vadd.f32 %v875_v34, %v712_v47  ;;  %v1951_v51 = vpop.f32.mrb[11].mxu1 }
 0x176   : > { %884 = vst.msk [vmem:[%s2201_s30 + $0x10] sm:$0xff] %vm358_vm11, %v881_v50 }
 0x178   : > { %v1154_v52 = vpop.f32.mrb[10].mxu0 }
 0x179   : > { %v1229_v53 = vadd.f32 %v1154_v52, %v1054_v45  ;;  %v1156_v54 = vpop.f32.mrb[11].mxu0 }
 0x17a   : > { %v1230_v55 = vadd.f32 %v1156_v54, %v1055_v48 }
 0x17b   : > { %v1400_v56 = vpop.f32.mrb[12].mxu1 }
 0x17c   : > { %v1956_v57 = vpop.f32.mrb[13].mxu1 }
 0x17d   : > { %v887_v58 = vld [vmem:[%s2201_s30 + $0x10] sm:$0xff]  ;;  %v1329_v59 = vpop.f32.mrb[12].mxu0 }
 0x17e   : > { %v1056_v60 = vadd.f32 %v1050_v42, %v887_v58  ;;  %v1404_v61 = vadd.f32 %v1329_v59, %v1229_v53  ;;  %v1331_v62 = vpop.f32.mrb[13].mxu0 }
 0x17f   : > { %v1405_v63 = vadd.f32 %v1331_v62, %v1230_v55  ;;  %v1575_v1 = vpop.f32.mrb[14].mxu1 }
 0x180   : > { %1059 = vst.msk [vmem:[%s2201_s30 + $0x10] sm:$0xff] %vm358_vm11, %v1056_v60  ;;  %v1961_v2 = vpop.f32.mrb[15].mxu1 }
 0x184   : > { %v1504_v3 = vpop.f32.mrb[14].mxu0 }
 0x185   : > { %v1579_v4 = vadd.f32 %v1504_v3, %v1404_v61  ;;  %v1506_v5 = vpop.f32.mrb[15].mxu0 }
 0x186   : > { %v1580_v6 = vadd.f32 %v1506_v5, %v1405_v63 }
 0x187   : > { %v1062_v7 = vld [vmem:[%s2201_s30 + $0x10] sm:$0xff]  ;;  %v1750_v8 = vpop.f32.mrb[16].mxu1 }
 0x188   : > { %v1231_v9 = vadd.f32 %v1225_v49, %v1062_v7  ;;  %v1966_v10 = vpop.f32.mrb[17].mxu1 }
 0x189   : > { %v1679_v11 = vpop.f32.mrb[16].mxu0 }
 0x18a   : > { %1234 = vst.msk [vmem:[%s2201_s30 + $0x10] sm:$0xff] %vm358_vm11, %v1231_v9  ;;  %v1754_v13 = vadd.f32 %v1679_v11, %v1579_v4  ;;  %v1681_v14 = vpop.f32.mrb[17].mxu0 }
 0x18b   : > { %v1755_v15 = vadd.f32 %v1681_v14, %v1580_v6 }
 0x18c   : > { %v1769_v0 = vmul.f32 %v1767_v12, %v1754_v13 }
 0x18d   : > { %v1770_v17 = vmul.f32 %v1767_v12, %v1755_v15 }
 0x18e   : > { %v1778_v18 = vadd.f32 %v1776_v16, %v1769_v0 }
 0x18f   : > { %v1779_v19 = vadd.f32 %v1776_v16, %v1770_v17 }
 0x190   : > { %v1781_v20 = vmax.f32 %v1778_v18, 0.0 }
 0x191   : > { %v1237_v21 = vld [vmem:[%s2201_s30 + $0x10] sm:$0xff]  ;;  %v1782_v22 = vmax.f32 %v1779_v19, 0.0 }
 0x192   : > { %v1406_v23 = vadd.f32 %v1400_v56, %v1237_v21  ;;  %1784 = vst [vmem:[%s2201_s30] sm:$0xff] %v1781_v20 }
 0x193   : > { %1785 = vst [vmem:[%s2201_s30 + $0x8] sm:$0xff] %v1782_v22 }
 0x194   : > { %1409 = vst.msk [vmem:[%s2201_s30 + $0x10] sm:$0xff] %vm358_vm11, %v1406_v23 }
 0x19b   : > { %v1412_v24 = vld [vmem:[%s2201_s30 + $0x10] sm:$0xff] }
 0x19c   : > { %v1581_v25 = vadd.f32 %v1575_v1, %v1412_v24 }
 0x19e   : > { %1584 = vst.msk [vmem:[%s2201_s30 + $0x10] sm:$0xff] %vm358_vm11, %v1581_v25 }
 0x1a5   : > { %v1587_v26 = vld [vmem:[%s2201_s30 + $0x10] sm:$0xff] }
 0x1a6   : > { %v1756_v27 = vadd.f32 %v1750_v8, %v1587_v26 }
 0x1a8   : > { %1759 = vst.msk [vmem:[%s2201_s30 + $0x10] sm:$0xff] %vm358_vm11, %v1756_v27 }
 0x1af   : > { %v1762_v28 = vld [vmem:[%s2201_s30 + $0x10] sm:$0xff] }
 0x1b0   : > { %v1771_v29 = vmul.f32 %v1767_v12, %v1762_v28 }
 0x1b2   : > { %v1780_v30 = vadd.f32 %v1776_v16, %v1771_v29 }
 0x1b4   : > { %v1783_v31 = vmax.f32 %v1780_v30, 0.0 }
 0x1b6   : > { %1786 = vst.msk [vmem:[%s2201_s30 + $0x10] sm:$0xff] %vm358_vm11, %v1783_v31 }
 0x1b7 PF: > { %s14_s15 = sadd.s32 1, %s2005_s15  }
 0x1b8   : > { %p11_p4 = scmp.ge.s32.totalorder %s14_s15, 4  }
 0x1ba   :  { %13 = sbr.rel (!%p11_p4) target bundleno = 1 (0x1), region = 74 }

// kernel: _lambda_.13
= control target key start
LH: loop header
LB: loop body
LE: loop exit
PB: predicated region body
PF: predicated region fallthrough
CT: control target
= control target key end

     0   :  { %s636_s21 = smov 0   ;;  %s638_s22 = smov 0   ;;  %s690_s0 = inlined_call_operand.vmem [shape: f32[2,8,64], index: 0, kind: input, shape index: {}]   ;;  %s691_s1 = inlined_call_operand.vmem [shape: f32[8,8], index: 1, kind: input, shape index: {}]   ;;  %s692_s2 = inlined_call_operand.vmem [shape: f32[8,1], index: 2, kind: input, shape index: {}]   ;;  %s693_s3 = inlined_call_operand.vmem [shape: f32[8,1], index: 3, kind: input, shape index: {}]   ;;  %s694_s4 = inlined_call_operand.vmem [shape: f32[2,8,1], index: 4, kind: input, shape index: {}]   ;;  %s695_s5 = inlined_call_operand.vmem [shape: f32[2,8,64], index: 5, kind: input, shape index: {}]   ;;  %s696_s6 = inlined_call_operand.vmem [shape: f32[2,8,64], index: 6, kind: output, shape index: {}]  }
   0x1   :  { %s640_s23 = smov 0  }
   0x2 LB: > { %s28_s24 = sadd.s32 1, %s592_s22  ;;  %p530_p0 = scmp.ge.s32.totalorder %s596_s23, 1  ;;  %s596_s23 = sphi %s640_s23, %s16_s23   ;;  %s592_s22 = sphi %s638_s22, %s698_s22   ;;  %s588_s21 = sphi %s636_s21, %s697_s21  }
   0x3   : > { %p30_p1 = scmp.ge.s32.totalorder %s28_s24, 2  ;;  %p253_p2 = scmp.lt.s32.totalorder %s596_s23, 3 }
   0x5   : > { %s700_s24 = smov (%p30_p1, %s28_s24), 0  ;;  %p254_p3 = pnand %p530_p0, %p253_p2 }
   0x6   : > { %p298_p4 = scmp.lt.s32.totalorder (!%p254_p3), %s588_s21, 1  ;;  %v598_v0 = vmov (!%p254_p3), 0   ;;  %v406_v2 = vld [vmem:[%s692_s2] sm:$0xff] (!%p254_p3)  ;;  %v599_v3 = vmov (!%p254_p3), 0.0   ;;  %vm600_vm0 = vmmov (!%p254_p3), 0   ;;  %vm332_vm1 = vcmask (!%p254_p3), 64512  }
   0x7   : > { %257 = sbr.rel (%p254_p3) target bundleno = 370 (0x172), region = 44  ;;  %572 = vset.pattern.permute.xlu0 (!%p254_p3), %v598_v0  ;;  %573 = vset.pattern.permute.xlu1 (!%p254_p3), %v598_v0  ;;  %v413_v4 = vld [vmem:[%s693_s3] sm:$0xff] (!%p254_p3)  ;;  %vm423_vm2 = vcmask (!%p254_p3), 523264  }
   0x8   : > { %540 = vmatprep.subr.mxu0 (!%p254_p3), %v599_v3  ;;  %542 = vmatprep.mubr.msk.f32.mxu0 (!%p254_p3), %vm600_vm0, %v599_v3  ;;  %v331_v8 = vld [vmem:[%s691_s1] sm:$0xff] (!%p254_p3) }
   0x9   : > { %416 = vperm.xlu1 (!%p254_p3), %573, %v413_v4  }
   0xe   : > { %s702_s21 = smov (!%p298_p4, %s588_s21), 1 }
   0xf   : > { %s654_s25 = sshll.u32 %s702_s21, 3 }
  0x10   : > { %s308_s28 = scalar_lea.vmem %s694_s4, %s654_s25  ;;  %s304_s11 = scalar_lea.vmem %s690_s0, %s654_s25 }
  0x11   : > { %v324_v1 = vld [vmem:[%s308_s28] sm:$0xff]  ;;  %s315_s16 = scalar_lea.vmem %s695_s5, %s654_s25  ;;  %s322_s19 = scalar_lea.vmem %s696_s6, %s654_s25 }
  0x12   : > { %327 = vperm.xlu0 %572, %v324_v1   ;;  %v323_v5 = vld [vmem:[%s304_s11] sm:$0xff] }
  0x13   : > { %v420_v14 = vld [vmem:[%s315_s16] sm:$0xff] }
  0x16   : > { %409 = vperm.xlu0 %572, %v406_v2  }
  0x88   : > { %v417_v11 = vpop.permute.xlu1 %416 }
  0x91   : > { %v328_v6 = vpop.permute.xlu0 %327 }
  0x92   : > { %v330_v7 = vmul.f32 %v328_v6, %v323_v5 }
  0x94   : > { %541 = vmatpush3.msra.mxu0 %v330_v7 }
  0x95   : > { %543 = vmatmul.mubr.msk.f32.vlgmr.msra.gmra.mrb[0].mxu0 %vm332_vm1, %v331_v8  ;;  %v410_v9 = vpop.permute.xlu0 %409 }
 0x168   : > { %v402_v10 = vpop.f32.mrb[0].mxu0 }
 0x169   : > { %v412_v12 = vmul.f32 %v410_v9, %v402_v10  ;;  %v544_v13 = vpop.f32.mrb[1].mxu0 }
 0x16b   : > { %v419_v15 = vadd.f32 %v417_v11, %v412_v12 }
 0x16d   : > { %v421_v16 = vadd.f32 %v420_v14, %v419_v15 }
 0x16f   : > { %v422_v17 = vmax.f32 %v421_v16, 0.0 }
 0x171   : > { %424 = vst.msk [vmem:[%s322_s19] sm:$0xff] %vm423_vm2, %v422_v17 }
 0x172 PF: > { %s16_s23 = sadd.s32 1, %s596_s23   ;;  %s697_s21 = smov %s592_s22 }
 0x173   : > { %p13_p5 = scmp.ge.s32.totalorder %s16_s23, 4   ;;  %s698_s22 = smov %s700_s24 }
 0x175   :  { %15 = sbr.rel (!%p13_p5) target bundleno = 2 (0x2), region = 80 }

// kernel: _lambda_.12
= control target key start
LH: loop header
LB: loop body
LE: loop exit
PB: predicated region body
PF: predicated region fallthrough
CT: control target
= control target key end

     0   :  { %s526_s18 = smov 0   ;;  %s562_s0 = inlined_call_operand.vmem [shape: f32[2,8,64], index: 0, kind: input, shape index: {}]   ;;  %s563_s1 = inlined_call_operand.vmem [shape: f32[2,8], index: 1, kind: input, shape index: {}]   ;;  %s564_s2 = inlined_call_operand.vmem [shape: f32[2,1], index: 2, kind: input, shape index: {}]   ;;  %s565_s3 = inlined_call_operand.vmem [shape: f32[8,2], index: 3, kind: input, shape index: {}]   ;;  %s566_s4 = inlined_call_operand.vmem [shape: f32[8,1], index: 4, kind: input, shape index: {}]   ;;  %s567_s5 = inlined_call_operand.vmem [shape: f32[2,8,1], index: 5, kind: output, shape index: {}]  }
   0x1 LB: > { %s445_s19 = sadd.s32 4294967295, %s492_s18   ;;  %p449_p0 = scmp.ge.s32.totalorder %s492_s18, 1  ;;  %s492_s18 = sphi %s526_s18, %s15_s18  }
   0x2   : > { %p186_p1 = scmp.lt.s32.totalorder %s492_s18, 3 }
   0x4   : > { %p187_p2 = pnand %p449_p0, %p186_p1 }
   0x5   : > { %p212_p3 = scmp.lt.s32.totalorder (!%p187_p2), %s445_s19, 1  ;;  %vm221_vm0 = vcmask (!%p187_p2), 523264   ;;  %v494_v2 = vmov (!%p187_p2), 0.0   ;;  %vm495_vm1 = vmmov (!%p187_p2), 0   ;;  %v227_v5 = vld [vmem:[%s563_s1] sm:$0x3] (!%p187_p2) }
   0x6   : > { %190 = sbr.rel (%p187_p2) target bundleno = 621 (0x26d), region = 40  ;;  %462 = vmatprep.subr.mxu0 (!%p187_p2), %v494_v2  ;;  %467 = vmatprep.subr.mxu1 (!%p187_p2), %v494_v2  ;;  %vm229_vm2 = vcmask (!%p187_p2), 64512   ;;  %v228_v6 = vld [vmem:[%s564_s2] sm:$0x3] (!%p187_p2)  ;;  %vm310_vm3 = vcmask (!%p187_p2), 1041408   ;;  %vm306_vm4 = vcmask (!%p187_p2), 15360  }
   0x7   : > { %464 = vmatprep.mubr.msk.f32.mxu0 (!%p187_p2), %vm495_vm1, %v494_v2  ;;  %469 = vmatprep.mubr.msk.f32.mxu1 (!%p187_p2), %vm495_vm1, %v494_v2  ;;  %v304_v11 = vld [vmem:[%s565_s3] sm:$0xff] (!%p187_p2)  ;;  %vm390_vm5 = vcmask (!%p187_p2), 7168  }
   0x8   : > { %v305_v12 = vld [vmem:[%s566_s4] sm:$0xff] (!%p187_p2) }
   0xd   : > { %s569_s19 = smov (!%p212_p3, %s445_s19), 1 }
   0xe   : > { %s450_s20 = sshll.u32 %s569_s19, 3 }
   0xf   : > { %s215_s23 = scalar_lea.vmem %s562_s0, %s450_s20  ;;  %s219_s9 = scalar_lea.vmem %s567_s5, %s450_s20 }
  0x10   : > { %v220_v0 = vld [vmem:[%s215_s23] sm:$0xff] }
  0x11   : > { %v222_v1 = vsel %vm221_vm0, %v220_v0, 0.0 }
  0x12   : > { %223 = vadd.xlane.f32.xlu0 %v222_v1 }
  0x9f   : > { %v224_v3 = vpop.xlane.xlu0 %223 }
  0xa0   : > { %v226_v4 = vmul.f32 0.015625, %v224_v3 }
  0xa2   : > { %463 = vmatpush3.msra.mxu0 %v226_v4 }
  0xa3   : > { %465 = vmatmul.mubr.msk.f32.vlgmr.msra.gmra.mrb[0].mxu0 %vm229_vm2, %v227_v5 }
 0x176   : > { %v299_v7 = vpop.f32.mrb[0].mxu0 }
 0x177   : > { %v300_v8 = vadd.f32 %v299_v7, %v228_v6  ;;  %v466_v9 = vpop.f32.mrb[1].mxu0 }
 0x179   : > { %v303_v10 = vmax.f32 %v300_v8, 0.0 }
 0x17b   : > { %468 = vmatpush3.msk.msra.mxu1 %vm310_vm3, %v303_v10 }
 0x17c   : > { %470 = vmatmul.mubr.msk.f32.vlgmr.msra.gmra.mrb[0].mxu1 %vm306_vm4, %v304_v11 }
 0x24f   : > { %v380_v13 = vpop.f32.mrb[0].mxu1 }
 0x250   : > { %v381_v14 = vadd.f32 %v380_v13, %v305_v12  ;;  %v471_v15 = vpop.f32.mrb[1].mxu1 }
 0x252   : > { %v455_v16 = vmul.f32 -1.442695, %v381_v14 }
 0x254   : > { %482 = vpow2.f32 %v455_v16 }
 0x25e   : > { %v483_v17 = vpop.eup %482 }
 0x25f   : > { %v387_v18 = vadd.f32 1.0, %v483_v17 }
 0x261   : > { %484 = vrcp.f32 %v387_v18 }
 0x26b   : > { %v485_v19 = vpop.eup %484 }
 0x26c   : > { %391 = vst.msk [vmem:[%s219_s9] sm:$0xff] %vm390_vm5, %v485_v19 }
 0x26d PF: > { %s15_s18 = sadd.s32 1, %s492_s18  }
 0x26e   : > { %p12_p4 = scmp.ge.s32.totalorder %s15_s18, 4  }
 0x270   :  { %14 = sbr.rel (!%p12_p4) target bundleno = 1 (0x1), region = 70 }

// kernel: _lambda_.11
= control target key start
LH: loop header
LB: loop body
LE: loop exit
PB: predicated region body
PF: predicated region fallthrough
CT: control target
= control target key end

     0   :  { %s1159_s15 = smov 0   ;;  %s1283_s0 = inlined_call_operand.vmem [shape: f32[2,8,120], index: 0, kind: input, shape index: {}]   ;;  %s1284_s1 = inlined_call_operand.vmem [shape: f32[9,8,8], index: 1, kind: input, shape index: {}]   ;;  %s1285_s2 = inlined_call_operand.vmem [shape: f32[8,1], index: 2, kind: input, shape index: {}]   ;;  %s1286_s3 = inlined_call_operand.vmem [shape: f32[8,1], index: 3, kind: input, shape index: {}]   ;;  %s1287_s4 = inlined_call_operand.vmem [shape: f32[2,8,80], index: 4, kind: output, shape index: {}]  }
   0x1 LB: > { %s1005_s16 = sadd.s32 4294967295, %s1121_s15   ;;  %p1009_p0 = scmp.ge.s32.totalorder %s1121_s15, 1  ;;  %s1121_s15 = sphi %s1159_s15, %s14_s15  }
   0x2   : > { %p161_p1 = scmp.lt.s32.totalorder %s1121_s15, 3 }
   0x4   : > { %p162_p2 = pnand %p1009_p0, %p161_p1 }
   0x5   : > { %p185_p3 = scmp.lt.s32.totalorder (!%p162_p2), %s1005_s16, 1  ;;  %v1123_v0 = vmov (!%p162_p2), 0.0   ;;  %vm1124_vm0 = vmmov (!%p162_p2), 0   ;;  %v193_v2 = vld [vmem:[%s1284_s1] sm:$0xff] (!%p162_p2)  ;;  %vm195_vm1 = vcmask (!%p162_p2), 64512   ;;  %s1125_s23 = smov (!%p162_p2), 127  }
   0x6   : > { %165 = sbr.rel (%p162_p2) target bundleno = 432 (0x1b0), region = 36  ;;  %1049 = vmatprep.subr.mxu0 (!%p162_p2), %v1123_v0  ;;  %1051 = vmatprep.mubr.msk.f32.mxu0 (!%p162_p2), %vm1124_vm0, %v1123_v0  ;;  %s1126_s24 = smov (!%p162_p2), 118   ;;  %v1129_v3 = vmov (!%p162_p2), 0   ;;  %v936_v4 = vld [vmem:[%s1285_s2] sm:$0xff] (!%p162_p2)  ;;  %v1013_v6 = vld [vmem:[%s1284_s1 + $0x8] sm:$0xff] (!%p162_p2)  ;;  %v1015_v9 = vld [vmem:[%s1284_s1 + $0x10] sm:$0xff] (!%p162_p2) }
   0x7   : > { %1054 = vmatprep.subr.mxu1 (!%p162_p2), %v1123_v0  ;;  %1056 = vmatprep.mubr.msk.f32.mxu1 (!%p162_p2), %vm1124_vm0, %v1123_v0  ;;  %s1127_s25 = smov (!%p162_p2), 126   ;;  %s1128_s26 = smov (!%p162_p2), 117   ;;  %v943_v5 = vld [vmem:[%s1286_s3] sm:$0xff] (!%p162_p2)  ;;  %v1017_v10 = vld [vmem:[%s1284_s1 + $0x18] sm:$0xff] (!%p162_p2)  ;;  %v1021_v14 = vld [vmem:[%s1284_s1 + $0x28] sm:$0xff] (!%p162_p2)  ;;  %vm269_vm2 = vcmask (!%p162_p2), 654336  }
   0x8   : > { %1113 = vset.pattern.permute.xlu0 (!%p162_p2), %v1129_v3  ;;  %1114 = vset.pattern.permute.xlu1 (!%p162_p2), %v1129_v3  ;;  %s1130_s27 = smov (!%p162_p2), 116   ;;  %s1131_s28 = smov (!%p162_p2), 108   ;;  %v1019_v13 = vld [vmem:[%s1284_s1 + $0x20] sm:$0xff] (!%p162_p2)  ;;  %v1023_v17 = vld [vmem:[%s1284_s1 + $0x30] sm:$0xff] (!%p162_p2)  ;;  %v1025_v18 = vld [vmem:[%s1284_s1 + $0x38] sm:$0xff] (!%p162_p2) }
   0x9   : > { %s1132_s29 = smov (!%p162_p2), 107   ;;  %s1133_s30 = smov (!%p162_p2), 106   ;;  %v1027_v21 = vld [vmem:[%s1284_s1 + $0x40] sm:$0xff] (!%p162_p2) }
   0xd   : > { %s1289_s16 = smov (!%p185_p3, %s1005_s16), 1 }
   0xe   : > { %s1010_s17 = sshll.u32 %s1289_s16, 3 }
   0xf   : > { %s188_s20 = scalar_lea.vmem %s1283_s0, %s1010_s17 }
  0x10   : > { %v274_v1 = vld [vmem:[%s188_s20] sm:$0xff] }
  0x11   : > { %276 = vrot.lane.b32.xlu0 %v274_v1, %s1125_s23  ;;  %442 = vrot.lane.b32.xlu1 %v274_v1, %s1126_s24 }
  0x12   : > { %1050 = vmatpush3.msra.mxu0 %v274_v1 }
  0x13   : > { %1052 = vmatmul.mubr.msk.f32.vlgmr.msra.gmra.mrb[0].mxu0 %vm195_vm1, %v193_v2  ;;  %1059 = vmatprep.subr.mxu0 %v1123_v0 }
  0x14   : > { %1061 = vmatprep.mubr.msk.f32.mxu0 %vm1124_vm0, %v1123_v0 }
  0x15   : > { %359 = vrot.lane.b32.xlu0 %v274_v1, %s1127_s25  ;;  %525 = vrot.lane.b32.xlu1 %v274_v1, %s1128_s26 }
  0x19   : > { %608 = vrot.lane.b32.xlu0 %v274_v1, %s1130_s27  ;;  %691 = vrot.lane.b32.xlu1 %v274_v1, %s1131_s28 }
  0x1d   : > { %774 = vrot.lane.b32.xlu0 %v274_v1, %s1132_s29  ;;  %857 = vrot.lane.b32.xlu1 %v274_v1, %s1133_s30  ;;  %s1249_s30 = scalar_lea.vmem %s1287_s4, %s1010_s17 }
  0x21   : > { %939 = vperm.xlu0 %1113, %v936_v4   ;;  %946 = vperm.xlu1 %1114, %v943_v5  }
  0x83   : > { %v277_v7 = vpop.permute.xlu0 %276  ;;  %v443_v8 = vpop.permute.xlu1 %442 }
  0x84   : > { %1055 = vmatpush3.msra.mxu1 %v277_v7 }
  0x85   : > { %1057 = vmatmul.mubr.msk.f32.vlgmr.msra.gmra.mrb[0].mxu1 %vm195_vm1, %v1013_v6  ;;  %1064 = vmatprep.subr.mxu1 %v1123_v0 }
  0x86   : > { %1065 = vmatpush3.msra.mxu1 %v443_v8  ;;  %1066 = vmatprep.mubr.msk.f32.mxu1 %vm1124_vm0, %v1123_v0 }
  0x87   : > { %v360_v11 = vpop.permute.xlu0 %359  ;;  %v526_v12 = vpop.permute.xlu1 %525  ;;  %1074 = vmatprep.subr.mxu1 %v1123_v0 }
  0x88   : > { %1060 = vmatpush3.msra.mxu0 %v360_v11 }
  0x89   : > { %1062 = vmatmul.mubr.msk.f32.vlgmr.msra.gmra.mrb[2].mxu0 %vm195_vm1, %v1015_v9  ;;  %1067 = vmatmul.mubr.msk.f32.vlgmr.msra.gmra.mrb[2].mxu1 %vm195_vm1, %v1017_v10 }
  0x8a   : > { %1069 = vmatprep.subr.mxu0 %v1123_v0  ;;  %1071 = vmatprep.mubr.msk.f32.mxu0 %vm1124_vm0, %v1123_v0 }
  0x8b   : > { %1070 = vmatpush3.msra.mxu0 %v526_v12  ;;  %v609_v15 = vpop.permute.xlu0 %608  ;;  %1076 = vmatprep.mubr.msk.f32.mxu1 %vm1124_vm0, %v1123_v0  ;;  %v692_v16 = vpop.permute.xlu1 %691 }
  0x8c   : > { %1075 = vmatpush3.msra.mxu1 %v609_v15  ;;  %1079 = vmatprep.subr.mxu0 %v1123_v0 }
  0x8d   : > { %1072 = vmatmul.mubr.msk.f32.vlgmr.msra.gmra.mrb[4].mxu0 %vm195_vm1, %v1019_v13  ;;  %1077 = vmatmul.mubr.msk.f32.vlgmr.msra.gmra.mrb[4].mxu1 %vm195_vm1, %v1021_v14 }
  0x8e   : > { %1080 = vmatpush3.msra.mxu0 %v692_v16  ;;  %1081 = vmatprep.mubr.msk.f32.mxu0 %vm1124_vm0, %v1123_v0 }
  0x8f   : > { %1084 = vmatprep.subr.mxu1 %v1123_v0  ;;  %v775_v19 = vpop.permute.xlu0 %774  ;;  %1086 = vmatprep.mubr.msk.f32.mxu1 %vm1124_vm0, %v1123_v0  ;;  %v858_v20 = vpop.permute.xlu1 %857 }
  0x90   : > { %1085 = vmatpush3.msra.mxu1 %v775_v19  ;;  %1089 = vmatprep.subr.mxu0 %v1123_v0 }
  0x91   : > { %1082 = vmatmul.mubr.msk.f32.vlgmr.msra.gmra.mrb[6].mxu0 %vm195_vm1, %v1023_v17  ;;  %1087 = vmatmul.mubr.msk.f32.vlgmr.msra.gmra.mrb[6].mxu1 %vm195_vm1, %v1025_v18 }
  0x92   : > { %1090 = vmatpush3.msra.mxu0 %v858_v20  ;;  %1091 = vmatprep.mubr.msk.f32.mxu0 %vm1124_vm0, %v1123_v0 }
  0x95   : > { %1092 = vmatmul.mubr.msk.f32.vlgmr.msra.gmra.mrb[8].mxu0 %vm195_vm1, %v1027_v21 }
  0xa0   : > { %v940_v56 = vpop.permute.xlu0 %939  ;;  %v947_v58 = vpop.permute.xlu1 %946 }
  0xe6   : > { %v265_v22 = vpop.f32.mrb[0].mxu0 }
  0xe7   : > { %270 = vst.msk [vmem:[%s1249_s30] sm:$0xff] %vm269_vm2, %v265_v22  ;;  %v1053_v23 = vpop.f32.mrb[1].mxu0 }
  0xee   : > { %v271_v24 = vld [vmem:[%s1249_s30] sm:$0xff] }
 0x158   : > { %v348_v25 = vpop.f32.mrb[0].mxu1 }
 0x159   : > { %v352_v26 = vadd.f32 %v348_v25, %v271_v24  ;;  %v1058_v27 = vpop.f32.mrb[1].mxu1 }
 0x15b   : > { %353 = vst.msk [vmem:[%s1249_s30] sm:$0xff] %vm269_vm2, %v352_v26 }
 0x15c   : > { %v431_v28 = vpop.f32.mrb[2].mxu0  ;;  %v514_v29 = vpop.f32.mrb[2].mxu1 }
 0x15d   : > { %v1063_v30 = vpop.f32.mrb[3].mxu0  ;;  %v1068_v31 = vpop.f32.mrb[3].mxu1 }
 0x160   : > { %v597_v32 = vpop.f32.mrb[4].mxu0  ;;  %v680_v33 = vpop.f32.mrb[4].mxu1 }
 0x161   : > { %v1073_v34 = vpop.f32.mrb[5].mxu0  ;;  %v1078_v35 = vpop.f32.mrb[5].mxu1 }
 0x162   : > { %v354_v36 = vld [vmem:[%s1249_s30] sm:$0xff] }
 0x163   : > { %v435_v37 = vadd.f32 %v431_v28, %v354_v36 }
 0x164   : > { %v763_v38 = vpop.f32.mrb[6].mxu0  ;;  %v846_v39 = vpop.f32.mrb[6].mxu1 }
 0x165   : > { %436 = vst.msk [vmem:[%s1249_s30] sm:$0xff] %vm269_vm2, %v435_v37  ;;  %v1083_v40 = vpop.f32.mrb[7].mxu0  ;;  %v1088_v41 = vpop.f32.mrb[7].mxu1 }
 0x168   : > { %v929_v42 = vpop.f32.mrb[8].mxu0 }
 0x169   : > { %v1093_v43 = vpop.f32.mrb[9].mxu0 }
 0x16c   : > { %v437_v44 = vld [vmem:[%s1249_s30] sm:$0xff] }
 0x16d   : > { %v518_v45 = vadd.f32 %v514_v29, %v437_v44 }
 0x16f   : > { %519 = vst.msk [vmem:[%s1249_s30] sm:$0xff] %vm269_vm2, %v518_v45 }
 0x176   : > { %v520_v46 = vld [vmem:[%s1249_s30] sm:$0xff] }
 0x177   : > { %v601_v47 = vadd.f32 %v597_v32, %v520_v46 }
 0x179   : > { %602 = vst.msk [vmem:[%s1249_s30] sm:$0xff] %vm269_vm2, %v601_v47 }
 0x180   : > { %v603_v48 = vld [vmem:[%s1249_s30] sm:$0xff] }
 0x181   : > { %v684_v49 = vadd.f32 %v680_v33, %v603_v48 }
 0x183   : > { %685 = vst.msk [vmem:[%s1249_s30] sm:$0xff] %vm269_vm2, %v684_v49 }
 0x18a   : > { %v686_v50 = vld [vmem:[%s1249_s30] sm:$0xff] }
 0x18b   : > { %v767_v51 = vadd.f32 %v763_v38, %v686_v50 }
 0x18d   : > { %768 = vst.msk [vmem:[%s1249_s30] sm:$0xff] %vm269_vm2, %v767_v51 }
 0x194   : > { %v769_v52 = vld [vmem:[%s1249_s30] sm:$0xff] }
 0x195   : > { %v850_v53 = vadd.f32 %v846_v39, %v769_v52 }
 0x197   : > { %851 = vst.msk [vmem:[%s1249_s30] sm:$0xff] %vm269_vm2, %v850_v53 }
 0x19e   : > { %v852_v54 = vld [vmem:[%s1249_s30] sm:$0xff] }
 0x19f   : > { %v933_v55 = vadd.f32 %v929_v42, %v852_v54 }
 0x1a1   : > { %934 = vst.msk [vmem:[%s1249_s30] sm:$0xff] %vm269_vm2, %v933_v55 }
 0x1a8   : > { %v935_v57 = vld [vmem:[%s1249_s30] sm:$0xff] }
 0x1a9   : > { %v942_v59 = vmul.f32 %v940_v56, %v935_v57 }
 0x1ab   : > { %v949_v60 = vadd.f32 %v947_v58, %v942_v59 }
 0x1ad   : > { %v950_v61 = vmax.f32 %v949_v60, 0.0 }
 0x1af   : > { %951 = vst.msk [vmem:[%s1249_s30] sm:$0xff] %vm269_vm2, %v950_v61 }
 0x1b0 PF: > { %s14_s15 = sadd.s32 1, %s1121_s15  }
 0x1b1   : > { %p11_p4 = scmp.ge.s32.totalorder %s14_s15, 4  }
 0x1b3   :  { %13 = sbr.rel (!%p11_p4) target bundleno = 1 (0x1), region = 74 }

// kernel: _lambda_.14
= control target key start
LH: loop header
LB: loop body
LE: loop exit
PB: predicated region body
PF: predicated region fallthrough
CT: control target
= control target key end

     0   :  { %s522_s15 = smov 0   ;;  %s524_s16 = smov 0   ;;  %s575_s0 = inlined_call_operand.vmem [shape: f32[2,8,64], index: 0, kind: input, shape index: {}]   ;;  %s576_s1 = inlined_call_operand.vmem [shape: f32[16,8], index: 1, kind: input, shape index: {}]   ;;  %s577_s2 = inlined_call_operand.vmem [shape: f32[16,1], index: 2, kind: input, shape index: {}]   ;;  %s578_s3 = inlined_call_operand.vmem [shape: f32[16,1], index: 3, kind: input, shape index: {}]   ;;  %s579_s4 = inlined_call_operand.vmem [shape: f32[2,16,64], index: 4, kind: output, shape index: {}]  }
   0x1   :  { %s526_s17 = smov 0  }
   0x2 LB: > { %s26_s18 = sadd.s32 1, %s490_s16  ;;  %p428_p0 = scmp.ge.s32.totalorder %s494_s17, 1  ;;  %s494_s17 = sphi %s526_s17, %s14_s17   ;;  %s490_s16 = sphi %s524_s16, %s581_s16   ;;  %s486_s15 = sphi %s522_s15, %s580_s15  }
   0x3   : > { %p28_p1 = scmp.ge.s32.totalorder %s26_s18, 2  ;;  %p180_p2 = scmp.lt.s32.totalorder %s494_s17, 3 }
   0x5   : > { %s583_s18 = smov (%p28_p1, %s26_s18), 0  ;;  %p181_p3 = pnand %p428_p0, %p180_p2 }
   0x6   : > { %p211_p4 = scmp.lt.s32.totalorder (!%p181_p3), %s486_s15, 1  ;;  %v227_v0 = vld [vmem:[%s576_s1] sm:$0xff] (!%p181_p3)  ;;  %vm229_vm0 = vcmask (!%p181_p3), 64512   ;;  %v496_v2 = vmov (!%p181_p3), 0   ;;  %v312_v4 = vld [vmem:[%s577_s2 + $0x8] sm:$0xff] (!%p181_p3)  ;;  %vm341_vm1 = vcmask (!%p181_p3), 523264  }
   0x7   : > { %184 = sbr.rel (%p181_p3) target bundleno = 240 (0xf0), region = 36  ;;  %v311_v1 = vld [vmem:[%s577_s2] sm:$0xff] (!%p181_p3)  ;;  %442 = vmatprep.mubr.msk.f32.mxu0 (!%p181_p3), %vm229_vm0, %v227_v0  ;;  %470 = vset.pattern.permute.xlu0 (!%p181_p3), %v496_v2  ;;  %v326_v5 = vld [vmem:[%s578_s3 + $0x8] sm:$0xff] (!%p181_p3) }
   0x8   : > { %v325_v3 = vld [vmem:[%s578_s3] sm:$0xff] (!%p181_p3)  ;;  %315 = vperm.xlu0 (!%p181_p3), %470, %v311_v1   ;;  %471 = vset.pattern.permute.xlu1 (!%p181_p3), %v496_v2  ;;  %v228_v7 = vld [vmem:[%s576_s1 + $0x8] sm:$0xff] (!%p181_p3) }
   0x9   : > { %329 = vperm.xlu1 (!%p181_p3), %471, %v325_v3  }
   0xc   : > { %320 = vperm.xlu0 (!%p181_p3), %470, %v312_v4  }
   0xd   : > { %334 = vperm.xlu1 (!%p181_p3), %471, %v326_v5  }
   0xe   : > { %s585_s15 = smov (!%p211_p4, %s486_s15), 1 }
   0xf   : > { %s429_s27 = sshll.u32 %s585_s15, 3  ;;  %s436_s9 = sshll.u32 %s585_s15, 4 }
  0x10   : > { %s217_s6 = scalar_lea.vmem %s575_s0, %s429_s27  ;;  %s225_s12 = scalar_lea.vmem %s579_s4, %s436_s9 }
  0x11   : > { %v226_v6 = vld [vmem:[%s217_s6] sm:$0xff] }
  0x12   : > { %440 = vmatprep.subr.mxu0 %v226_v6 }
  0x13   : > { %441 = vmatpush3.msra.mxu0 %v226_v6 }
  0x14   : > { %443 = vmatmul.mubr.msk.f32.vlgmr.msra.gmra.mrb[0].mxu0 %vm229_vm0, %v228_v7 }
  0x87   : > { %v316_v8 = vpop.permute.xlu0 %315 }
  0x88   : > { %v330_v9 = vpop.permute.xlu1 %329 }
  0x8b   : > { %v321_v10 = vpop.permute.xlu0 %320 }
  0x8c   : > { %v335_v14 = vpop.permute.xlu1 %334 }
  0xe7   : > { %v444_v11 = vpop.f32.mrb[0].mxu0 }
  0xe8   : > { %v324_v12 = vmul.f32 %v444_v11, %v321_v10  ;;  %v302_v13 = vpop.f32.mrb[1].mxu0 }
  0xe9   : > { %v323_v15 = vmul.f32 %v316_v8, %v302_v13 }
  0xea   : > { %v338_v16 = vadd.f32 %v335_v14, %v324_v12 }
  0xeb   : > { %v337_v17 = vadd.f32 %v330_v9, %v323_v15 }
  0xec   : > { %v340_v18 = vmax.f32 %v338_v16, 0.0 }
  0xed   : > { %v339_v19 = vmax.f32 %v337_v17, 0.0 }
  0xee   : > { %343 = vst.msk [vmem:[%s225_s12 + $0x8] sm:$0xff] %vm341_vm1, %v340_v18 }
  0xef   : > { %342 = vst.msk [vmem:[%s225_s12] sm:$0xff] %vm341_vm1, %v339_v19 }
  0xf0 PF: > { %s14_s17 = sadd.s32 1, %s494_s17   ;;  %s580_s15 = smov %s490_s16 }
  0xf1   : > { %p11_p5 = scmp.ge.s32.totalorder %s14_s17, 4   ;;  %s581_s16 = smov %s583_s18 }
  0xf3   :  { %13 = sbr.rel (!%p11_p5) target bundleno = 2 (0x2), region = 66 }

// kernel: _lambda_.16
= control target key start
LH: loop header
LB: loop body
LE: loop exit
PB: predicated region body
PF: predicated region fallthrough
CT: control target
= control target key end

     0   :  { %s573_s18 = smov 0   ;;  %s618_s0 = inlined_call_operand.vmem [shape: f32[2,16,16], index: 0, kind: input, shape index: {}]   ;;  %s619_s1 = inlined_call_operand.vmem [shape: f32[2,16], index: 1, kind: input, shape index: {}]   ;;  %s620_s2 = inlined_call_operand.vmem [shape: f32[2,1], index: 2, kind: input, shape index: {}]   ;;  %s621_s3 = inlined_call_operand.vmem [shape: f32[16,2], index: 3, kind: input, shape index: {}]   ;;  %s622_s4 = inlined_call_operand.vmem [shape: f32[16,1], index: 4, kind: input, shape index: {}]   ;;  %s623_s5 = inlined_call_operand.vmem [shape: f32[2,16,1], index: 5, kind: output, shape index: {}]  }
   0x1 LB: > { %s473_s19 = sadd.s32 4294967295, %s538_s18   ;;  %p477_p0 = scmp.ge.s32.totalorder %s538_s18, 1  ;;  %s538_s18 = sphi %s573_s18, %s15_s18  }
   0x2   : > { %p187_p1 = scmp.lt.s32.totalorder %s538_s18, 3 }
   0x4   : > { %p188_p2 = pnand %p477_p0, %p187_p1 }
   0x5   : > { %p215_p3 = scmp.lt.s32.totalorder (!%p188_p2), %s473_s19, 1  ;;  %vm227_vm0 = vcmask (!%p188_p2), 130048   ;;  %v540_v4 = vmov (!%p188_p2), 0.0|0.0   ;;  %vm541_vm1 = vmmov (!%p188_p2), 0   ;;  %v542_v5 = vmov (!%p188_p2), 0.0   ;;  %v313_v12 = vld [vmem:[%s621_s3] sm:$0xff] (!%p188_p2) }
   0x6   : > { %191 = sbr.rel (%p188_p2) target bundleno = 631 (0x277), region = 40  ;;  %510 = vmatprep.subr.bf16.mxu0 (!%p188_p2), %v540_v4  ;;  %502 = vmatprep.mubr.msk.f32.mxu0 (!%p188_p2), %vm541_vm1, %v542_v5  ;;  %v237_v11 = vld [vmem:[%s619_s1] sm:$0x3] (!%p188_p2)  ;;  %vm317_vm2 = vcmask (!%p188_p2), 15360   ;;  %vm324_vm3 = vcmask (!%p188_p2), 1041408   ;;  %v314_v18 = vld [vmem:[%s621_s3 + $0x8] sm:$0xff] (!%p188_p2) }
   0x7   : > { %507 = vmatprep.mubr.msk.f32.mxu1 (!%p188_p2), %vm317_vm2, %v313_v12  ;;  %v238_v13 = vld [vmem:[%s620_s2] sm:$0x3] (!%p188_p2)  ;;  %v316_v19 = vld [vmem:[%s622_s4 + $0x8] sm:$0xff] (!%p188_p2)  ;;  %vm415_vm4 = vcmask (!%p188_p2), 7168  }
   0x8   : > { %v315_v20 = vld [vmem:[%s622_s4] sm:$0xff] (!%p188_p2) }
   0xd   : > { %s625_s19 = smov (!%p215_p3, %s473_s19), 1 }
   0xe   : > { %s490_s20 = sshll.u32 %s625_s19, 4 }
   0xf   : > { %s219_s23 = scalar_lea.vmem %s618_s0, %s490_s20  ;;  %s224_s13 = scalar_lea.vmem %s623_s5, %s490_s20 }
  0x10   : > { %v225_v0 = vld [vmem:[%s219_s23] sm:$0xff]  ;;  %v226_v1 = vld [vmem:[%s219_s23 + $0x8] sm:$0xff] }
  0x11   : > { %v228_v2 = vsel %vm227_vm0, %v225_v0, 0.0  ;;  %v231_v3 = vsel %vm227_vm0, %v226_v1, 0.0 }
  0x12   : > { %229 = vadd.xlane.f32.xlu0 %v228_v2 }
  0x16   : > { %232 = vadd.xlane.f32.xlu0 %v231_v3 }
  0x9f   : > { %v230_v6 = vpop.xlane.xlu0 %229 }
  0xa0   : > { %v235_v8 = vmul.f32 0.0625, %v230_v6 }
  0xa3   : > { %v233_v7 = vpop.xlane.xlu0 %232 }
  0xa4   : > { %v236_v9 = vmul.f32 0.0625, %v233_v7 }
  0xa6   : > { %v511_v10 = vpack.c.bf16 %v236_v9, %v235_v8 }
  0xa8   : > { %512 = vmatpush3.bf16.msra.mxu0 %v511_v10 }
  0xab   : > { %503 = vmatmul.mubr.msk.f32.vlgmr.msra.gmra.mrb[0].mxu0 %vm227_vm0, %v237_v11 }
 0x17e   : > { %v308_v14 = vpop.f32.mrb[0].mxu0 }
 0x17f   : > { %v309_v15 = vadd.f32 %v308_v14, %v238_v13  ;;  %v504_v16 = vpop.f32.mrb[1].mxu0 }
 0x181   : > { %v312_v17 = vmax.f32 %v309_v15, 0.0 }
 0x183   : > { %505 = vmatprep.subr.msk.mxu1 %vm324_vm3, %v312_v17 }
 0x184   : > { %506 = vmatpush3.msk.msra.mxu1 %vm324_vm3, %v312_v17 }
 0x185   : > { %508 = vmatmul.mubr.msk.f32.vlgmr.msra.gmra.mrb[0].mxu1 %vm317_vm2, %v314_v18 }
 0x258   : > { %v509_v21 = vpop.f32.mrb[0].mxu1 }
 0x259   : > { %v400_v22 = vadd.f32 %v509_v21, %v316_v19  ;;  %v394_v23 = vpop.f32.mrb[1].mxu1 }
 0x25a   : > { %v395_v24 = vadd.f32 %v394_v23, %v315_v20 }
 0x25b   : > { %v487_v25 = vmul.f32 -1.442695, %v400_v22 }
 0x25c   : > { %v486_v26 = vmul.f32 -1.442695, %v395_v24 }
 0x25d   : > { %524 = vpow2.f32 %v487_v25 }
 0x25e   : > { %526 = vpow2.f32 %v486_v26 }
 0x267   : > { %v525_v27 = vpop.eup %524 }
 0x268   : > { %v527_v28 = vpop.eup %526  ;;  %v410_v29 = vadd.f32 1.0, %v525_v27 }
 0x269   : > { %v409_v30 = vadd.f32 1.0, %v527_v28 }
 0x26a   : > { %528 = vrcp.f32 %v410_v29 }
 0x26b   : > { %530 = vrcp.f32 %v409_v30 }
 0x274   : > { %v529_v31 = vpop.eup %528 }
 0x275   : > { %v531_v32 = vpop.eup %530  ;;  %417 = vst.msk [vmem:[%s224_s13 + $0x8] sm:$0xff] %vm415_vm4, %v529_v31 }
 0x276   : > { %416 = vst.msk [vmem:[%s224_s13] sm:$0xff] %vm415_vm4, %v531_v32 }
 0x277 PF: > { %s15_s18 = sadd.s32 1, %s538_s18  }
 0x278   : > { %p12_p4 = scmp.ge.s32.totalorder %s15_s18, 4  }
 0x27a   :  { %14 = sbr.rel (!%p12_p4) target bundleno = 1 (0x1), region = 70 }

// kernel: _lambda_.17
= control target key start
LH: loop header
LB: loop body
LE: loop exit
PB: predicated region body
PF: predicated region fallthrough
CT: control target
= control target key end

     0   :  { %s915_s30 = smov 0   ;;  %s917_s10 = smov 0   ;;  %s1001_s0 = inlined_call_operand.vmem [shape: f32[2,16,16], index: 0, kind: input, shape index: {}]   ;;  %s1002_s1 = inlined_call_operand.vmem [shape: f32[16,16], index: 1, kind: input, shape index: {}]   ;;  %s1003_s2 = inlined_call_operand.vmem [shape: f32[16,1], index: 2, kind: input, shape index: {}]   ;;  %s1004_s3 = inlined_call_operand.vmem [shape: f32[16,1], index: 3, kind: input, shape index: {}]   ;;  %s1005_s4 = inlined_call_operand.vmem [shape: f32[2,16,1], index: 4, kind: input, shape index: {}]   ;;  %s1006_s5 = inlined_call_operand.vmem [shape: f32[2,8,16], index: 5, kind: input, shape index: {}]   ;;  %s1007_s6 = inlined_call_operand.vmem [shape: f32[16,8], index: 6, kind: input, shape index: {}]   ;;  %s1008_s7 = inlined_call_operand.vmem [shape: f32[16,1], index: 7, kind: input, shape index: {}]   ;;  %s1009_s8 = inlined_call_operand.vmem [shape: f32[16,1], index: 8, kind: input, shape index: {}]   ;;  %s1010_s9 = inlined_call_operand.vmem [shape: f32[2,16,16], index: 9, kind: output, shape index: {}]  }
   0x1   :  { %s919_s11 = smov 0  }
   0x2 LB: > { %s31_s12 = sadd.s32 1, %s858_s10  ;;  %p773_p0 = scmp.ge.s32.totalorder %s862_s11, 1  ;;  %s862_s11 = sphi %s919_s11, %s19_s11   ;;  %s858_s10 = sphi %s917_s10, %s1012_s10   ;;  %s854_s30 = sphi %s915_s30, %s1011_s30  }
   0x3   : > { %p33_p1 = scmp.ge.s32.totalorder %s31_s12, 2  ;;  %p330_p2 = scmp.lt.s32.totalorder %s862_s11, 3 }
   0x5   : > { %s1014_s12 = smov (%p33_p1, %s31_s12), 0  ;;  %p331_p3 = pnand %p773_p0, %p330_p2 }
   0x6   : > { %p384_p4 = scmp.lt.s32.totalorder (!%p331_p3), %s854_s30, 1  ;;  %v540_v0 = vld [vmem:[%s1007_s6] sm:$0xff] (!%p331_p3)  ;;  %vm543_vm0 = vcmask (!%p331_p3), 64512   ;;  %v864_v1 = vmov (!%p331_p3), 0   ;;  %v541_v4 = vld [vmem:[%s1007_s6 + $0x8] sm:$0xff] (!%p331_p3)  ;;  %vm430_vm1 = vcmask (!%p331_p3), 130048  }
   0x7   : > { %334 = sbr.rel (%p331_p3) target bundleno = 381 (0x17d), region = 56  ;;  %838 = vset.pattern.permute.xlu0 (!%p331_p3), %v864_v1  ;;  %806 = vmatprep.mubr.msk.f32.mxu1 (!%p331_p3), %vm543_vm0, %v540_v0  ;;  %v625_v6 = vld [vmem:[%s1008_s7] sm:$0xff] (!%p331_p3)  ;;  %v513_v11 = vld [vmem:[%s1003_s2 + $0x8] sm:$0xff] (!%p331_p3) }
   0x8   : > { %839 = vset.pattern.permute.xlu1 (!%p331_p3), %v864_v1  ;;  %v526_v7 = vld [vmem:[%s1004_s3] sm:$0xff] (!%p331_p3)  ;;  %v626_v12 = vld [vmem:[%s1008_s7 + $0x8] sm:$0xff] (!%p331_p3) }
   0x9   : > { %v428_v8 = vld [vmem:[%s1002_s1] sm:$0xff] (!%p331_p3)  ;;  %v527_v13 = vld [vmem:[%s1004_s3 + $0x8] sm:$0xff] (!%p331_p3) }
   0xa   : > { %801 = vmatprep.mubr.msk.f32.mxu0 (!%p331_p3), %vm430_vm1, %v428_v8  ;;  %v639_v9 = vld [vmem:[%s1009_s8] sm:$0xff] (!%p331_p3)  ;;  %v640_v14 = vld [vmem:[%s1009_s8 + $0x8] sm:$0xff] (!%p331_p3) }
   0xb   : > { %v512_v10 = vld [vmem:[%s1003_s2] sm:$0xff] (!%p331_p3)  ;;  %v429_v22 = vld [vmem:[%s1002_s1 + $0x8] sm:$0xff] (!%p331_p3) }
   0xc   : > { %516 = vperm.xlu1 (!%p331_p3), %839, %v512_v10  }
   0xe   : > { %s1016_s30 = smov (!%p384_p4, %s854_s30), 1 }
   0xf   : > { %s778_s15 = sshll.u32 %s1016_s30, 3  ;;  %s937_s16 = sshll.u32 %s1016_s30, 4 }
  0x10   : > { %s403_s19 = scalar_lea.vmem %s1006_s5, %s778_s15  ;;  %s396_s22 = scalar_lea.vmem %s1005_s4, %s937_s16  ;;  %521 = vperm.xlu1 %839, %v513_v11  }
  0x11   : > { %v542_v2 = vld [vmem:[%s403_s19] sm:$0xff]  ;;  %v415_v5 = vld [vmem:[%s396_s22 + $0x8] sm:$0xff]  ;;  %s391_s28 = scalar_lea.vmem %s1001_s0, %s937_s16  ;;  %s411_s15 = scalar_lea.vmem %s1010_s9, %s937_s16 }
  0x12   : > { %v414_v3 = vld [vmem:[%s396_s22] sm:$0xff]  ;;  %804 = vmatprep.subr.mxu1 %v542_v2  ;;  %v413_v17 = vld [vmem:[%s391_s28 + $0x8] sm:$0xff] }
  0x13   : > { %418 = vperm.xlu0 %838, %v414_v3   ;;  %805 = vmatpush3.msra.mxu1 %v542_v2  ;;  %v412_v16 = vld [vmem:[%s391_s28] sm:$0xff] }
  0x14   : > { %807 = vmatmul.mubr.msk.f32.vlgmr.msra.gmra.mrb[0].mxu1 %vm543_vm0, %v541_v4  ;;  %634 = vperm.xlu1 %839, %v626_v12  }
  0x17   : > { %423 = vperm.xlu0 %838, %v415_v5  }
  0x18   : > { %535 = vperm.xlu1 %839, %v527_v13  }
  0x1b   : > { %629 = vperm.xlu0 %838, %v625_v6  }
  0x1c   : > { %648 = vperm.xlu1 %839, %v640_v14  }
  0x1f   : > { %530 = vperm.xlu0 %838, %v526_v7  }
  0x23   : > { %643 = vperm.xlu0 %838, %v639_v9  }
  0x8b   : > { %v517_v25 = vpop.permute.xlu1 %516 }
  0x8f   : > { %v522_v26 = vpop.permute.xlu1 %521 }
  0x92   : > { %v419_v15 = vpop.permute.xlu0 %418 }
  0x93   : > { %v426_v19 = vmul.f32 %v419_v15, %v412_v16  ;;  %v635_v27 = vpop.permute.xlu1 %634 }
  0x96   : > { %v424_v18 = vpop.permute.xlu0 %423 }
  0x97   : > { %v427_v20 = vmul.f32 %v424_v18, %v413_v17  ;;  %v536_v29 = vpop.permute.xlu1 %535 }
  0x99   : > { %v809_v21 = vpack.c.bf16 %v427_v20, %v426_v19 }
  0x9a   : > { %v630_v28 = vpop.permute.xlu0 %629 }
  0x9b   : > { %810 = vmatprep.subr.bf16.mxu0 %v809_v21  ;;  %v649_v33 = vpop.permute.xlu1 %648 }
  0x9c   : > { %812 = vmatpush3.bf16.msra.mxu0 %v809_v21 }
  0x9e   : > { %v531_v30 = vpop.permute.xlu0 %530 }
  0x9f   : > { %802 = vmatmul.mubr.msk.f32.vlgmr.msra.gmra.mrb[0].mxu0 %vm430_vm1, %v429_v22 }
  0xa2   : > { %v644_v38 = vpop.permute.xlu0 %643 }
  0xe7   : > { %v808_v23 = vpop.f32.mrb[0].mxu1 }
  0xe8   : > { %v616_v24 = vpop.f32.mrb[1].mxu1  ;;  %v638_v31 = vmul.f32 %v808_v23, %v635_v27 }
  0xe9   : > { %v637_v32 = vmul.f32 %v630_v28, %v616_v24 }
  0xea   : > { %v652_v39 = vadd.f32 %v649_v33, %v638_v31 }
  0xeb   : > { %v651_v41 = vadd.f32 %v644_v38, %v637_v32 }
 0x172   : > { %v803_v34 = vpop.f32.mrb[0].mxu0 }
 0x173   : > { %v525_v35 = vmul.f32 %v803_v34, %v522_v26  ;;  %v503_v36 = vpop.f32.mrb[1].mxu0 }
 0x174   : > { %v524_v37 = vmul.f32 %v517_v25, %v503_v36 }
 0x175   : > { %v539_v40 = vadd.f32 %v536_v29, %v525_v35 }
 0x176   : > { %v538_v42 = vadd.f32 %v531_v30, %v524_v37 }
 0x177   : > { %v654_v43 = vadd.f32 %v652_v39, %v539_v40 }
 0x178   : > { %v653_v44 = vadd.f32 %v651_v41, %v538_v42 }
 0x179   : > { %v656_v45 = vmax.f32 %v654_v43, 0.0 }
 0x17a   : > { %v655_v46 = vmax.f32 %v653_v44, 0.0 }
 0x17b   : > { %658 = vst.msk [vmem:[%s411_s15 + $0x8] sm:$0xff] %vm430_vm1, %v656_v45 }
 0x17c   : > { %657 = vst.msk [vmem:[%s411_s15] sm:$0xff] %vm430_vm1, %v655_v46 }
 0x17d PF: > { %s19_s11 = sadd.s32 1, %s862_s11   ;;  %s1011_s30 = smov %s858_s10 }
 0x17e   : > { %p16_p5 = scmp.ge.s32.totalorder %s19_s11, 4   ;;  %s1012_s10 = smov %s1014_s12 }
 0x180   :  { %18 = sbr.rel (!%p16_p5) target bundleno = 2 (0x2), region = 92 }

// kernel: _lambda_.15
= control target key start
LH: loop header
LB: loop body
LE: loop exit
PB: predicated region body
PF: predicated region fallthrough
CT: control target
= control target key end

     0   :  { %s1459_s15 = smov 0   ;;  %s1627_s0 = inlined_call_operand.vmem [shape: f32[2,16,120], index: 0, kind: input, shape index: {}]   ;;  %s1628_s1 = inlined_call_operand.vmem [shape: f32[9,16,16], index: 1, kind: input, shape index: {}]   ;;  %s1629_s2 = inlined_call_operand.vmem [shape: f32[16,1], index: 2, kind: input, shape index: {}]   ;;  %s1630_s3 = inlined_call_operand.vmem [shape: f32[16,1], index: 3, kind: input, shape index: {}]   ;;  %s1631_s4 = inlined_call_operand.vmem [shape: f32[2,16,70], index: 4, kind: output, shape index: {}]  }
   0x1 LB: > { %s1176_s16 = sadd.s32 4294967295, %s1423_s15   ;;  %p1180_p0 = scmp.ge.s32.totalorder %s1423_s15, 1  ;;  %s1423_s15 = sphi %s1459_s15, %s14_s15  }
   0x2   : > { %p162_p1 = scmp.lt.s32.totalorder %s1423_s15, 3 }
   0x4   : > { %p163_p2 = pnand %p1180_p0, %p162_p1 }
   0x5   : > { %p188_p3 = scmp.lt.s32.totalorder (!%p163_p2), %s1176_s16, 1  ;;  %v198_v0 = vld [vmem:[%s1628_s1] sm:$0xff] (!%p163_p2)  ;;  %vm202_vm0 = vcmask (!%p163_p2), 130048   ;;  %v1187_v1 = vld [vmem:[%s1628_s1 + $0x10] sm:$0xff] (!%p163_p2)  ;;  %s1425_s25 = smov (!%p163_p2), 127   ;;  %v199_v6 = vld [vmem:[%s1628_s1 + $0x8] sm:$0xff] (!%p163_p2) }
   0x6   : > { %166 = sbr.rel (%p163_p2) target bundleno = 442 (0x1ba), region = 36  ;;  %1263 = vmatprep.mubr.msk.f32.mxu0 (!%p163_p2), %vm202_vm0, %v198_v0  ;;  %1270 = vmatprep.mubr.msk.f32.mxu1 (!%p163_p2), %vm202_vm0, %v1187_v1  ;;  %s1426_s26 = smov (!%p163_p2), 118   ;;  %v1191_v7 = vld [vmem:[%s1628_s1 + $0x20] sm:$0xff] (!%p163_p2)  ;;  %v1433_v8 = vmov (!%p163_p2), 0   ;;  %v1090_v9 = vld [vmem:[%s1629_s2 + $0x8] sm:$0xff] (!%p163_p2)  ;;  %v1188_v27 = vld [vmem:[%s1628_s1 + $0x18] sm:$0xff] (!%p163_p2) }
   0x7   : > { %s1427_s5 = smov (!%p163_p2), 126   ;;  %s1428_s6 = smov (!%p163_p2), 117   ;;  %1416 = vset.pattern.permute.xlu1 (!%p163_p2), %v1433_v8  ;;  %1415 = vset.pattern.permute.xlu0 (!%p163_p2), %v1433_v8  ;;  %v1089_v10 = vld [vmem:[%s1629_s2] sm:$0xff] (!%p163_p2)  ;;  %v1104_v12 = vld [vmem:[%s1630_s3 + $0x8] sm:$0xff] (!%p163_p2)  ;;  %v1195_v30 = vld [vmem:[%s1628_s1 + $0x30] sm:$0xff] (!%p163_p2)  ;;  %vm284_vm1 = vcmask (!%p163_p2), 572416  }
   0x8   : > { %s1429_s7 = smov (!%p163_p2), 116   ;;  %s1430_s8 = smov (!%p163_p2), 108   ;;  %v1103_v11 = vld [vmem:[%s1630_s3] sm:$0xff] (!%p163_p2)  ;;  %v1192_v37 = vld [vmem:[%s1628_s1 + $0x28] sm:$0xff] (!%p163_p2)  ;;  %v1196_v38 = vld [vmem:[%s1628_s1 + $0x38] sm:$0xff] (!%p163_p2) }
   0x9   : > { %s1431_s9 = smov (!%p163_p2), 107   ;;  %s1432_s10 = smov (!%p163_p2), 106   ;;  %v1199_v39 = vld [vmem:[%s1628_s1 + $0x40] sm:$0xff] (!%p163_p2)  ;;  %v1203_v41 = vld [vmem:[%s1628_s1 + $0x50] sm:$0xff] (!%p163_p2)  ;;  %v1200_v49 = vld [vmem:[%s1628_s1 + $0x48] sm:$0xff] (!%p163_p2) }
   0xa   : > { %v1207_v50 = vld [vmem:[%s1628_s1 + $0x60] sm:$0xff] (!%p163_p2)  ;;  %v1204_v53 = vld [vmem:[%s1628_s1 + $0x58] sm:$0xff] (!%p163_p2)  ;;  %v1211_v54 = vld [vmem:[%s1628_s1 + $0x70] sm:$0xff] (!%p163_p2) }
   0xb   : > { %v1208_v55 = vld [vmem:[%s1628_s1 + $0x68] sm:$0xff] (!%p163_p2)  ;;  %v1215_v56 = vld [vmem:[%s1628_s1 + $0x80] sm:$0xff] (!%p163_p2)  ;;  %v1212_v57 = vld [vmem:[%s1628_s1 + $0x78] sm:$0xff] (!%p163_p2) }
   0xc   : > { %v1216_v58 = vld [vmem:[%s1628_s1 + $0x88] sm:$0xff] (!%p163_p2) }
   0xd   : > { %s1633_s16 = smov (!%p188_p3, %s1176_s16), 1 }
   0xe   : > { %s1221_s21 = sshll.u32 %s1633_s16, 4 }
   0xf   : > { %s192_s24 = scalar_lea.vmem %s1627_s0, %s1221_s21  ;;  %s1564_s29 = scalar_lea.vmem %s1631_s4, %s1221_s21 }
  0x10   : > { %v292_v2 = vld [vmem:[%s192_s24] sm:$0xff]  ;;  %v293_v3 = vld [vmem:[%s192_s24 + $0x8] sm:$0xff] }
  0x11   : > { %v1375_v4 = vpack.i.bf16 %v293_v3, %v292_v2  ;;  %v1322_v5 = vpack.c.bf16 %v293_v3, %v292_v2 }
  0x13   : > { %1376 = vrot.lane.b32.xlu0 %v1375_v4, %s1425_s25  ;;  %1386 = vrot.lane.b32.xlu1 %v1375_v4, %s1426_s26 }
  0x14   : > { %1323 = vmatprep.subr.bf16.mxu0 %v1322_v5 }
  0x15   : > { %1325 = vmatpush3.bf16.msra.mxu0 %v1322_v5 }
  0x17   : > { %1381 = vrot.lane.b32.xlu0 %v1375_v4, %s1427_s5  ;;  %1391 = vrot.lane.b32.xlu1 %v1375_v4, %s1428_s6 }
  0x18   : > { %1264 = vmatmul.mubr.msk.f32.vlgmr.msra.gmra.mrb[0].mxu0 %vm202_vm0, %v199_v6 }
  0x19   : > { %1277 = vmatprep.mubr.msk.f32.mxu0 %vm202_vm0, %v1191_v7 }
  0x1b   : > { %1396 = vrot.lane.b32.xlu0 %v1375_v4, %s1429_s7  ;;  %1401 = vrot.lane.b32.xlu1 %v1375_v4, %s1430_s8 }
  0x1f   : > { %1406 = vrot.lane.b32.xlu0 %v1375_v4, %s1431_s9  ;;  %1411 = vrot.lane.b32.xlu1 %v1375_v4, %s1432_s10 }
  0x23   : > { %1098 = vperm.xlu1 %1416, %v1090_v9   ;;  %1093 = vperm.xlu0 %1415, %v1089_v10  }
  0x27   : > { %1107 = vperm.xlu1 %1416, %v1103_v11   ;;  %1112 = vperm.xlu0 %1415, %v1104_v12  }
  0x85   : > { %v1377_v13 = vpop.permute.xlu0 %1376  ;;  %v1387_v14 = vpop.permute.xlu1 %1386 }
  0x86   : > { %v1379_v15 = vunpack.i.h.bf16 %v1377_v13  ;;  %v1378_v16 = vunpack.i.l.bf16 %v1377_v13  ;;  %v1389_v17 = vunpack.i.h.bf16 %v1387_v14  ;;  %v1388_v18 = vunpack.i.l.bf16 %v1387_v14 }
  0x88   : > { %v1326_v19 = vpack.c.bf16 %v1379_v15, %v1378_v16  ;;  %v1334_v20 = vpack.c.bf16 %v1389_v17, %v1388_v18 }
  0x89   : > { %v1382_v21 = vpop.permute.xlu0 %1381  ;;  %v1392_v22 = vpop.permute.xlu1 %1391 }
  0x8a   : > { %1327 = vmatprep.subr.bf16.mxu1 %v1326_v19  ;;  %v1384_v23 = vunpack.i.h.bf16 %v1382_v21  ;;  %v1383_v24 = vunpack.i.l.bf16 %v1382_v21  ;;  %v1394_v25 = vunpack.i.h.bf16 %v1392_v22  ;;  %v1393_v26 = vunpack.i.l.bf16 %v1392_v22 }
  0x8b   : > { %1329 = vmatpush3.bf16.msra.mxu1 %v1326_v19 }
  0x8c   : > { %v1330_v28 = vpack.c.bf16 %v1384_v23, %v1383_v24  ;;  %1335 = vmatprep.subr.bf16.mxu1 %v1334_v20  ;;  %v1338_v29 = vpack.c.bf16 %v1394_v25, %v1393_v26 }
  0x8d   : > { %v1397_v31 = vpop.permute.xlu0 %1396  ;;  %v1402_v32 = vpop.permute.xlu1 %1401 }
  0x8e   : > { %1271 = vmatmul.mubr.msk.f32.vlgmr.msra.gmra.mrb[0].mxu1 %vm202_vm0, %v1188_v27  ;;  %1331 = vmatprep.subr.bf16.mxu0 %v1330_v28  ;;  %v1399_v33 = vunpack.i.h.bf16 %v1397_v31  ;;  %v1398_v34 = vunpack.i.l.bf16 %v1397_v31  ;;  %v1404_v35 = vunpack.i.h.bf16 %v1402_v32  ;;  %v1403_v36 = vunpack.i.l.bf16 %v1402_v32 }
  0x8f   : > { %1333 = vmatpush3.bf16.msra.mxu0 %v1330_v28  ;;  %1337 = vmatpush3.bf16.msra.mxu1 %v1334_v20 }
  0x90   : > { %1284 = vmatprep.mubr.msk.f32.mxu1 %vm202_vm0, %v1195_v30  ;;  %1339 = vmatprep.subr.bf16.mxu0 %v1338_v29  ;;  %v1342_v40 = vpack.c.bf16 %v1399_v33, %v1398_v34  ;;  %v1346_v42 = vpack.c.bf16 %v1404_v35, %v1403_v36 }
  0x91   : > { %v1407_v43 = vpop.permute.xlu0 %1406  ;;  %v1412_v44 = vpop.permute.xlu1 %1411 }
  0x92   : > { %1278 = vmatmul.mubr.msk.f32.vlgmr.msra.gmra.mrb[2].mxu0 %vm202_vm0, %v1192_v37  ;;  %1285 = vmatmul.mubr.msk.f32.vlgmr.msra.gmra.mrb[2].mxu1 %vm202_vm0, %v1196_v38  ;;  %v1409_v45 = vunpack.i.h.bf16 %v1407_v43  ;;  %v1408_v46 = vunpack.i.l.bf16 %v1407_v43  ;;  %v1414_v47 = vunpack.i.h.bf16 %v1412_v44  ;;  %v1413_v48 = vunpack.i.l.bf16 %v1412_v44 }
  0x93   : > { %1341 = vmatpush3.bf16.msra.mxu0 %v1338_v29  ;;  %1291 = vmatprep.mubr.msk.f32.mxu0 %vm202_vm0, %v1199_v39 }
  0x94   : > { %1343 = vmatprep.subr.bf16.mxu1 %v1342_v40  ;;  %1298 = vmatprep.mubr.msk.f32.mxu1 %vm202_vm0, %v1203_v41  ;;  %v1350_v51 = vpack.c.bf16 %v1409_v45, %v1408_v46  ;;  %v1354_v52 = vpack.c.bf16 %v1414_v47, %v1413_v48 }
  0x95   : > { %1345 = vmatpush3.bf16.msra.mxu1 %v1342_v40  ;;  %1347 = vmatprep.subr.bf16.mxu0 %v1346_v42 }
  0x96   : > { %1292 = vmatmul.mubr.msk.f32.vlgmr.msra.gmra.mrb[4].mxu0 %vm202_vm0, %v1200_v49  ;;  %1351 = vmatprep.subr.bf16.mxu1 %v1350_v51 }
  0x97   : > { %1349 = vmatpush3.bf16.msra.mxu0 %v1346_v42  ;;  %1305 = vmatprep.mubr.msk.f32.mxu0 %vm202_vm0, %v1207_v50 }
  0x98   : > { %1299 = vmatmul.mubr.msk.f32.vlgmr.msra.gmra.mrb[4].mxu1 %vm202_vm0, %v1204_v53  ;;  %1355 = vmatprep.subr.bf16.mxu0 %v1354_v52 }
  0x99   : > { %1353 = vmatpush3.bf16.msra.mxu1 %v1350_v51  ;;  %1312 = vmatprep.mubr.msk.f32.mxu1 %vm202_vm0, %v1211_v54 }
  0x9a   : > { %1306 = vmatmul.mubr.msk.f32.vlgmr.msra.gmra.mrb[6].mxu0 %vm202_vm0, %v1208_v55 }
  0x9b   : > { %1357 = vmatpush3.bf16.msra.mxu0 %v1354_v52  ;;  %1319 = vmatprep.mubr.msk.f32.mxu0 %vm202_vm0, %v1215_v56 }
  0x9c   : > { %1313 = vmatmul.mubr.msk.f32.vlgmr.msra.gmra.mrb[6].mxu1 %vm202_vm0, %v1212_v57 }
  0x9e   : > { %1320 = vmatmul.mubr.msk.f32.vlgmr.msra.gmra.mrb[8].mxu0 %vm202_vm0, %v1216_v58 }
  0xa2   : > { %v1094_v45 = vpop.permute.xlu0 %1093  ;;  %v1099_v46 = vpop.permute.xlu1 %1098 }
  0xa6   : > { %v1113_v51 = vpop.permute.xlu0 %1112  ;;  %v1108_v52 = vpop.permute.xlu1 %1107 }
  0xeb   : > { %v1265_v59 = vpop.f32.mrb[0].mxu0 }
  0xec   : > { %286 = vst.msk [vmem:[%s1564_s29 + $0x8] sm:$0xff] %vm284_vm1, %v1265_v59  ;;  %v275_v60 = vpop.f32.mrb[1].mxu0 }
  0xed   : > { %285 = vst.msk [vmem:[%s1564_s29] sm:$0xff] %vm284_vm1, %v275_v60 }
  0xf3   : > { %v288_v61 = vld [vmem:[%s1564_s29 + $0x8] sm:$0xff] }
  0xf4   : > { %v287_v62 = vld [vmem:[%s1564_s29] sm:$0xff] }
 0x161   : > { %v1272_v63 = vpop.f32.mrb[0].mxu1 }
 0x162   : > { %v384_v0 = vadd.f32 %v1272_v63, %v288_v61  ;;  %v374_v1 = vpop.f32.mrb[1].mxu1 }
 0x163   : > { %v383_v2 = vadd.f32 %v374_v1, %v287_v62 }
 0x164   : > { %386 = vst.msk [vmem:[%s1564_s29 + $0x8] sm:$0xff] %vm284_vm1, %v384_v0 }
 0x165   : > { %385 = vst.msk [vmem:[%s1564_s29] sm:$0xff] %vm284_vm1, %v383_v2  ;;  %v1279_v3 = vpop.f32.mrb[2].mxu0  ;;  %v1286_v4 = vpop.f32.mrb[2].mxu1 }
 0x166   : > { %v474_v5 = vpop.f32.mrb[3].mxu0  ;;  %v574_v6 = vpop.f32.mrb[3].mxu1 }
 0x169   : > { %v1293_v7 = vpop.f32.mrb[4].mxu0 }
 0x16a   : > { %v674_v8 = vpop.f32.mrb[5].mxu0 }
 0x16b   : > { %v388_v9 = vld [vmem:[%s1564_s29 + $0x8] sm:$0xff]  ;;  %v1300_v10 = vpop.f32.mrb[4].mxu1 }
 0x16c   : > { %v484_v11 = vadd.f32 %v1279_v3, %v388_v9  ;;  %v387_v12 = vld [vmem:[%s1564_s29] sm:$0xff]  ;;  %v774_v13 = vpop.f32.mrb[5].mxu1 }
 0x16d   : > { %v483_v14 = vadd.f32 %v474_v5, %v387_v12  ;;  %v1307_v15 = vpop.f32.mrb[6].mxu0 }
 0x16e   : > { %486 = vst.msk [vmem:[%s1564_s29 + $0x8] sm:$0xff] %vm284_vm1, %v484_v11  ;;  %v874_v16 = vpop.f32.mrb[7].mxu0 }
 0x16f   : > { %485 = vst.msk [vmem:[%s1564_s29] sm:$0xff] %vm284_vm1, %v483_v14  ;;  %v1314_v17 = vpop.f32.mrb[6].mxu1 }
 0x170   : > { %v974_v18 = vpop.f32.mrb[7].mxu1 }
 0x171   : > { %v1321_v19 = vpop.f32.mrb[8].mxu0 }
 0x172   : > { %v1074_v20 = vpop.f32.mrb[9].mxu0 }
 0x175   : > { %v488_v21 = vld [vmem:[%s1564_s29 + $0x8] sm:$0xff] }
 0x176   : > { %v584_v22 = vadd.f32 %v1286_v4, %v488_v21  ;;  %v487_v23 = vld [vmem:[%s1564_s29] sm:$0xff] }
 0x177   : > { %v583_v24 = vadd.f32 %v574_v6, %v487_v23 }
 0x178   : > { %586 = vst.msk [vmem:[%s1564_s29 + $0x8] sm:$0xff] %vm284_vm1, %v584_v22 }
 0x179   : > { %585 = vst.msk [vmem:[%s1564_s29] sm:$0xff] %vm284_vm1, %v583_v24 }
 0x17f   : > { %v588_v25 = vld [vmem:[%s1564_s29 + $0x8] sm:$0xff] }
 0x180   : > { %v684_v26 = vadd.f32 %v1293_v7, %v588_v25  ;;  %v587_v27 = vld [vmem:[%s1564_s29] sm:$0xff] }
 0x181   : > { %v683_v28 = vadd.f32 %v674_v8, %v587_v27 }
 0x182   : > { %686 = vst.msk [vmem:[%s1564_s29 + $0x8] sm:$0xff] %vm284_vm1, %v684_v26 }
 0x183   : > { %685 = vst.msk [vmem:[%s1564_s29] sm:$0xff] %vm284_vm1, %v683_v28 }
 0x189   : > { %v688_v29 = vld [vmem:[%s1564_s29 + $0x8] sm:$0xff] }
 0x18a   : > { %v784_v30 = vadd.f32 %v1300_v10, %v688_v29  ;;  %v687_v31 = vld [vmem:[%s1564_s29] sm:$0xff] }
 0x18b   : > { %v783_v32 = vadd.f32 %v774_v13, %v687_v31 }
 0x18c   : > { %786 = vst.msk [vmem:[%s1564_s29 + $0x8] sm:$0xff] %vm284_vm1, %v784_v30 }
 0x18d   : > { %785 = vst.msk [vmem:[%s1564_s29] sm:$0xff] %vm284_vm1, %v783_v32 }
 0x193   : > { %v788_v33 = vld [vmem:[%s1564_s29 + $0x8] sm:$0xff] }
 0x194   : > { %v884_v34 = vadd.f32 %v1307_v15, %v788_v33  ;;  %v787_v35 = vld [vmem:[%s1564_s29] sm:$0xff] }
 0x195   : > { %v883_v36 = vadd.f32 %v874_v16, %v787_v35 }
 0x196   : > { %886 = vst.msk [vmem:[%s1564_s29 + $0x8] sm:$0xff] %vm284_vm1, %v884_v34 }
 0x197   : > { %885 = vst.msk [vmem:[%s1564_s29] sm:$0xff] %vm284_vm1, %v883_v36 }
 0x19d   : > { %v888_v37 = vld [vmem:[%s1564_s29 + $0x8] sm:$0xff] }
 0x19e   : > { %v984_v38 = vadd.f32 %v1314_v17, %v888_v37  ;;  %v887_v39 = vld [vmem:[%s1564_s29] sm:$0xff] }
 0x19f   : > { %v983_v40 = vadd.f32 %v974_v18, %v887_v39 }
 0x1a0   : > { %986 = vst.msk [vmem:[%s1564_s29 + $0x8] sm:$0xff] %vm284_vm1, %v984_v38 }
 0x1a1   : > { %985 = vst.msk [vmem:[%s1564_s29] sm:$0xff] %vm284_vm1, %v983_v40 }
 0x1a7   : > { %v988_v41 = vld [vmem:[%s1564_s29 + $0x8] sm:$0xff] }
 0x1a8   : > { %v1084_v42 = vadd.f32 %v1321_v19, %v988_v41  ;;  %v987_v43 = vld [vmem:[%s1564_s29] sm:$0xff] }
 0x1a9   : > { %v1083_v44 = vadd.f32 %v1074_v20, %v987_v43 }
 0x1aa   : > { %1086 = vst.msk [vmem:[%s1564_s29 + $0x8] sm:$0xff] %vm284_vm1, %v1084_v42 }
 0x1ab   : > { %1085 = vst.msk [vmem:[%s1564_s29] sm:$0xff] %vm284_vm1, %v1083_v44 }
 0x1b1   : > { %v1088_v47 = vld [vmem:[%s1564_s29 + $0x8] sm:$0xff] }
 0x1b2   : > { %v1102_v48 = vmul.f32 %v1099_v46, %v1088_v47  ;;  %v1087_v49 = vld [vmem:[%s1564_s29] sm:$0xff] }
 0x1b3   : > { %v1101_v50 = vmul.f32 %v1094_v45, %v1087_v49 }
 0x1b4   : > { %v1116_v53 = vadd.f32 %v1113_v51, %v1102_v48 }
 0x1b5   : > { %v1115_v54 = vadd.f32 %v1108_v52, %v1101_v50 }
 0x1b6   : > { %v1118_v55 = vmax.f32 %v1116_v53, 0.0 }
 0x1b7   : > { %v1117_v56 = vmax.f32 %v1115_v54, 0.0 }
 0x1b8   : > { %1120 = vst.msk [vmem:[%s1564_s29 + $0x8] sm:$0xff] %vm284_vm1, %v1118_v55 }
 0x1b9   : > { %1119 = vst.msk [vmem:[%s1564_s29] sm:$0xff] %vm284_vm1, %v1117_v56 }
 0x1ba PF: > { %s14_s15 = sadd.s32 1, %s1423_s15  }
 0x1bb   : > { %p11_p4 = scmp.ge.s32.totalorder %s14_s15, 4  }
 0x1bd   :  { %13 = sbr.rel (!%p11_p4) target bundleno = 1 (0x1), region = 74 }

</bundles_post_ra>
